<compile_context>
chip_gen: v5e
topology: v5e:2x2
jax: 0.10.0
libtpu: 0.0.40
codegen_flags: <defaults>
</compile_context>

<pallas_src>
import math

import jax
import jax.numpy as jnp
import numpy as np
from jax.experimental import pallas as pl
from jax.experimental.pallas import tpu as pltpu

EPS = 1e-5


# --------------------------- host-side weight packing ---------------------- #
def _pack_params(params, node_dims, edge_dims, hidden_dims):
    """Pack all GVP weights into a bf16 [rows, 128] slab (+ f32 bias slab).

    Weights are stored transposed ([in, out]) and pre-split so every in-kernel
    matmul is `activation @ slice` with no lane-axis concatenation:
      {pfx}_wh{i} : Wh.T split per vector-channel group (fuser: mean | cross)
      {pfx}_ws{i} : Ws.T rows for the i-th scalar input group (fuser: scal | dot)
      {pfx}_wsn   : Ws.T rows for the vector-norm input
      {pfx}_wv    : Wv.T
      {pfx}_wsv   : Wsv.T
    """
    ns, nv = node_dims
    es, ev = edge_dims
    hs, hv = hidden_dims
    layout = {
        "e1": (params[0], (es,), (ev,)),
        "e2": (params[1], (ns,), (nv,)),
        "n1": (params[2], (ns, nv), (nv, nv)),
        "n2": (params[3], (hs,), (hv,)),
    }
    wmats, bvecs = {}, {}
    for pfx, (layer, s_sizes, v_sizes) in layout.items():
        Wh, Ws, bs, Wv, Wsv, bsv = [jnp.asarray(x, jnp.float32) for x in layer]
        h = Wh.shape[0]
        WhT, WsT = Wh.T, Ws.T
        off = 0
        for i, sz in enumerate(v_sizes):
            wmats[f"{pfx}_wh{i}"] = WhT[off:off + sz]
            off += sz
        off = 0
        for i, sz in enumerate(s_sizes):
            wmats[f"{pfx}_ws{i}"] = WsT[off:off + sz]
            off += sz
        wmats[f"{pfx}_wsn"] = WsT[off:off + h]
        wmats[f"{pfx}_wv"] = Wv.T
        wmats[f"{pfx}_wsv"] = Wsv.T
        bvecs[f"{pfx}_bs"] = bs.reshape(1, -1)
        bvecs[f"{pfx}_bsv"] = bsv.reshape(1, -1)

    w_index, blocks, off = {}, [], 0
    for name, mat in wmats.items():
        r, c = mat.shape
        w_index[name] = (off, r, c)
        pad_r = (-r) % 8                       # keep every slice 8-row aligned
        blocks.append(jnp.pad(mat, ((0, pad_r), (0, 128 - c))))
        off += r + pad_r
    w_slab = jnp.concatenate(blocks, axis=0).astype(jnp.bfloat16)

    b_index, brows = {}, []
    for i, (name, vec) in enumerate(bvecs.items()):
        c = vec.shape[-1]
        b_index[name] = (i, c)
        brows.append(jnp.pad(vec, ((0, 0), (0, 128 - c))))
    b_slab = jnp.concatenate(brows, axis=0)    # [8, 128] f32
    return w_slab, b_slab, w_index, b_index


# --------------------------------- kernel ----------------------------------- #
def _make_kernel(tn, te, ns, nv, w_index, b_index):
    f32, bf16 = jnp.float32, jnp.bfloat16

    def kernel(row_ref, sn_ref, vn_ref, se_ref, ve_ref, w_ref, b_ref,
               out_ref, acc_ref):

        def W(name):
            o, r, c = w_index[name]
            return w_ref[o:o + r, :c]

        def B(name):
            i, c = b_index[name]
            return b_ref[i:i + 1, :c]

        def gvp(pfx, s_parts, v3_parts, rows, scalar_relu):
            """GVP with vector gating; xyz components stacked along sublanes."""
            h3 = None
            for i, v3 in enumerate(v3_parts):
                t = jnp.dot(v3.astype(bf16), W(f"{pfx}_wh{i}"),
                            preferred_element_type=f32)
                h3 = t if h3 is None else h3 + t
            hx, hy, hz = h3[0:rows], h3[rows:2 * rows], h3[2 * rows:3 * rows]
            vnorm = jnp.sqrt(jnp.maximum(hx * hx + hy * hy + hz * hz, EPS))
            s = B(f"{pfx}_bs") + jnp.dot(vnorm.astype(bf16), W(f"{pfx}_wsn"),
                                         preferred_element_type=f32)
            for i, sp in enumerate(s_parts):
                s = s + jnp.dot(sp.astype(bf16), W(f"{pfx}_ws{i}"),
                                preferred_element_type=f32)
            v3o = jnp.dot(h3.astype(bf16), W(f"{pfx}_wv"),
                          preferred_element_type=f32)
            gate = jax.nn.sigmoid(
                jnp.dot(jax.nn.sigmoid(s).astype(bf16), W(f"{pfx}_wsv"),
                        preferred_element_type=f32) + B(f"{pfx}_bsv"))
            v3o = v3o * jnp.concatenate([gate, gate, gate], axis=0)
            if scalar_relu:
                s = jax.nn.relu(s)
            return s, v3o

        n = pl.program_id(0)
        e = pl.program_id(1)

        @pl.when(e == 0)
        def _init():
            acc_ref[...] = jnp.zeros_like(acc_ref)

        # ---- edge_lin = GVP(relu) -> GVLinear, xyz stacked along sublanes ----
        se = se_ref[...]                                              # [te, es]
        v3e = jnp.concatenate([ve_ref[0], ve_ref[1], ve_ref[2]], axis=0)
        s_e, v3e = gvp("e1", [se], [v3e], te, True)
        s_e, v3e = gvp("e2", [s_e], [v3e], te, False)

        # ---- fused scatter_sum: one bf16 one-hot matmul, f32 accumulation ----
        # (assumes every row index lies in [0, N); padded/sentinel edges would
        #  need an explicit validity mask here)
        rhs = jnp.concatenate(
            [s_e, v3e[0:te], v3e[te:2 * te], v3e[2 * te:3 * te]],
            axis=-1).astype(bf16)                                     # [te, ns+3nv]
        ids = jax.lax.broadcasted_iota(jnp.int32, (tn, te), 0) + n * tn
        onehot = jnp.where(ids == row_ref[...], 1.0, 0.0).astype(bf16)
        acc_ref[...] += jnp.dot(onehot, rhs, preferred_element_type=f32)

        # ---- last edge tile: Fuser('cross') + node_lin + store --------------
        @pl.when(e == pl.num_programs(1) - 1)
        def _finalize():
            msg = acc_ref[...]
            msg_s = msg[:, 0:ns]
            mvx = msg[:, ns:ns + nv]
            mvy = msg[:, ns + nv:ns + 2 * nv]
            mvz = msg[:, ns + 2 * nv:ns + 3 * nv]
            sn = sn_ref[...]
            vnx, vny, vnz = vn_ref[0], vn_ref[1], vn_ref[2]
            scal = sn * msg_s
            dotp = vnx * mvx + vny * mvy + vnz * mvz
            m3 = jnp.concatenate([vnx + mvx, vny + mvy, vnz + mvz], axis=0) * 0.5
            c3 = jnp.concatenate([vny * mvz - vnz * mvy,
                                  vnz * mvx - vnx * mvz,
                                  vnx * mvy - vny * mvx], axis=0)
            s_n, v3n = gvp("n1", [scal, dotp], [m3, c3], tn, True)
            s_n, v3n = gvp("n2", [s_n], [v3n], tn, False)
            out_ref[...] = jnp.concatenate(
                [v3n[0:tn], v3n[tn:2 * tn], v3n[2 * tn:3 * tn]],
                axis=-1).astype(out_ref.dtype)

    return kernel


# -------------------------------- wrapper ----------------------------------- #
def pos_update_gvp(h_node, h_edge, edge_index, params,
                   node_dims, edge_dims, hidden_dims,
                   tile_n=256, tile_e=512):
    s_node, v_node = h_node            # [N, ns], [N, nv, 3]
    s_edge, v_edge = h_edge            # [E, es], [E, ev, 3]
    ns, nv = node_dims
    es, ev = edge_dims
    N, E = s_node.shape[0], s_edge.shape[0]

    tn = N if N <= tile_n else tile_n
    te = E if E <= tile_e else tile_e
    assert N % tn == 0 and (tn == N or tn % 8 == 0)
    assert E % te == 0 and (te == E or te % 128 == 0)

    w_slab, b_slab, w_index, b_index = _pack_params(
        params, node_dims, edge_dims, hidden_dims)

    row = edge_index[0].astype(jnp.int32).reshape(1, E)
    sn = s_node.astype(jnp.float32)                           # elementwise path: f32
    vn = jnp.moveaxis(v_node, -1, 0).astype(jnp.float32)      # [3, N, nv]
    se = s_edge.astype(jnp.bfloat16)                          # matmul-only: bf16
    ve = jnp.moveaxis(v_edge, -1, 0).astype(jnp.bfloat16)     # [3, E, ev]

    kernel = _make_kernel(tn, te, ns, nv, w_index, b_index)
    grid = (N // tn, E // te)

    return pl.pallas_call(
        kernel,
        grid_spec=pltpu.PrefetchScalarGridSpec(
            num_scalar_prefetch=0,
            grid=grid,
            in_specs=[
                pl.BlockSpec((1, te), lambda n, e: (0, e)),          # edge rows
                pl.BlockSpec((tn, ns), lambda n, e: (n, 0)),         # s_node
                pl.BlockSpec((3, tn, nv), lambda n, e: (0, n, 0)),   # v_node (xyz)
                pl.BlockSpec((te, es), lambda n, e: (e, 0)),         # s_edge
                pl.BlockSpec((3, te, ev), lambda n, e: (0, e, 0)),   # v_edge (xyz)
                pl.BlockSpec(w_slab.shape, lambda n, e: (0, 0)),     # weight slab
                pl.BlockSpec(b_slab.shape, lambda n, e: (0, 0)),     # bias slab
            ],
            out_specs=pl.BlockSpec((tn, 3), lambda n, e: (n, 0)),
            scratch_shapes=[pltpu.VMEM((tn, ns + 3 * nv), jnp.float32)],
        ),
        out_shape=jax.ShapeDtypeStruct((N, 3), jnp.float32),
        compiler_params=pltpu.CompilerParams(
            dimension_semantics=("parallel", "arbitrary")),
    )(row, sn, vn, se, ve, w_slab, b_slab)


# ------------------------ deterministic parameter init ---------------------- #
def init_gvp_params(key, si, vi, so, vo, h_dim=None):
    h = h_dim or max(vi, vo)
    ks = jax.random.split(key, 6)

    def u(k, shape, fan_in):
        b = 1.0 / math.sqrt(fan_in)
        return jax.random.uniform(k, shape, jnp.float32, -b, b)

    Wh = u(ks[0], (h, vi), vi)                 # nn.Linear(vi, h, bias=False)
    Ws = u(ks[1], (so, si + h), si + h)        # nn.Linear(h + si, so)
    bs = u(ks[2], (1, so), si + h)
    Wv = u(ks[3], (vo, h), h)                  # nn.Linear(h, vo, bias=False)
    Wsv = u(ks[4], (vo, so), so)               # nn.Linear(so, vo)
    bsv = u(ks[5], (1, vo), so)
    return [Wh, Ws, bs, Wv, Wsv, bsv]


# ------------------------- pure-JAX reference (check) ----------------------- #
def _ref_gvp(s, v, params, scalar_relu):
    Wh, Ws, bs, Wv, Wsv, bsv = params
    vh = jnp.einsum('bic,hi->bch', v, Wh, precision='highest')       # [B, 3, h]
    vn = jnp.sqrt(jnp.maximum(jnp.sum(vh * vh, axis=-2), EPS))       # [B, h]
    s_out = jnp.einsum('bk,ok->bo', jnp.concatenate([s, vn], -1), Ws,
                       precision='highest') + bs[0]
    v_out = jnp.einsum('bch,oh->boc', vh, Wv, precision='highest')   # [B, vo, 3]
    gate = jnp.einsum('bo,po->bp', jax.nn.sigmoid(s_out), Wsv,
                      precision='highest') + bsv[0]
    v_out = v_out * jax.nn.sigmoid(gate)[:, :, None]
    if scalar_relu:
        s_out = jax.nn.relu(s_out)
    return s_out, v_out


def _ref_forward(h_node, h_edge, edge_index, params):
    p_e1, p_e2, p_n1, p_n2 = params
    row = edge_index[0]
    s_e, v_e = h_edge
    s_e, v_e = _ref_gvp(s_e, v_e, p_e1, True)
    s_e, v_e = _ref_gvp(s_e, v_e, p_e2, False)
    N = h_node[0].shape[0]
    msg_s = jax.ops.segment_sum(s_e, row, num_segments=N)
    msg_v = jax.ops.segment_sum(v_e, row, num_segments=N)
    s_n, v_n = h_node
    scal = jnp.concatenate([s_n * msg_s, jnp.sum(v_n * msg_v, -1)], -1)
    vec = jnp.concatenate([(v_n + msg_v) / 2.0, jnp.cross(v_n, msg_v)], axis=-2)
    s, v = _ref_gvp(scal, vec, p_n1, True)
    s, v = _ref_gvp(s, v, p_n2, False)
    return v[:, 0, :]    # squeeze(-2), vo == 1


# ---------------------------------- main ------------------------------------ #
if __name__ == "__main__":
    N, E = 16, 256
    node_dims = (8, 4)      # (n_scalar, n_vector)
    edge_dims = (8, 4)
    hidden_dims = (16, 8)
    ns, nv = node_dims
    es, ev = edge_dims
    hs, hv = hidden_dims
    fuser_dims = (ns + nv, nv * 2)   # Fuser('cross').get_fuser_dim(node_dims)

    key = jax.random.PRNGKey(0)
    keys = jax.random.split(key, 9)
    s_node = jax.random.normal(keys[0], (N, ns), jnp.float32)
    v_node = jax.random.normal(keys[1], (N, nv, 3), jnp.float32)
    s_edge = jax.random.normal(keys[2], (E, es), jnp.float32)
    v_edge = jax.random.normal(keys[3], (E, ev, 3), jnp.float32)
    edge_index = jax.random.randint(keys[4], (2, E), 0, N, dtype=jnp.int32)

    params = [
        init_gvp_params(keys[5], es, ev, ns, nv),                        # edge GVP
        init_gvp_params(keys[6], ns, nv, ns, nv),                        # edge GVLinear
        init_gvp_params(keys[7], fuser_dims[0], fuser_dims[1], hs, hv),  # node GVP
        init_gvp_params(keys[8], hs, hv, 1, 1),                          # node GVLinear
    ]

    # Small tiles so the (N_tiles, E_tiles) accumulator grid is exercised: (2, 2).
    delta = pos_update_gvp((s_node, v_node), (s_edge, v_edge), edge_index,
                           params, node_dims, edge_dims, hidden_dims,
                           tile_n=8, tile_e=128)
    jax.block_until_ready(delta)

    ref = _ref_forward((s_node, v_node), (s_edge, v_edge), edge_index, params)
    np.testing.assert_allclose(np.asarray(delta), np.asarray(ref),
                               atol=1e-2, rtol=2e-2)
    print("KERNEL_OK")
</pallas_src>

<mosaic_0001>
module attributes {stable_mosaic.version = 11 : i64} {
  func.func @kernel(%arg0: i32, %arg1: i32, %arg2: memref<1x128xi32, #tpu.memory_space<vmem>>, %arg3: memref<8x8xf32, #tpu.memory_space<vmem>>, %arg4: memref<3x8x4xf32, #tpu.memory_space<vmem>>, %arg5: memref<128x8xbf16, #tpu.memory_space<vmem>>, %arg6: memref<3x128x4xbf16, #tpu.memory_space<vmem>>, %arg7: memref<192x128xbf16, #tpu.memory_space<vmem>>, %arg8: memref<8x128xf32, #tpu.memory_space<vmem>>, %arg9: memref<8x3xf32, #tpu.memory_space<vmem>>, %arg10: memref<8x20xf32, #tpu.memory_space<vmem>>) attributes {dimension_semantics = [#tpu.dimension_semantics<parallel>, #tpu.dimension_semantics<arbitrary>], iteration_bounds = array<i64: 2, 2>, scalar_prefetch = 0 : i64, scratch_operands = 1 : i64, tpu.core_type = #tpu.core_type<tc>, window_params = [{transform_indices = @transform_0, window_bounds = array<i64: 1, 128>}, {transform_indices = @transform_1, window_bounds = array<i64: 8, 8>}, {transform_indices = @transform_2, window_bounds = array<i64: 3, 8, 4>}, {transform_indices = @transform_3, window_bounds = array<i64: 128, 8>}, {transform_indices = @transform_4, window_bounds = array<i64: 3, 128, 4>}, {pipeline_mode = #tpu.pipeline_mode<synchronous>, transform_indices = @transform_5, window_bounds = array<i64: 192, 128>}, {pipeline_mode = #tpu.pipeline_mode<synchronous>, transform_indices = @transform_6, window_bounds = array<i64: 8, 128>}, {transform_indices = @transform_7, window_bounds = array<i64: 8, 3>}]} {
    %c0_i32 = arith.constant 0 : i32
    %0 = arith.cmpi eq, %arg1, %c0_i32 : i32
    %1 = arith.extui %0 : i1 to i32
    %c0_i32_0 = arith.constant 0 : i32
    %2 = arith.cmpi ne, %1, %c0_i32_0 : i32
    scf.if %2 {
      %cst_53 = arith.constant 0.000000e+00 : f32
      %124 = vector.broadcast %cst_53 : f32 to vector<8x20xf32>
      %c0_54 = arith.constant 0 : index
      %c0_55 = arith.constant 0 : index
      %125 = vector.load %arg10[%c0_54, %c0_55] : memref<8x20xf32, #tpu.memory_space<vmem>>, vector<8x20xf32>
      tpu.vector_store %arg10[%c0_54, %c0_55], %124 {strides = array<i32>} : memref<8x20xf32, #tpu.memory_space<vmem>>, vector<8x20xf32>,
    } else {
    }
    %c0 = arith.constant 0 : index
    %c0_1 = arith.constant 0 : index
    %3 = vector.load %arg5[%c0, %c0_1] : memref<128x8xbf16, #tpu.memory_space<vmem>>, vector<128x8xbf16>
    %c0_2 = arith.constant 0 : index
    %c0_3 = arith.constant 0 : index
    %c0_4 = arith.constant 0 : index
    %4 = vector.load %arg6[%c0_2, %c0_3, %c0_4] : memref<3x128x4xbf16, #tpu.memory_space<vmem>>, vector<1x128x4xbf16>
    %5 = vector.shape_cast %4 : vector<1x128x4xbf16> to vector<128x4xbf16>
    %c1 = arith.constant 1 : index
    %c0_5 = arith.constant 0 : index
    %c0_6 = arith.constant 0 : index
    %6 = vector.load %arg6[%c1, %c0_5, %c0_6] : memref<3x128x4xbf16, #tpu.memory_space<vmem>>, vector<1x128x4xbf16>
    %7 = vector.shape_cast %6 : vector<1x128x4xbf16> to vector<128x4xbf16>
    %c2 = arith.constant 2 : index
    %c0_7 = arith.constant 0 : index
    %c0_8 = arith.constant 0 : index
    %8 = vector.load %arg6[%c2, %c0_7, %c0_8] : memref<3x128x4xbf16, #tpu.memory_space<vmem>>, vector<1x128x4xbf16>
    %9 = vector.shape_cast %8 : vector<1x128x4xbf16> to vector<128x4xbf16>
    %10 = tpu.concatenate %5, %7, %9 in 0 : vector<128x4xbf16>, vector<128x4xbf16>, vector<128x4xbf16> -> vector<384x4xbf16>
    %c0_9 = arith.constant 0 : index
    %c0_10 = arith.constant 0 : index
    %11 = vector.load %arg7[%c0_9, %c0_10] : memref<192x128xbf16, #tpu.memory_space<vmem>>, vector<4x4xbf16>
    %cst = arith.constant dense<0.000000e+00> : vector<384x4xf32>
    %12 = tpu.matmul %10, %11, %cst {dimension_numbers = #tpu.dot_dimension_numbers<[1], [0], [0], [1], [0, 0, 1, 1], [], []>} : vector<384x4xbf16>, vector<4x4xbf16>, vector<384x4xf32> -> vector<384x4xf32>
    %13 = vector.extract_strided_slice %12 {offsets = [0, 0], sizes = [128, 4], strides = [1, 1]} : vector<384x4xf32> to vector<128x4xf32>
    %14 = vector.extract_strided_slice %12 {offsets = [128, 0], sizes = [128, 4], strides = [1, 1]} : vector<384x4xf32> to vector<128x4xf32>
    %15 = vector.extract_strided_slice %12 {offsets = [256, 0], sizes = [128, 4], strides = [1, 1]} : vector<384x4xf32> to vector<128x4xf32>
    %16 = arith.mulf %13, %13 : vector<128x4xf32>
    %17 = arith.mulf %14, %14 : vector<128x4xf32>
    %18 = arith.addf %16, %17 : vector<128x4xf32>
    %19 = arith.mulf %15, %15 : vector<128x4xf32>
    %20 = arith.addf %18, %19 : vector<128x4xf32>
    %cst_11 = arith.constant 9.99999974E-6 : f32
    %21 = vector.broadcast %cst_11 : f32 to vector<128x4xf32>
    %22 = arith.maximumf %20, %21 : vector<128x4xf32>
    %23 = math.sqrt %22 : vector<128x4xf32>
    %c0_12 = arith.constant 0 : index
    %c0_13 = arith.constant 0 : index
    %24 = vector.load %arg8[%c0_12, %c0_13] : memref<8x128xf32, #tpu.memory_space<vmem>>, vector<1x8xf32>
    %25 = arith.truncf %23 : vector<128x4xf32> to vector<128x4xbf16>
    %c16 = arith.constant 16 : index
    %c0_14 = arith.constant 0 : index
    %26 = vector.load %arg7[%c16, %c0_14] : memref<192x128xbf16, #tpu.memory_space<vmem>>, vector<4x8xbf16>
    %cst_15 = arith.constant dense<0.000000e+00> : vector<128x8xf32>
    %27 = tpu.matmul %25, %26, %cst_15 {dimension_numbers = #tpu.dot_dimension_numbers<[1], [0], [0], [1], [0, 0, 1, 1], [], []>} : vector<128x4xbf16>, vector<4x8xbf16>, vector<128x8xf32> -> vector<128x8xf32>
    %28 = vector.broadcast %24 : vector<1x8xf32> to vector<128x8xf32>
    %29 = arith.addf %28, %27 : vector<128x8xf32>
    %c8 = arith.constant 8 : index
    %c0_16 = arith.constant 0 : index
    %30 = vector.load %arg7[%c8, %c0_16] : memref<192x128xbf16, #tpu.memory_space<vmem>>, vector<8x8xbf16>
    %cst_17 = arith.constant dense<0.000000e+00> : vector<128x8xf32>
    %31 = tpu.matmul %3, %30, %cst_17 {dimension_numbers = #tpu.dot_dimension_numbers<[1], [0], [0], [1], [0, 0, 1, 1], [], []>} : vector<128x8xbf16>, vector<8x8xbf16>, vector<128x8xf32> -> vector<128x8xf32>
    %32 = arith.addf %29, %31 : vector<128x8xf32>
    %33 = arith.truncf %12 : vector<384x4xf32> to vector<384x4xbf16>
    %c24 = arith.constant 24 : index
    %c0_18 = arith.constant 0 : index
    %34 = vector.load %arg7[%c24, %c0_18] : memref<192x128xbf16, #tpu.memory_space<vmem>>, vector<4x4xbf16>
    %cst_19 = arith.constant dense<0.000000e+00> : vector<384x4xf32>
    %35 = tpu.matmul %33, %34, %cst_19 {dimension_numbers = #tpu.dot_dimension_numbers<[1], [0], [0], [1], [0, 0, 1, 1], [], []>} : vector<384x4xbf16>, vector<4x4xbf16>, vector<384x4xf32> -> vector<384x4xf32>
    %36 = arith.negf %32 : vector<128x8xf32>
    %37 = math.exp %36 : vector<128x8xf32>
    %cst_20 = arith.constant 1.000000e+00 : f32
    %38 = vector.broadcast %cst_20 : f32 to vector<128x8xf32>
    %39 = arith.addf %38, %37 : vector<128x8xf32>
    %40 = arith.divf %38, %39 : vector<128x8xf32>
    %41 = arith.truncf %40 : vector<128x8xf32> to vector<128x8xbf16>
    %c32 = arith.constant 32 : index
    %c0_21 = arith.constant 0 : index
    %42 = vector.load %arg7[%c32, %c0_21] : memref<192x128xbf16, #tpu.memory_space<vmem>>, vector<8x4xbf16>
    %cst_22 = arith.constant dense<0.000000e+00> : vector<128x4xf32>
    %43 = tpu.matmul %41, %42, %cst_22 {dimension_numbers = #tpu.dot_dimension_numbers<[1], [0], [0], [1], [0, 0, 1, 1], [], []>} : vector<128x8xbf16>, vector<8x4xbf16>, vector<128x4xf32> -> vector<128x4xf32>
    %c1_23 = arith.constant 1 : index
    %c0_24 = arith.constant 0 : index
    %44 = vector.load %arg8[%c1_23, %c0_24] : memref<8x128xf32, #tpu.memory_space<vmem>>, vector<1x4xf32>
    %45 = vector.broadcast %44 : vector<1x4xf32> to vector<128x4xf32>
    %46 = arith.addf %43, %45 : vector<128x4xf32>
    %47 = arith.negf %46 : vector<128x4xf32>
    %48 = math.exp %47 : vector<128x4xf32>
    %cst_25 = arith.constant 1.000000e+00 : f32
    %49 = vector.broadcast %cst_25 : f32 to vector<128x4xf32>
    %50 = arith.addf %49, %48 : vector<128x4xf32>
    %51 = arith.divf %49, %50 : vector<128x4xf32>
    %52 = tpu.concatenate %51, %51, %51 in 0 : vector<128x4xf32>, vector<128x4xf32>, vector<128x4xf32> -> vector<384x4xf32>
    %53 = arith.mulf %35, %52 : vector<384x4xf32>
    %cst_26 = arith.constant 0.000000e+00 : f32
    %54 = vector.broadcast %cst_26 : f32 to vector<128x8xf32>
    %55 = arith.maximumf %32, %54 : vector<128x8xf32>
    %56 = arith.truncf %53 : vector<384x4xf32> to vector<384x4xbf16>
    %c40 = arith.constant 40 : index
    %c0_27 = arith.constant 0 : index
    %57 = vector.load %arg7[%c40, %c0_27] : memref<192x128xbf16, #tpu.memory_space<vmem>>, vector<4x4xbf16>
    %cst_28 = arith.constant dense<0.000000e+00> : vector<384x4xf32>
    %58 = tpu.matmul %56, %57, %cst_28 {dimension_numbers = #tpu.dot_dimension_numbers<[1], [0], [0], [1], [0, 0, 1, 1], [], []>} : vector<384x4xbf16>, vector<4x4xbf16>, vector<384x4xf32> -> vector<384x4xf32>
    %59 = vector.extract_strided_slice %58 {offsets = [0, 0], sizes = [128, 4], strides = [1, 1]} : vector<384x4xf32> to vector<128x4xf32>
    %60 = vector.extract_strided_slice %58 {offsets = [128, 0], sizes = [128, 4], strides = [1, 1]} : vector<384x4xf32> to vector<128x4xf32>
    %61 = vector.extract_strided_slice %58 {offsets = [256, 0], sizes = [128, 4], strides = [1, 1]} : vector<384x4xf32> to vector<128x4xf32>
    %62 = arith.mulf %59, %59 : vector<128x4xf32>
    %63 = arith.mulf %60, %60 : vector<128x4xf32>
    %64 = arith.addf %62, %63 : vector<128x4xf32>
    %65 = arith.mulf %61, %61 : vector<128x4xf32>
    %66 = arith.addf %64, %65 : vector<128x4xf32>
    %cst_29 = arith.constant 9.99999974E-6 : f32
    %67 = vector.broadcast %cst_29 : f32 to vector<128x4xf32>
    %68 = arith.maximumf %66, %67 : vector<128x4xf32>
    %69 = math.sqrt %68 : vector<128x4xf32>
    %c2_30 = arith.constant 2 : index
    %c0_31 = arith.constant 0 : index
    %70 = vector.load %arg8[%c2_30, %c0_31] : memref<8x128xf32, #tpu.memory_space<vmem>>, vector<1x8xf32>
    %71 = arith.truncf %69 : vector<128x4xf32> to vector<128x4xbf16>
    %c56 = arith.constant 56 : index
    %c0_32 = arith.constant 0 : index
    %72 = vector.load %arg7[%c56, %c0_32] : memref<192x128xbf16, #tpu.memory_space<vmem>>, vector<4x8xbf16>
    %cst_33 = arith.constant dense<0.000000e+00> : vector<128x8xf32>
    %73 = tpu.matmul %71, %72, %cst_33 {dimension_numbers = #tpu.dot_dimension_numbers<[1], [0], [0], [1], [0, 0, 1, 1], [], []>} : vector<128x4xbf16>, vector<4x8xbf16>, vector<128x8xf32> -> vector<128x8xf32>
    %74 = vector.broadcast %70 : vector<1x8xf32> to vector<128x8xf32>
    %75 = arith.addf %74, %73 : vector<128x8xf32>
    %76 = arith.truncf %55 : vector<128x8xf32> to vector<128x8xbf16>
    %c48 = arith.constant 48 : index
    %c0_34 = arith.constant 0 : index
    %77 = vector.load %arg7[%c48, %c0_34] : memref<192x128xbf16, #tpu.memory_space<vmem>>, vector<8x8xbf16>
    %cst_35 = arith.constant dense<0.000000e+00> : vector<128x8xf32>
    %78 = tpu.matmul %76, %77, %cst_35 {dimension_numbers = #tpu.dot_dimension_numbers<[1], [0], [0], [1], [0, 0, 1, 1], [], []>} : vector<128x8xbf16>, vector<8x8xbf16>, vector<128x8xf32> -> vector<128x8xf32>
    %79 = arith.addf %75, %78 : vector<128x8xf32>
    %80 = arith.truncf %58 : vector<384x4xf32> to vector<384x4xbf16>
    %c64 = arith.constant 64 : index
    %c0_36 = arith.constant 0 : index
    %81 = vector.load %arg7[%c64, %c0_36] : memref<192x128xbf16, #tpu.memory_space<vmem>>, vector<4x4xbf16>
    %cst_37 = arith.constant dense<0.000000e+00> : vector<384x4xf32>
    %82 = tpu.matmul %80, %81, %cst_37 {dimension_numbers = #tpu.dot_dimension_numbers<[1], [0], [0], [1], [0, 0, 1, 1], [], []>} : vector<384x4xbf16>, vector<4x4xbf16>, vector<384x4xf32> -> vector<384x4xf32>
    %83 = arith.negf %79 : vector<128x8xf32>
    %84 = math.exp %83 : vector<128x8xf32>
    %cst_38 = arith.constant 1.000000e+00 : f32
    %85 = vector.broadcast %cst_38 : f32 to vector<128x8xf32>
    %86 = arith.addf %85, %84 : vector<128x8xf32>
    %87 = arith.divf %85, %86 : vector<128x8xf32>
    %88 = arith.truncf %87 : vector<128x8xf32> to vector<128x8xbf16>
    %c72 = arith.constant 72 : index
    %c0_39 = arith.constant 0 : index
    %89 = vector.load %arg7[%c72, %c0_39] : memref<192x128xbf16, #tpu.memory_space<vmem>>, vector<8x4xbf16>
    %cst_40 = arith.constant dense<0.000000e+00> : vector<128x4xf32>
    %90 = tpu.matmul %88, %89, %cst_40 {dimension_numbers = #tpu.dot_dimension_numbers<[1], [0], [0], [1], [0, 0, 1, 1], [], []>} : vector<128x8xbf16>, vector<8x4xbf16>, vector<128x4xf32> -> vector<128x4xf32>
    %c3 = arith.constant 3 : index
    %c0_41 = arith.constant 0 : index
    %91 = vector.load %arg8[%c3, %c0_41] : memref<8x128xf32, #tpu.memory_space<vmem>>, vector<1x4xf32>
    %92 = vector.broadcast %91 : vector<1x4xf32> to vector<128x4xf32>
    %93 = arith.addf %90, %92 : vector<128x4xf32>
    %94 = arith.negf %93 : vector<128x4xf32>
    %95 = math.exp %94 : vector<128x4xf32>
    %cst_42 = arith.constant 1.000000e+00 : f32
    %96 = vector.broadcast %cst_42 : f32 to vector<128x4xf32>
    %97 = arith.addf %96, %95 : vector<128x4xf32>
    %98 = arith.divf %96, %97 : vector<128x4xf32>
    %99 = tpu.concatenate %98, %98, %98 in 0 : vector<128x4xf32>, vector<128x4xf32>, vector<128x4xf32> -> vector<384x4xf32>
    %100 = arith.mulf %82, %99 : vector<384x4xf32>
    %101 = vector.extract_strided_slice %100 {offsets = [0, 0], sizes = [128, 4], strides = [1, 1]} : vector<384x4xf32> to vector<128x4xf32>
    %102 = vector.extract_strided_slice %100 {offsets = [128, 0], sizes = [128, 4], strides = [1, 1]} : vector<384x4xf32> to vector<128x4xf32>
    %103 = vector.extract_strided_slice %100 {offsets = [256, 0], sizes = [128, 4], strides = [1, 1]} : vector<384x4xf32> to vector<128x4xf32>
    %104 = tpu.concatenate %79, %101, %102, %103 in 1 : vector<128x8xf32>, vector<128x4xf32>, vector<128x4xf32>, vector<128x4xf32> -> vector<128x20xf32>
    %105 = arith.truncf %104 : vector<128x20xf32> to vector<128x20xbf16>
    %106 = tpu.iota {dimensions = array<i32: 0>} : vector<8x128xi32>
    %c8_i32 = arith.constant 8 : i32
    %107 = arith.muli %arg0, %c8_i32 : i32
    %108 = vector.broadcast %107 : i32 to vector<8x128xi32>
    %109 = arith.addi %106, %108 : vector<8x128xi32>
    %c0_43 = arith.constant 0 : index
    %c0_44 = arith.constant 0 : index
    %110 = vector.load %arg2[%c0_43, %c0_44] : memref<1x128xi32, #tpu.memory_space<vmem>>, vector<1x128xi32>
    %111 = vector.broadcast %110 : vector<1x128xi32> to vector<8x128xi32>
    %112 = arith.cmpi eq, %109, %111 : vector<8x128xi32>
    %cst_45 = arith.constant 1.000000e+00 : f32
    %cst_46 = arith.constant 0.000000e+00 : f32
    %113 = vector.broadcast %cst_45 : f32 to vector<8x128xf32>
    %114 = vector.broadcast %cst_46 : f32 to vector<8x128xf32>
    %115 = arith.select %112, %113, %114 : vector<8x128xi1>, vector<8x128xf32>
    %116 = arith.truncf %115 : vector<8x128xf32> to vector<8x128xbf16>
    %c0_47 = arith.constant 0 : index
    %c0_48 = arith.constant 0 : index
    %117 = vector.load %arg10[%c0_47, %c0_48] : memref<8x20xf32, #tpu.memory_space<vmem>>, vector<8x20xf32>
    %cst_49 = arith.constant dense<0.000000e+00> : vector<8x20xf32>
    %118 = tpu.matmul %116, %105, %cst_49 {dimension_numbers = #tpu.dot_dimension_numbers<[1], [0], [0], [1], [0, 0, 1, 1], [], []>} : vector<8x128xbf16>, vector<128x20xbf16>, vector<8x20xf32> -> vector<8x20xf32>
    %119 = arith.addf %117, %118 : vector<8x20xf32>
    %c0_50 = arith.constant 0 : index
    %c0_51 = arith.constant 0 : index
    %120 = vector.load %arg10[%c0_50, %c0_51] : memref<8x20xf32, #tpu.memory_space<vmem>>, vector<8x20xf32>
    tpu.vector_store %arg10[%c0_50, %c0_51], %119 {strides = array<i32>} : memref<8x20xf32, #tpu.memory_space<vmem>>, vector<8x20xf32>,
    %c1_i32 = arith.constant 1 : i32
    %121 = arith.cmpi eq, %arg1, %c1_i32 : i32
    %122 = arith.extui %121 : i1 to i32
    %c0_i32_52 = arith.constant 0 : i32
    %123 = arith.cmpi ne, %122, %c0_i32_52 : i32
    scf.if %123 {
      %c0_53 = arith.constant 0 : index
      %c0_54 = arith.constant 0 : index
      %124 = vector.load %arg10[%c0_53, %c0_54] : memref<8x20xf32, #tpu.memory_space<vmem>>, vector<8x20xf32>
      %125 = vector.extract_strided_slice %124 {offsets = [0, 0], sizes = [8, 8], strides = [1, 1]} : vector<8x20xf32> to vector<8x8xf32>
      %126 = vector.extract_strided_slice %124 {offsets = [0, 8], sizes = [8, 4], strides = [1, 1]} : vector<8x20xf32> to vector<8x4xf32>
      %127 = vector.extract_strided_slice %124 {offsets = [0, 12], sizes = [8, 4], strides = [1, 1]} : vector<8x20xf32> to vector<8x4xf32>
      %128 = vector.extract_strided_slice %124 {offsets = [0, 16], sizes = [8, 4], strides = [1, 1]} : vector<8x20xf32> to vector<8x4xf32>
      %c0_55 = arith.constant 0 : index
      %c0_56 = arith.constant 0 : index
      %129 = vector.load %arg3[%c0_55, %c0_56] : memref<8x8xf32, #tpu.memory_space<vmem>>, vector<8x8xf32>
      %c0_57 = arith.constant 0 : index
      %c0_58 = arith.constant 0 : index
      %c0_59 = arith.constant 0 : index
      %130 = vector.load %arg4[%c0_57, %c0_58, %c0_59] : memref<3x8x4xf32, #tpu.memory_space<vmem>>, vector<1x8x4xf32>
      %131 = vector.shape_cast %130 : vector<1x8x4xf32> to vector<8x4xf32>
      %c1_60 = arith.constant 1 : index
      %c0_61 = arith.constant 0 : index
      %c0_62 = arith.constant 0 : index
      %132 = vector.load %arg4[%c1_60, %c0_61, %c0_62] : memref<3x8x4xf32, #tpu.memory_space<vmem>>, vector<1x8x4xf32>
      %133 = vector.shape_cast %132 : vector<1x8x4xf32> to vector<8x4xf32>
      %c2_63 = arith.constant 2 : index
      %c0_64 = arith.constant 0 : index
      %c0_65 = arith.constant 0 : index
      %134 = vector.load %arg4[%c2_63, %c0_64, %c0_65] : memref<3x8x4xf32, #tpu.memory_space<vmem>>, vector<1x8x4xf32>
      %135 = vector.shape_cast %134 : vector<1x8x4xf32> to vector<8x4xf32>
      %136 = arith.mulf %129, %125 : vector<8x8xf32>
      %137 = arith.mulf %131, %126 : vector<8x4xf32>
      %138 = arith.mulf %133, %127 : vector<8x4xf32>
      %139 = arith.addf %137, %138 : vector<8x4xf32>
      %140 = arith.mulf %135, %128 : vector<8x4xf32>
      %141 = arith.addf %139, %140 : vector<8x4xf32>
      %142 = arith.addf %131, %126 : vector<8x4xf32>
      %143 = arith.addf %133, %127 : vector<8x4xf32>
      %144 = arith.addf %135, %128 : vector<8x4xf32>
      %145 = tpu.concatenate %142, %143, %144 in 0 : vector<8x4xf32>, vector<8x4xf32>, vector<8x4xf32> -> vector<24x4xf32>
      %cst_66 = arith.constant 5.000000e-01 : f32
      %146 = vector.broadcast %cst_66 : f32 to vector<24x4xf32>
      %147 = arith.mulf %145, %146 : vector<24x4xf32>
      %148 = arith.mulf %133, %128 : vector<8x4xf32>
      %149 = arith.mulf %135, %127 : vector<8x4xf32>
      %150 = arith.subf %148, %149 : vector<8x4xf32>
      %151 = arith.mulf %135, %126 : vector<8x4xf32>
      %152 = arith.mulf %131, %128 : vector<8x4xf32>
      %153 = arith.subf %151, %152 : vector<8x4xf32>
      %154 = arith.mulf %131, %127 : vector<8x4xf32>
      %155 = arith.mulf %133, %126 : vector<8x4xf32>
      %156 = arith.subf %154, %155 : vector<8x4xf32>
      %157 = tpu.concatenate %150, %153, %156 in 0 : vector<8x4xf32>, vector<8x4xf32>, vector<8x4xf32> -> vector<24x4xf32>
      %158 = arith.truncf %147 : vector<24x4xf32> to vector<24x4xbf16>
      %c80 = arith.constant 80 : index
      %c0_67 = arith.constant 0 : index
      %159 = vector.load %arg7[%c80, %c0_67] : memref<192x128xbf16, #tpu.memory_space<vmem>>, vector<4x8xbf16>
      %cst_68 = arith.constant dense<0.000000e+00> : vector<24x8xf32>
      %160 = tpu.matmul %158, %159, %cst_68 {dimension_numbers = #tpu.dot_dimension_numbers<[1], [0], [0], [1], [0, 0, 1, 1], [], []>} : vector<24x4xbf16>, vector<4x8xbf16>, vector<24x8xf32> -> vector<24x8xf32>
      %161 = arith.truncf %157 : vector<24x4xf32> to vector<24x4xbf16>
      %c88 = arith.constant 88 : index
      %c0_69 = arith.constant 0 : index
      %162 = vector.load %arg7[%c88, %c0_69] : memref<192x128xbf16, #tpu.memory_space<vmem>>, vector<4x8xbf16>
      %cst_70 = arith.constant dense<0.000000e+00> : vector<24x8xf32>
      %163 = tpu.matmul %161, %162, %cst_70 {dimension_numbers = #tpu.dot_dimension_numbers<[1], [0], [0], [1], [0, 0, 1, 1], [], []>} : vector<24x4xbf16>, vector<4x8xbf16>, vector<24x8xf32> -> vector<24x8xf32>
      %164 = arith.addf %160, %163 : vector<24x8xf32>
      %165 = vector.extract_strided_slice %164 {offsets = [0, 0], sizes = [8, 8], strides = [1, 1]} : vector<24x8xf32> to vector<8x8xf32>
      %166 = vector.extract_strided_slice %164 {offsets = [8, 0], sizes = [8, 8], strides = [1, 1]} : vector<24x8xf32> to vector<8x8xf32>
      %167 = vector.extract_strided_slice %164 {offsets = [16, 0], sizes = [8, 8], strides = [1, 1]} : vector<24x8xf32> to vector<8x8xf32>
      %168 = arith.mulf %165, %165 : vector<8x8xf32>
      %169 = arith.mulf %166, %166 : vector<8x8xf32>
      %170 = arith.addf %168, %169 : vector<8x8xf32>
      %171 = arith.mulf %167, %167 : vector<8x8xf32>
      %172 = arith.addf %170, %171 : vector<8x8xf32>
      %cst_71 = arith.constant 9.99999974E-6 : f32
      %173 = vector.broadcast %cst_71 : f32 to vector<8x8xf32>
      %174 = arith.maximumf %172, %173 : vector<8x8xf32>
      %175 = math.sqrt %174 : vector<8x8xf32>
      %c4 = arith.constant 4 : index
      %c0_72 = arith.constant 0 : index
      %176 = vector.load %arg8[%c4, %c0_72] : memref<8x128xf32, #tpu.memory_space<vmem>>, vector<1x16xf32>
      %177 = arith.truncf %175 : vector<8x8xf32> to vector<8x8xbf16>
      %c112 = arith.constant 112 : index
      %c0_73 = arith.constant 0 : index
      %178 = vector.load %arg7[%c112, %c0_73] : memref<192x128xbf16, #tpu.memory_space<vmem>>, vector<8x16xbf16>
      %cst_74 = arith.constant dense<0.000000e+00> : vector<8x16xf32>
      %179 = tpu.matmul %177, %178, %cst_74 {dimension_numbers = #tpu.dot_dimension_numbers<[1], [0], [0], [1], [0, 0, 1, 1], [], []>} : vector<8x8xbf16>, vector<8x16xbf16>, vector<8x16xf32> -> vector<8x16xf32>
      %180 = vector.broadcast %176 : vector<1x16xf32> to vector<8x16xf32>
      %181 = arith.addf %180, %179 : vector<8x16xf32>
      %182 = arith.truncf %136 : vector<8x8xf32> to vector<8x8xbf16>
      %c96 = arith.constant 96 : index
      %c0_75 = arith.constant 0 : index
      %183 = vector.load %arg7[%c96, %c0_75] : memref<192x128xbf16, #tpu.memory_space<vmem>>, vector<8x16xbf16>
      %cst_76 = arith.constant dense<0.000000e+00> : vector<8x16xf32>
      %184 = tpu.matmul %182, %183, %cst_76 {dimension_numbers = #tpu.dot_dimension_numbers<[1], [0], [0], [1], [0, 0, 1, 1], [], []>} : vector<8x8xbf16>, vector<8x16xbf16>, vector<8x16xf32> -> vector<8x16xf32>
      %185 = arith.addf %181, %184 : vector<8x16xf32>
      %186 = arith.truncf %141 : vector<8x4xf32> to vector<8x4xbf16>
      %c104 = arith.constant 104 : index
      %c0_77 = arith.constant 0 : index
      %187 = vector.load %arg7[%c104, %c0_77] : memref<192x128xbf16, #tpu.memory_space<vmem>>, vector<4x16xbf16>
      %cst_78 = arith.constant dense<0.000000e+00> : vector<8x16xf32>
      %188 = tpu.matmul %186, %187, %cst_78 {dimension_numbers = #tpu.dot_dimension_numbers<[1], [0], [0], [1], [0, 0, 1, 1], [], []>} : vector<8x4xbf16>, vector<4x16xbf16>, vector<8x16xf32> -> vector<8x16xf32>
      %189 = arith.addf %185, %188 : vector<8x16xf32>
      %190 = arith.truncf %164 : vector<24x8xf32> to vector<24x8xbf16>
      %c120 = arith.constant 120 : index
      %c0_79 = arith.constant 0 : index
      %191 = vector.load %arg7[%c120, %c0_79] : memref<192x128xbf16, #tpu.memory_space<vmem>>, vector<8x8xbf16>
      %cst_80 = arith.constant dense<0.000000e+00> : vector<24x8xf32>
      %192 = tpu.matmul %190, %191, %cst_80 {dimension_numbers = #tpu.dot_dimension_numbers<[1], [0], [0], [1], [0, 0, 1, 1], [], []>} : vector<24x8xbf16>, vector<8x8xbf16>, vector<24x8xf32> -> vector<24x8xf32>
      %193 = arith.negf %189 : vector<8x16xf32>
      %194 = math.exp %193 : vector<8x16xf32>
      %cst_81 = arith.constant 1.000000e+00 : f32
      %195 = vector.broadcast %cst_81 : f32 to vector<8x16xf32>
      %196 = arith.addf %195, %194 : vector<8x16xf32>
      %197 = arith.divf %195, %196 : vector<8x16xf32>
      %198 = arith.truncf %197 : vector<8x16xf32> to vector<8x16xbf16>
      %c128 = arith.constant 128 : index
      %c0_82 = arith.constant 0 : index
      %199 = vector.load %arg7[%c128, %c0_82] : memref<192x128xbf16, #tpu.memory_space<vmem>>, vector<16x8xbf16>
      %cst_83 = arith.constant dense<0.000000e+00> : vector<8x8xf32>
      %200 = tpu.matmul %198, %199, %cst_83 {dimension_numbers = #tpu.dot_dimension_numbers<[1], [0], [0], [1], [0, 0, 1, 1], [], []>} : vector<8x16xbf16>, vector<16x8xbf16>, vector<8x8xf32> -> vector<8x8xf32>
      %c5 = arith.constant 5 : index
      %c0_84 = arith.constant 0 : index
      %201 = vector.load %arg8[%c5, %c0_84] : memref<8x128xf32, #tpu.memory_space<vmem>>, vector<1x8xf32>
      %202 = vector.broadcast %201 : vector<1x8xf32> to vector<8x8xf32>
      %203 = arith.addf %200, %202 : vector<8x8xf32>
      %204 = arith.negf %203 : vector<8x8xf32>
      %205 = math.exp %204 : vector<8x8xf32>
      %cst_85 = arith.constant 1.000000e+00 : f32
      %206 = vector.broadcast %cst_85 : f32 to vector<8x8xf32>
      %207 = arith.addf %206, %205 : vector<8x8xf32>
      %208 = arith.divf %206, %207 : vector<8x8xf32>
      %209 = tpu.concatenate %208, %208, %208 in 0 : vector<8x8xf32>, vector<8x8xf32>, vector<8x8xf32> -> vector<24x8xf32>
      %210 = arith.mulf %192, %209 : vector<24x8xf32>
      %cst_86 = arith.constant 0.000000e+00 : f32
      %211 = vector.broadcast %cst_86 : f32 to vector<8x16xf32>
      %212 = arith.maximumf %189, %211 : vector<8x16xf32>
      %213 = arith.truncf %210 : vector<24x8xf32> to vector<24x8xbf16>
      %c144 = arith.constant 144 : index
      %c0_87 = arith.constant 0 : index
      %214 = vector.load %arg7[%c144, %c0_87] : memref<192x128xbf16, #tpu.memory_space<vmem>>, vector<8x8xbf16>
      %cst_88 = arith.constant dense<0.000000e+00> : vector<24x8xf32>
      %215 = tpu.matmul %213, %214, %cst_88 {dimension_numbers = #tpu.dot_dimension_numbers<[1], [0], [0], [1], [0, 0, 1, 1], [], []>} : vector<24x8xbf16>, vector<8x8xbf16>, vector<24x8xf32> -> vector<24x8xf32>
      %216 = vector.extract_strided_slice %215 {offsets = [0, 0], sizes = [8, 8], strides = [1, 1]} : vector<24x8xf32> to vector<8x8xf32>
      %217 = vector.extract_strided_slice %215 {offsets = [8, 0], sizes = [8, 8], strides = [1, 1]} : vector<24x8xf32> to vector<8x8xf32>
      %218 = vector.extract_strided_slice %215 {offsets = [16, 0], sizes = [8, 8], strides = [1, 1]} : vector<24x8xf32> to vector<8x8xf32>
      %219 = arith.mulf %216, %216 : vector<8x8xf32>
      %220 = arith.mulf %217, %217 : vector<8x8xf32>
      %221 = arith.addf %219, %220 : vector<8x8xf32>
      %222 = arith.mulf %218, %218 : vector<8x8xf32>
      %223 = arith.addf %221, %222 : vector<8x8xf32>
      %cst_89 = arith.constant 9.99999974E-6 : f32
      %224 = vector.broadcast %cst_89 : f32 to vector<8x8xf32>
      %225 = arith.maximumf %223, %224 : vector<8x8xf32>
      %226 = math.sqrt %225 : vector<8x8xf32>
      %c6 = arith.constant 6 : index
      %c0_90 = arith.constant 0 : index
      %227 = vector.load %arg8[%c6, %c0_90] : memref<8x128xf32, #tpu.memory_space<vmem>>, vector<1x1xf32>
      %228 = arith.truncf %226 : vector<8x8xf32> to vector<8x8xbf16>
      %c168 = arith.constant 168 : index
      %c0_91 = arith.constant 0 : index
      %229 = vector.load %arg7[%c168, %c0_91] : memref<192x128xbf16, #tpu.memory_space<vmem>>, vector<8x1xbf16>
      %cst_92 = arith.constant dense<0.000000e+00> : vector<8x1xf32>
      %230 = tpu.matmul %228, %229, %cst_92 {dimension_numbers = #tpu.dot_dimension_numbers<[1], [0], [0], [1], [0, 0, 1, 1], [], []>} : vector<8x8xbf16>, vector<8x1xbf16>, vector<8x1xf32> -> vector<8x1xf32>
      %231 = vector.broadcast %227 : vector<1x1xf32> to vector<8x1xf32>
      %232 = arith.addf %231, %230 : vector<8x1xf32>
      %233 = arith.truncf %212 : vector<8x16xf32> to vector<8x16xbf16>
      %c152 = arith.constant 152 : index
      %c0_93 = arith.constant 0 : index
      %234 = vector.load %arg7[%c152, %c0_93] : memref<192x128xbf16, #tpu.memory_space<vmem>>, vector<16x1xbf16>
      %cst_94 = arith.constant dense<0.000000e+00> : vector<8x1xf32>
      %235 = tpu.matmul %233, %234, %cst_94 {dimension_numbers = #tpu.dot_dimension_numbers<[1], [0], [0], [1], [0, 0, 1, 1], [], []>} : vector<8x16xbf16>, vector<16x1xbf16>, vector<8x1xf32> -> vector<8x1xf32>
      %236 = arith.addf %232, %235 : vector<8x1xf32>
      %237 = arith.truncf %215 : vector<24x8xf32> to vector<24x8xbf16>
      %c176 = arith.constant 176 : index
      %c0_95 = arith.constant 0 : index
      %238 = vector.load %arg7[%c176, %c0_95] : memref<192x128xbf16, #tpu.memory_space<vmem>>, vector<8x1xbf16>
      %cst_96 = arith.constant dense<0.000000e+00> : vector<24x1xf32>
      %239 = tpu.matmul %237, %238, %cst_96 {dimension_numbers = #tpu.dot_dimension_numbers<[1], [0], [0], [1], [0, 0, 1, 1], [], []>} : vector<24x8xbf16>, vector<8x1xbf16>, vector<24x1xf32> -> vector<24x1xf32>
      %240 = arith.negf %236 : vector<8x1xf32>
      %241 = math.exp %240 : vector<8x1xf32>
      %cst_97 = arith.constant 1.000000e+00 : f32
      %242 = vector.broadcast %cst_97 : f32 to vector<8x1xf32>
      %243 = arith.addf %242, %241 : vector<8x1xf32>
      %244 = arith.divf %242, %243 : vector<8x1xf32>
      %245 = arith.truncf %244 : vector<8x1xf32> to vector<8x1xbf16>
      %c184 = arith.constant 184 : index
      %c0_98 = arith.constant 0 : index
      %246 = vector.load %arg7[%c184, %c0_98] : memref<192x128xbf16, #tpu.memory_space<vmem>>, vector<1x1xbf16>
      %cst_99 = arith.constant dense<0.000000e+00> : vector<8x1xf32>
      %247 = tpu.matmul %245, %246, %cst_99 {dimension_numbers = #tpu.dot_dimension_numbers<[1], [0], [0], [1], [0, 0, 1, 1], [], []>} : vector<8x1xbf16>, vector<1x1xbf16>, vector<8x1xf32> -> vector<8x1xf32>
      %c7 = arith.constant 7 : index
      %c0_100 = arith.constant 0 : index
      %248 = vector.load %arg8[%c7, %c0_100] : memref<8x128xf32, #tpu.memory_space<vmem>>, vector<1x1xf32>
      %249 = vector.broadcast %248 : vector<1x1xf32> to vector<8x1xf32>
      %250 = arith.addf %247, %249 : vector<8x1xf32>
      %251 = arith.negf %250 : vector<8x1xf32>
      %252 = math.exp %251 : vector<8x1xf32>
      %cst_101 = arith.constant 1.000000e+00 : f32
      %253 = vector.broadcast %cst_101 : f32 to vector<8x1xf32>
      %254 = arith.addf %253, %252 : vector<8x1xf32>
      %255 = arith.divf %253, %254 : vector<8x1xf32>
      %256 = tpu.concatenate %255, %255, %255 in 0 : vector<8x1xf32>, vector<8x1xf32>, vector<8x1xf32> -> vector<24x1xf32>
      %257 = arith.mulf %239, %256 : vector<24x1xf32>
      %258 = vector.extract_strided_slice %257 {offsets = [0, 0], sizes = [8, 1], strides = [1, 1]} : vector<24x1xf32> to vector<8x1xf32>
      %259 = vector.extract_strided_slice %257 {offsets = [8, 0], sizes = [8, 1], strides = [1, 1]} : vector<24x1xf32> to vector<8x1xf32>
      %260 = vector.extract_strided_slice %257 {offsets = [16, 0], sizes = [8, 1], strides = [1, 1]} : vector<24x1xf32> to vector<8x1xf32>
      %261 = tpu.concatenate %258, %259, %260 in 1 : vector<8x1xf32>, vector<8x1xf32>, vector<8x1xf32> -> vector<8x3xf32>
      %c0_102 = arith.constant 0 : index
      %c0_103 = arith.constant 0 : index
      %262 = vector.load %arg9[%c0_102, %c0_103] : memref<8x3xf32, #tpu.memory_space<vmem>>, vector<8x3xf32>
      tpu.vector_store %arg9[%c0_102, %c0_103], %261 {strides = array<i32>} : memref<8x3xf32, #tpu.memory_space<vmem>>, vector<8x3xf32>,
    } else {
    }
    return
  }
  func.func @transform_0(%arg0: i32, %arg1: i32) -> (i32, i32) {
    %c0_i32 = arith.constant 0 : i32
    %c0_i32_0 = arith.constant 0 : i32
    return %c0_i32, %arg1 : i32, i32
  }
  func.func @transform_1(%arg0: i32, %arg1: i32) -> (i32, i32) {
    %c0_i32 = arith.constant 0 : i32
    %c0_i32_0 = arith.constant 0 : i32
    return %arg0, %c0_i32 : i32, i32
  }
  func.func @transform_2(%arg0: i32, %arg1: i32) -> (i32, i32, i32) {
    %c0_i32 = arith.constant 0 : i32
    %c0_i32_0 = arith.constant 0 : i32
    %c0_i32_1 = arith.constant 0 : i32
    return %c0_i32, %arg0, %c0_i32_0 : i32, i32, i32
  }
  func.func @transform_3(%arg0: i32, %arg1: i32) -> (i32, i32) {
    %c0_i32 = arith.constant 0 : i32
    %c0_i32_0 = arith.constant 0 : i32
    return %arg1, %c0_i32 : i32, i32
  }
  func.func @transform_4(%arg0: i32, %arg1: i32) -> (i32, i32, i32) {
    %c0_i32 = arith.constant 0 : i32
    %c0_i32_0 = arith.constant 0 : i32
    %c0_i32_1 = arith.constant 0 : i32
    return %c0_i32, %arg1, %c0_i32_0 : i32, i32, i32
  }
  func.func @transform_5(%arg0: i32, %arg1: i32) -> (i32, i32) {
    %c0_i32 = arith.constant 0 : i32
    %c0_i32_0 = arith.constant 0 : i32
    %c0_i32_1 = arith.constant 0 : i32
    return %c0_i32, %c0_i32_0 : i32, i32
  }
  func.func @transform_6(%arg0: i32, %arg1: i32) -> (i32, i32) {
    %c0_i32 = arith.constant 0 : i32
    %c0_i32_0 = arith.constant 0 : i32
    %c0_i32_1 = arith.constant 0 : i32
    return %c0_i32, %c0_i32_0 : i32, i32
  }
  func.func @transform_7(%arg0: i32, %arg1: i32) -> (i32, i32) {
    %c0_i32 = arith.constant 0 : i32
    %c0_i32_0 = arith.constant 0 : i32
    return %arg0, %c0_i32 : i32, i32
  }
}

</mosaic_0001>

<bundles_post_ra>
// kernel: tpu_custom_call.1
= control target key start
LH: loop header
LB: loop body
LE: loop exit
PB: predicated region body
PF: predicated region fallthrough
CT: control target
= control target key end

     0   :  { %s8715_s0 = inlined_call_operand.vmem [shape: s32[1,256], index: 0, kind: input, shape index: {}]   ;;  %s8716_s1 = inlined_call_operand.vmem [shape: f32[16,8], index: 1, kind: input, shape index: {}]   ;;  %s8717_s2 = inlined_call_operand.vmem [shape: f32[3,16,4], index: 2, kind: input, shape index: {}]   ;;  %s8718_s3 = inlined_call_operand.vmem [shape: bf16[256,8], index: 3, kind: input, shape index: {}]   ;;  %s8719_s4 = inlined_call_operand.vmem [shape: bf16[3,256,4], index: 4, kind: input, shape index: {}]   ;;  %s8720_s5 = inlined_call_operand.vmem [shape: bf16[192,128], index: 5, kind: input, shape index: {}]   ;;  %s8721_s6 = inlined_call_operand.vmem [shape: f32[8,128], index: 6, kind: input, shape index: {}]   ;;  %s8722_s7 = inlined_call_operand.vmem [shape: f32[16,3], index: 7, kind: output, shape index: {}]  }
   0x1   :  { %8754 = sst [smem:[#allocation36_spill]] %s8717_s2 }
   0x2   :  { %8755 = sst [smem:[#allocation37_spill]] %s8719_s4 }
   0x3   :  { %s6273_s24 = smov 0   ;;  %s6275_s25 = smov 0  }
   0x4   :  { %s6277_s26 = smov 0   ;;  %s6279_s27 = smov 0  }
   0x5   :  { %s6281_s28 = smov 0   ;;  %s6283_s29 = smov 0  }
   0x6   :  { %s6285_s30 = smov 0   ;;  %s6287_s8 = smov 0  }
   0x7   :  { %s6289_s9 = smov 0  }
   0x8 LB: > { %8756 = sst [smem:[#allocation5_spill]] %s6212_s30  ;;  %s26_s10 = sadd.s32 1, %s6212_s30  ;;  %s6220_s9 = sphi %s6289_s9, %s17_s9   ;;  %s6216_s8 = sphi %s6287_s8, %s8932_s8   ;;  %s6212_s30 = sphi %s6285_s30, %s8931_s30   ;;  %s6208_s29 = sphi %s6283_s29, %s8924_s29   ;;  %s6204_s28 = sphi %s6281_s28, %s8923_s28   ;;  %s6200_s27 = sphi %s6279_s27, %s8930_s27   ;;  %s6196_s26 = sphi %s6277_s26, %s8929_s26   ;;  %s6192_s25 = sphi %s6275_s25, %s8928_s25   ;;  %s6188_s24 = sphi %s6273_s24, %s8927_s24  }
   0x9   : > { %8757 = sst [smem:[#allocation6_spill]] %s6216_s8  ;;  %s29_s11 = sadd.s32 1, %s6216_s8 }
   0xa   : > { %p27_p0 = scmp.ge.s32.totalorder %s26_s10, 2  ;;  %s88_s12 = sadd.s32 1, %s6200_s27 }
   0xb   : > { %p95_p1 = scmp.ne.s32.totalorder %s6200_s27, %s6196_s26  ;;  %p96_p2 = scmp.eq.s32.totalorder %s6220_s9, 0 }
   0xc   : > { %s8934_s10 = smov (%p27_p0, %s26_s10), 0  ;;  %s8936_s11 = smov (!%p27_p0, %s29_s11), %s6216_s8 }
   0xd   : > { %8758 = sst [smem:[#allocation7_spill]] %s8934_s10  ;;  %p6327_p3 = por %p96_p2, %p95_p1 }
   0xe   : > { %s137_s14 = ssub.s32 %s6212_s30, %s8934_s10  ;;  %p31_p4 = scmp.ge.s32.totalorder %s8936_s11, 2 }
   0xf   : > { %p138_p5 = scmp.eq.s32.totalorder %s137_s14, 0  ;;  %s140_s15 = sadd.s32 1, %s6192_s25 }
  0x10   : > { %p147_p6 = scmp.ne.s32.totalorder %s6192_s25, %s6188_s24  ;;  %s8938_s11 = smov (%p31_p4, %s8936_s11), 0 }
  0x11   : > { %8760 = sst [smem:[#allocation8_spill]] %s8938_s11  ;;  %s85_s17 = ssub.s32 %s6216_s8, %s8938_s11 }
  0x12   : > { %s6339_s16 = scalar_select %p138_p5, %s6192_s25, %s140_s15  }
  0x13   : > { %p6343_p7 = por %p147_p6, %p96_p2  ;;  %p86_p8 = scmp.eq.s32.totalorder %s85_s17, 0 }
  0x14   : > { %p5142_p9 = scmp.ge.s32.totalorder %s6220_s9, 4 }
  0x15   : > { %s6348_s19 = scalar_select %p86_p8, %s6200_s27, %s88_s12  }
  0x16   : > { %247 = sbr.rel (%p5142_p9) target bundleno = 74 (0x4a), region = 24 }
  0x17   : > { %8762 = sst [smem:[#allocation9_spill]] %s6348_s19 }
  0x1b   : > { %263 = sbr.rel (!%p6327_p3) target bundleno = 40 (0x28), region = 36  ;;  %s265_s20 = sand.u32 (%p6327_p3), 1, %s6200_s27  }
  0x1c   : > { %s5143_s21 = sshll.u32 (%p6327_p3), %s6216_s8, 3  ;;  %s5594_s22 = smul.u32 (%p6327_p3), 24, %s265_s20 }
  0x1d   : > { %s8763_s2 = sld [smem:[#allocation36_spill]] (%p6327_p3) }
  0x1e   : > { %s267_s12 = scalar_lea.vmem (%p6327_p3), [#allocation3], %s5594_s22 }
  0x23   : > { %s269_s15 = scalar_lea.vmem %s8763_s2, %s5143_s21 }
  0x24   : > { %v302_v0 = vld [vmem:[%s269_s15] sm:$0xff]  ;;  %v304_v1 = vld [vmem:[%s269_s15 + $0x10] sm:$0xff] }
  0x25   : > { %v306_v2 = vld [vmem:[%s269_s15 + $0x20] sm:$0xff]  ;;  %303 = vst [vmem:[%s267_s12] sm:$0xff] %v302_v0 }
  0x26   : > { %305 = vst [vmem:[%s267_s12 + $0x8] sm:$0xff] %v304_v1 }
  0x27   : > { %307 = vst [vmem:[%s267_s12 + $0x10] sm:$0xff] %v306_v2 }
  0x28 PF: > { %322 = sbr.rel (!%p6343_p7) target bundleno = 74 (0x4a), region = 78  ;;  %s324_s13 = sand.u32 (%p6343_p7), 1, %s6192_s25  }
  0x29   : > { %s5557_s17 = sshll.u32 (%p6343_p7), %s6212_s30, 6  ;;  %s5595_s20 = smul.u32 (%p6343_p7), 192, %s324_s13 }
  0x2a   : > { %s8764_s4 = sld [smem:[#allocation37_spill]] (%p6343_p7) }
  0x2b   : > { %s6370_s18 = scalar_lea.vmem (%p6343_p7), [#allocation4], %s5595_s20 }
  0x30   : > { %s6365_s21 = scalar_lea.vmem %s8764_s4, %s5557_s17 }
  0x31   : > { %v346_v3 = vld [vmem:[%s6365_s21] sm:$0xff]   ;;  %v350_v4 = vld [vmem:[%s6365_s21 + $0x8] sm:$0xff]   ;;  %v354_v5 = vld [vmem:[%s6365_s21 + $0x10] sm:$0xff]  }
  0x32   : > { %347 = vst [vmem:[%s6370_s18] sm:$0xff] %v346_v3   ;;  %v358_v6 = vld [vmem:[%s6365_s21 + $0x18] sm:$0xff]   ;;  %v362_v7 = vld [vmem:[%s6365_s21 + $0x20] sm:$0xff]   ;;  %v366_v8 = vld [vmem:[%s6365_s21 + $0x28] sm:$0xff]  }
  0x33   : > { %351 = vst [vmem:[%s6370_s18 + $0x8] sm:$0xff] %v350_v4   ;;  %v370_v9 = vld [vmem:[%s6365_s21 + $0x30] sm:$0xff]   ;;  %v374_v10 = vld [vmem:[%s6365_s21 + $0x38] sm:$0xff]   ;;  %v378_v11 = vld [vmem:[%s6365_s21 + $0x80] sm:$0xff]  }
  0x34   : > { %355 = vst [vmem:[%s6370_s18 + $0x10] sm:$0xff] %v354_v5   ;;  %v382_v12 = vld [vmem:[%s6365_s21 + $0x88] sm:$0xff]   ;;  %v386_v13 = vld [vmem:[%s6365_s21 + $0x90] sm:$0xff]   ;;  %v390_v14 = vld [vmem:[%s6365_s21 + $0x98] sm:$0xff]  }
  0x35   : > { %359 = vst [vmem:[%s6370_s18 + $0x18] sm:$0xff] %v358_v6   ;;  %v394_v15 = vld [vmem:[%s6365_s21 + $0xa0] sm:$0xff]   ;;  %v398_v16 = vld [vmem:[%s6365_s21 + $0xa8] sm:$0xff]   ;;  %v402_v17 = vld [vmem:[%s6365_s21 + $0xb0] sm:$0xff]  }
  0x36   : > { %363 = vst [vmem:[%s6370_s18 + $0x20] sm:$0xff] %v362_v7   ;;  %v406_v18 = vld [vmem:[%s6365_s21 + $0xb8] sm:$0xff]   ;;  %v410_v19 = vld [vmem:[%s6365_s21 + $0x100] sm:$0xff]   ;;  %v414_v20 = vld [vmem:[%s6365_s21 + $0x108] sm:$0xff]  }
  0x37   : > { %367 = vst [vmem:[%s6370_s18 + $0x28] sm:$0xff] %v366_v8   ;;  %v418_v21 = vld [vmem:[%s6365_s21 + $0x110] sm:$0xff]   ;;  %v422_v22 = vld [vmem:[%s6365_s21 + $0x118] sm:$0xff]   ;;  %v426_v23 = vld [vmem:[%s6365_s21 + $0x120] sm:$0xff]  }
  0x38   : > { %371 = vst [vmem:[%s6370_s18 + $0x30] sm:$0xff] %v370_v9   ;;  %v430_v24 = vld [vmem:[%s6365_s21 + $0x128] sm:$0xff]   ;;  %v434_v25 = vld [vmem:[%s6365_s21 + $0x130] sm:$0xff]   ;;  %v438_v26 = vld [vmem:[%s6365_s21 + $0x138] sm:$0xff]  }
  0x39   : > { %375 = vst [vmem:[%s6370_s18 + $0x38] sm:$0xff] %v374_v10  }
  0x3a   : > { %379 = vst [vmem:[%s6370_s18 + $0x40] sm:$0xff] %v378_v11  }
  0x3b   : > { %383 = vst [vmem:[%s6370_s18 + $0x48] sm:$0xff] %v382_v12  }
  0x3c   : > { %387 = vst [vmem:[%s6370_s18 + $0x50] sm:$0xff] %v386_v13  }
  0x3d   : > { %391 = vst [vmem:[%s6370_s18 + $0x58] sm:$0xff] %v390_v14  }
  0x3e   : > { %395 = vst [vmem:[%s6370_s18 + $0x60] sm:$0xff] %v394_v15  }
  0x3f   : > { %399 = vst [vmem:[%s6370_s18 + $0x68] sm:$0xff] %v398_v16  }
  0x40   : > { %403 = vst [vmem:[%s6370_s18 + $0x70] sm:$0xff] %v402_v17  }
  0x41   : > { %407 = vst [vmem:[%s6370_s18 + $0x78] sm:$0xff] %v406_v18  }
  0x42   : > { %411 = vst [vmem:[%s6370_s18 + $0x80] sm:$0xff] %v410_v19  }
  0x43   : > { %415 = vst [vmem:[%s6370_s18 + $0x88] sm:$0xff] %v414_v20  }
  0x44   : > { %419 = vst [vmem:[%s6370_s18 + $0x90] sm:$0xff] %v418_v21  }
  0x45   : > { %423 = vst [vmem:[%s6370_s18 + $0x98] sm:$0xff] %v422_v22  }
  0x46   : > { %427 = vst [vmem:[%s6370_s18 + $0xa0] sm:$0xff] %v426_v23  }
  0x47   : > { %431 = vst [vmem:[%s6370_s18 + $0xa8] sm:$0xff] %v430_v24  }
  0x48   : > { %435 = vst [vmem:[%s6370_s18 + $0xb0] sm:$0xff] %v434_v25  }
  0x49   : > { %439 = vst [vmem:[%s6370_s18 + $0xb8] sm:$0xff] %v438_v26  }
  0x4a PF: > { %p5146_p10 = scmp.ge.s32.totalorder %s6220_s9, 1  ;;  %p560_p11 = scmp.lt.s32.totalorder %s6220_s9, 5 }
  0x4c   : > { %p561_p12 = pnand %p5146_p10, %p560_p11 }
  0x4e   : > { %564 = sbr.rel (%p561_p12) target bundleno = 3613 (0xe1d), region = 119 }
  0x53   : > { %s567_s10 = sand.u32 1, %s6196_s26   ;;  %s574_s11 = sand.u32 1, %s6188_s24  }
  0x54   : > { %s5596_s22 = smul.u32 24, %s567_s10  ;;  %p620_p13 = scmp.lt.s32.totalorder %s6204_s28, 1 }
  0x55   : > { %s5597_s23 = smul.u32 192, %s574_s11  ;;  %p623_p0 = scmp.lt.s32.totalorder %s6208_s29, 1 }
  0x56   : > { %s5148_s14 = sshll.u32 %s6204_s28, 4  ;;  %s6447_s13 = scalar_lea.vmem [#allocation3], %s5596_s22 }
  0x57   : > { %p628_p1 = scmp.lt.s32.totalorder %s5148_s14, 31  ;;  %p5151_p2 = scmp.ne.s32.totalorder %s6204_s28, 0 }
  0x58   : > { %s6425_s15 = scalar_select %p620_p13, %s6204_s28, 1 }
  0x59   : > { %s624_s12 = scalar_select %p623_p0, %s6208_s29, 1 }
  0x5a   : > { %s622_s20 = scalar_lea.vmem %s8715_s0, %s6425_s15  ;;  %s8940_s14 = smov (!%p628_p1, %s5148_s14), 31 }
  0x5b   : > { %s5147_s21 = sshll.u32 %s624_s12, 3  ;;  %s5149_s4 = sshll.u32 %s8940_s14, 2 }
  0x5c   : > { %s6435_s26 = scalar_lea.vmem %s8716_s1, %s5147_s21  ;;  %s6440_s11 = scalar_lea.vmem %s8722_s7, %s5147_s21 }
  0x5d   : > { %s6445_s19 = scalar_lea.vmem %s8718_s3, %s5149_s4  ;;  %s6449_s12 = scalar_lea.vmem [#allocation4], %s5597_s23 }
  0x5e   : > { %642 = sbr.rel (%p5151_p2) target bundleno = 101 (0x65), region = 131 }
  0x63   : > { %vm643_vm0 = vcmask 162816   ;;  %v6222_v27 = vmov 0.0  }
  0x64   : > { %644 = vst.msk [vmem:[#allocation2] sm:$0xff] %vm643_vm0, %v6222_v27 }
  0x65 PF: > { %v831_v28 = vld [vmem:[%s8720_s5] sm:$0x3]  ;;  %vm905_vm1 = vcmask 1041408   ;;  %v5566_v29 = vld [vmem:[%s6449_s12] sm:$0xff]  ;;  %vm832_vm2 = vcmask 31744   ;;  %v5568_v32 = vld [vmem:[%s6449_s12 + $0x10] sm:$0xff] }
  0x66   : > { %v907_v30 = vsel %vm905_vm1, %v831_v28, 0  ;;  %v5567_v31 = vld [vmem:[%s6449_s12 + $0x8] sm:$0xff]  ;;  %v5569_v33 = vld [vmem:[%s6449_s12 + $0x18] sm:$0xff]  ;;  %v5570_v34 = vld [vmem:[%s6449_s12 + $0x20] sm:$0xff]  ;;  %s6224_s17 = smov 12   ;;  %s6225_s4 = smov 16  }
  0x67   : > { %916 = vmatpush.bf16.msra.mxu0 %v907_v30  ;;  %v5571_v35 = vld [vmem:[%s6449_s12 + $0x28] sm:$0xff]  ;;  %v5572_v36 = vld [vmem:[%s6449_s12 + $0x30] sm:$0xff]  ;;  %v5573_v39 = vld [vmem:[%s6449_s12 + $0x38] sm:$0xff]  ;;  %s5520_s30 = sshll.u32 %s6208_s29, 3  ;;  %p5523_p3 = scmp.ne.s32.totalorder %s6204_s28, 1 }
  0x68   : > { %v1588_v37 = vld [vmem:[%s8720_s5 + $0xc] sm:$0x3]  ;;  %v5574_v40 = vld [vmem:[%s6449_s12 + $0x40] sm:$0xff]  ;;  %v5575_v44 = vld [vmem:[%s6449_s12 + $0x48] sm:$0xff]  ;;  %s6227_s15 = smov (!%p5523_p3), 112   ;;  %s6229_s22 = smov (!%p5523_p3), 116  }
  0x69   : > { %v1662_v38 = vsel %vm905_vm1, %v1588_v37, 0  ;;  %v5576_v48 = vld [vmem:[%s6449_s12 + $0x50] sm:$0xff]  ;;  %v5577_v52 = vld [vmem:[%s6449_s12 + $0x58] sm:$0xff]  ;;  %v5578_v56 = vld [vmem:[%s6449_s12 + $0x60] sm:$0xff] }
  0x6a   : > { %5280 = vmatmul.msk.bf16.vlgmr.msra.gmra.mxu0 %vm832_vm2, %v5566_v29  ;;  %1671 = vmatpush.bf16.msra.mxu3 %v1662_v38  ;;  %v5579_v60 = vld [vmem:[%s6449_s12 + $0x68] sm:$0xff]  ;;  %v5580_v0 = vld [vmem:[%s6449_s12 + $0x70] sm:$0xff]  ;;  %v5581_v6 = vld [vmem:[%s6449_s12 + $0x78] sm:$0xff] }
  0x6b   : > { %v1335_v4 = vld [vmem:[%s8720_s5 + $0x8] sm:$0x3]  ;;  %v5582_v10 = vld [vmem:[%s6449_s12 + $0x80] sm:$0xff]  ;;  %v5583_v20 = vld [vmem:[%s6449_s12 + $0x88] sm:$0xff] }
  0x6c   : > { %v1361_v5 = vsel %vm905_vm1, %v1335_v4, 0 }
  0x6d   : > { %1370 = vmatpush.bf16.msrb.mxu0 %v1361_v5  ;;  %5592 = vmatpush.bf16.msra.mxu2 %v1361_v5  ;;  %v5587_v5 = vld [vmem:[%s6449_s12 + $0xa8] sm:$0xff] }
  0x7a   : > { %5281 = vmatmul.msk.bf16.gmra.mxu0 %vm832_vm2, %v5567_v31 }
  0x8a   : > { %5282 = vmatmul.msk.bf16.gmra.mxu0 %vm832_vm2, %v5568_v32  ;;  %v5584_v32 = vld [vmem:[%s6449_s12 + $0x90] sm:$0xff] }
  0x9a   : > { %5283 = vmatmul.msk.bf16.gmra.mxu0 %vm832_vm2, %v5569_v33 }
  0xaa   : > { %5284 = vmatmul.msk.bf16.gmra.mxu0 %vm832_vm2, %v5570_v34 }
  0xba   : > { %5285 = vmatmul.msk.bf16.gmra.mxu0 %vm832_vm2, %v5571_v35 }
  0xca   : > { %5286 = vmatmul.msk.bf16.gmra.mxu0 %vm832_vm2, %v5572_v36 }
  0xda   : > { %5287 = vmatmul.msk.bf16.gmra.mxu0 %vm832_vm2, %v5573_v39 }
  0xe7   : > { %v918_v41 = vpop.f32.mrf.mxu0 }
  0xe8   : > { %v1038_v12 = vmul.f32 %v918_v41, %v918_v41 }
  0xea   : > { %5288 = vmatmul.msk.bf16.gmra.mxu0 %vm832_vm2, %v5574_v40 }
  0xef   : > { %v920_v42 = vpop.f32.mrf.mxu0 }
  0xf0   : > { %v1564_v43 = vpack.c.bf16 %v920_v42, %v918_v41  ;;  %v1039_v16 = vmul.f32 %v920_v42, %v920_v42 }
  0xf2   : > { %5352 = vmatmul.msk.bf16.vlgmr.msra.gmra.mxu3 %vm832_vm2, %v1564_v43  ;;  %v5585_v43 = vld [vmem:[%s6449_s12 + $0x98] sm:$0xff] }
  0xf7   : > { %v923_v45 = vpop.f32.mrf.mxu0 }
  0xf8   : > { %v1040_v22 = vmul.f32 %v923_v45, %v923_v45 }
  0xfa   : > { %5289 = vmatmul.msk.bf16.gmra.mxu0 %vm832_vm2, %v5575_v44 }
  0xff   : > { %v925_v46 = vpop.f32.mrf.mxu0 }
 0x100   : > { %v1565_v47 = vpack.c.bf16 %v925_v46, %v923_v45  ;;  %v1041_v27 = vmul.f32 %v925_v46, %v925_v46 }
 0x102   : > { %5353 = vmatmul.msk.bf16.gmra.mxu3 %vm832_vm2, %v1565_v47 }
 0x107   : > { %v6483_v49 = vpop.f32.mrf.mxu0 }
 0x108   : > { %v1042_v34 = vmul.f32 %v6483_v49, %v6483_v49 }
 0x10a   : > { %5290 = vmatmul.msk.bf16.gmra.mxu0 %vm832_vm2, %v5576_v48 }
 0x10f   : > { %v6486_v50 = vpop.f32.mrf.mxu0 }
 0x110   : > { %v1566_v51 = vpack.c.bf16 %v6486_v50, %v6483_v49  ;;  %v1043_v38 = vmul.f32 %v6486_v50, %v6486_v50 }
 0x112   : > { %5354 = vmatmul.msk.bf16.gmra.mxu3 %vm832_vm2, %v1566_v51 }
 0x117   : > { %v6492_v53 = vpop.f32.mrf.mxu0 }
 0x118   : > { %v1044_v45 = vmul.f32 %v6492_v53, %v6492_v53 }
 0x11a   : > { %5291 = vmatmul.msk.bf16.gmra.mxu0 %vm832_vm2, %v5577_v52 }
 0x11f   : > { %v6495_v54 = vpop.f32.mrf.mxu0 }
 0x120   : > { %v1567_v55 = vpack.c.bf16 %v6495_v54, %v6492_v53  ;;  %v1045_v50 = vmul.f32 %v6495_v54, %v6495_v54  ;;  %v5586_v53 = vld [vmem:[%s6449_s12 + $0xa0] sm:$0xff] }
 0x122   : > { %5355 = vmatmul.msk.bf16.gmra.mxu3 %vm832_vm2, %v1567_v55 }
 0x127   : > { %v6501_v57 = vpop.f32.mrf.mxu0 }
 0x12a   : > { %5292 = vmatmul.msk.bf16.gmra.mxu0 %vm832_vm2, %v5578_v56 }
 0x12f   : > { %v6504_v58 = vpop.f32.mrf.mxu0 }
 0x130   : > { %v1568_v59 = vpack.c.bf16 %v6504_v58, %v6501_v57 }
 0x132   : > { %5356 = vmatmul.msk.bf16.gmra.mxu3 %vm832_vm2, %v1568_v59 }
 0x137   : > { %v6510_v61 = vpop.f32.mrf.mxu0 }
 0x13a   : > { %5293 = vmatmul.msk.bf16.gmra.mxu0 %vm832_vm2, %v5579_v60  ;;  %v1046_v60 = vmul.f32 %v6501_v57, %v6501_v57 }
 0x13f   : > { %v6513_v62 = vpop.f32.mrf.mxu0 }
 0x140   : > { %v1569_v63 = vpack.c.bf16 %v6513_v62, %v6510_v61 }
 0x142   : > { %5357 = vmatmul.msk.bf16.gmra.mxu3 %vm832_vm2, %v1569_v63 }
 0x147   : > { %v6519_v1 = vpop.f32.mrf.mxu0 }
 0x14a   : > { %5294 = vmatmul.msk.bf16.gmra.mxu0 %vm832_vm2, %v5580_v0 }
 0x14f   : > { %v6522_v2 = vpop.f32.mrf.mxu0 }
 0x150   : > { %v1570_v3 = vpack.c.bf16 %v6522_v2, %v6519_v1 }
 0x152   : > { %5358 = vmatmul.msk.bf16.gmra.mxu3 %vm832_vm2, %v1570_v3 }
 0x157   : > { %v6532_v7 = vpop.f32.mrf.mxu0 }
 0x15a   : > { %5295 = vmatmul.msk.bf16.gmra.mxu0 %vm832_vm2, %v5581_v6 }
 0x15f   : > { %v6535_v8 = vpop.f32.mrf.mxu0 }
 0x160   : > { %v1571_v9 = vpack.c.bf16 %v6535_v8, %v6532_v7 }
 0x162   : > { %5359 = vmatmul.msk.bf16.gmra.mxu3 %vm832_vm2, %v1571_v9  ;;  %v1048_v9 = vmul.f32 %v6510_v61, %v6510_v61  ;;  %v1050_v61 = vmul.f32 %v6519_v1, %v6519_v1  ;;  %v1052_v1 = vmul.f32 %v6532_v7, %v6532_v7 }
 0x167   : > { %v958_v11 = vpop.f32.mrf.mxu0 }
 0x168   : > { %v1054_v13 = vmul.f32 %v958_v11, %v958_v11 }
 0x16a   : > { %v6541_v14 = vadd.f32 %v1054_v13, %v1038_v12  ;;  %5296 = vmatmul.msk.bf16.gmra.mxu0 %vm832_vm2, %v5582_v10 }
 0x16f   : > { %v960_v15 = vpop.f32.mrf.mxu0 }
 0x170   : > { %v1055_v17 = vmul.f32 %v960_v15, %v960_v15  ;;  %v1572_v18 = vpack.c.bf16 %v960_v15, %v958_v11 }
 0x172   : > { %v6544_v19 = vadd.f32 %v1055_v17, %v1039_v16  ;;  %5360 = vmatmul.msk.bf16.gmra.mxu3 %vm832_vm2, %v1572_v18  ;;  %v5588_v16 = vld [vmem:[%s6449_s12 + $0xb0] sm:$0xff] }
 0x175   : > { %v6551_v25 = vpop.f32.mrf.mxu3 }
 0x177   : > { %v963_v21 = vpop.f32.mrf.mxu0 }
 0x178   : > { %v1056_v23 = vmul.f32 %v963_v21, %v963_v21 }
 0x17a   : > { %v6548_v24 = vadd.f32 %v1056_v23, %v1040_v22  ;;  %5297 = vmatmul.msk.bf16.gmra.mxu0 %vm832_vm2, %v5583_v20 }
 0x17d   : > { %v6556_v31 = vpop.f32.mrf.mxu3 }
 0x17f   : > { %v965_v26 = vpop.f32.mrf.mxu0 }
 0x180   : > { %v1057_v28 = vmul.f32 %v965_v26, %v965_v26  ;;  %v1573_v29 = vpack.c.bf16 %v965_v26, %v963_v21 }
 0x182   : > { %v6553_v30 = vadd.f32 %v1057_v28, %v1041_v27  ;;  %5361 = vmatmul.msk.bf16.gmra.mxu3 %vm832_vm2, %v1573_v29  ;;  %v5589_v27 = vld [vmem:[%s6449_s12 + $0xb8] sm:$0xff] }
 0x185   : > { %v6566_v39 = vpop.f32.mrf.mxu3 }
 0x187   : > { %v968_v33 = vpop.f32.mrf.mxu0 }
 0x188   : > { %v1058_v35 = vmul.f32 %v968_v33, %v968_v33 }
 0x18a   : > { %v6561_v36 = vadd.f32 %v1058_v35, %v1042_v34  ;;  %5298 = vmatmul.msk.bf16.gmra.mxu0 %vm832_vm2, %v5584_v32 }
 0x18d   : > { %v6574_v47 = vpop.f32.mrf.mxu3 }
 0x18f   : > { %v970_v37 = vpop.f32.mrf.mxu0 }
 0x190   : > { %v1059_v40 = vmul.f32 %v970_v37, %v970_v37  ;;  %v1574_v41 = vpack.c.bf16 %v970_v37, %v968_v33 }
 0x192   : > { %v6568_v42 = vadd.f32 %v1059_v40, %v1043_v38  ;;  %5362 = vmatmul.msk.bf16.gmra.mxu3 %vm832_vm2, %v1574_v41 }
 0x195   : > { %v6584_v56 = vpop.f32.mrf.mxu3 }
 0x197   : > { %v973_v44 = vpop.f32.mrf.mxu0 }
 0x198   : > { %v1060_v46 = vmul.f32 %v973_v44, %v973_v44 }
 0x19a   : > { %v6576_v48 = vadd.f32 %v1060_v46, %v1044_v45  ;;  %5299 = vmatmul.msk.bf16.gmra.mxu0 %vm832_vm2, %v5585_v43 }
 0x19d   : > { %v6592_v54 = vpop.f32.mrf.mxu3 }
 0x19f   : > { %v975_v49 = vpop.f32.mrf.mxu0 }
 0x1a0   : > { %v1061_v51 = vmul.f32 %v975_v49, %v975_v49  ;;  %v1575_v52 = vpack.c.bf16 %v975_v49, %v973_v44 }
 0x1a2   : > { %v6581_v55 = vadd.f32 %v1061_v51, %v1045_v50  ;;  %5363 = vmatmul.msk.bf16.gmra.mxu3 %vm832_vm2, %v1575_v52 }
 0x1a5   : > { %v6601_v57 = vpop.f32.mrf.mxu3 }
 0x1a7   : > { %v978_v59 = vpop.f32.mrf.mxu0 }
 0x1a8   : > { %v1062_v63 = vmul.f32 %v978_v59, %v978_v59 }
 0x1aa   : > { %v6589_v0 = vadd.f32 %v1062_v63, %v1046_v60  ;;  %5300 = vmatmul.msk.bf16.gmra.mxu0 %vm832_vm2, %v5586_v53 }
 0x1ad   : > { %v6609_v15 = vpop.f32.mrf.mxu3 }
 0x1af   : > { %v6594_v3 = vpop.f32.mrf.mxu0 }
 0x1b0   : > { %v1576_v4 = vpack.c.bf16 %v6594_v3, %v978_v59 }
 0x1b2   : > { %5364 = vmatmul.msk.bf16.gmra.mxu3 %vm832_vm2, %v1576_v4 }
 0x1b5   : > { %v6618_v21 = vpop.f32.mrf.mxu3 }
 0x1b7   : > { %v983_v6 = vpop.f32.mrf.mxu0 }
 0x1b8   : > { %v1064_v10 = vmul.f32 %v983_v6, %v983_v6 }
 0x1ba   : > { %v6603_v11 = vadd.f32 %v1064_v10, %v1048_v9  ;;  %5301 = vmatmul.msk.bf16.gmra.mxu0 %vm832_vm2, %v5587_v5 }
 0x1bd   : > { %v6624_v26 = vpop.f32.mrf.mxu3 }
 0x1bf   : > { %v6606_v12 = vpop.f32.mrf.mxu0 }
 0x1c0   : > { %v1577_v13 = vpack.c.bf16 %v6606_v12, %v983_v6 }
 0x1c2   : > { %5365 = vmatmul.msk.bf16.gmra.mxu3 %vm832_vm2, %v1577_v13 }
 0x1c5   : > { %v6634_v34 = vpop.f32.mrf.mxu3 }
 0x1c7   : > { %v988_v17 = vpop.f32.mrf.mxu0 }
 0x1c8   : > { %v1066_v18 = vmul.f32 %v988_v17, %v988_v17 }
 0x1ca   : > { %v6615_v20 = vadd.f32 %v1066_v18, %v1050_v61  ;;  %5302 = vmatmul.msk.bf16.gmra.mxu0 %vm832_vm2, %v5588_v16 }
 0x1cd   : > { %v6638_v40 = vpop.f32.mrf.mxu3 }
 0x1cf   : > { %v6620_v22 = vpop.f32.mrf.mxu0 }
 0x1d0   : > { %v1578_v23 = vpack.c.bf16 %v6620_v22, %v988_v17 }
 0x1d2   : > { %5366 = vmatmul.msk.bf16.gmra.mxu3 %vm832_vm2, %v1578_v23 }
 0x1d5   : > { %v6643_v50 = vpop.f32.mrf.mxu3 }
 0x1d7   : > { %v993_v28 = vpop.f32.mrf.mxu0 }
 0x1d8   : > { %v1068_v29 = vmul.f32 %v993_v28, %v993_v28 }
 0x1da   : > { %v6629_v32 = vadd.f32 %v1068_v29, %v1052_v1  ;;  %5303 = vmatmul.msk.bf16.gmra.mxu0 %vm832_vm2, %v5589_v27 }
 0x1df   : > { %v6632_v33 = vpop.f32.mrf.mxu0 }
 0x1e0   : > { %v1579_v35 = vpack.c.bf16 %v6632_v33, %v993_v28 }
 0x1e2   : > { %5367 = vmatmul.msk.bf16.gmra.mxu3 %vm832_vm2, %v1579_v35 }
 0x1e7   : > { %v998_v37 = vpop.f32.mrf.mxu0 }
 0x1e8   : > { %v1086_v38 = vmul.f32 %v998_v37, %v998_v37 }
 0x1ea   : > { %v1102_v41 = vadd.f32 %v1086_v38, %v6541_v14 }
 0x1ec   : > { %v1118_v7 = vmax.f32 %v1102_v41, 1e-05 }
 0x1ee   : > { %5806 = vrsqrt.f32 %v1118_v7  ;;  %vm1141_vm3 = vcmp.eq.f32.partialorder %v1118_v7, inf  ;;  %vm1143_vm5 = vcmp.eq.f32.partialorder %v1118_v7, 0.0 }
 0x1ef   : > { %v1000_v43 = vpop.f32.mrf.mxu0 }
 0x1f0   : > { %v1087_v44 = vmul.f32 %v1000_v43, %v1000_v43  ;;  %v1580_v45 = vpack.c.bf16 %v1000_v43, %v998_v37 }
 0x1f2   : > { %v1103_v46 = vadd.f32 %v1087_v44, %v6544_v19  ;;  %5368 = vmatmul.msk.bf16.gmra.mxu3 %vm832_vm2, %v1580_v45  ;;  %v6648_v19 = vpop.f32.mrf.mxu3 }
 0x1f4   : > { %v5807_v49 = vpop.eup %5806  ;;  %v1119_v51 = vmax.f32 %v1103_v46, 1e-05  ;;  %v1144_v46 = vand.u32 2147483648, %v1118_v7 }
 0x1f5   : > { %v1135_v52 = vmul.f32 %v5807_v49, %v1118_v7 }
 0x1f6   : > { %5808 = vrsqrt.f32 %v1119_v51  ;;  %vm1153_vm4 = vcmp.eq.f32.partialorder %v1119_v51, inf  ;;  %vm1155_vm6 = vcmp.eq.f32.partialorder %v1119_v51, 0.0 }
 0x1f7   : > { %v1003_v53 = vpop.f32.mrf.mxu0  ;;  %v1136_v59 = vmul.f32 %v5807_v49, %v1135_v52 }
 0x1f8   : > { %v1088_v60 = vmul.f32 %v1003_v53, %v1003_v53 }
 0x1f9   : > { %v1137_v63 = vmul.f32 0.5, %v1136_v59 }
 0x1fa   : > { %v1104_v14 = vadd.f32 %v1088_v60, %v6548_v24  ;;  %v6654_v44 = vpop.f32.mrf.mxu3 }
 0x1fb   : > { %v1138_v4 = vsub.f32 1.5, %v1137_v63  ;;  %8765 = vst [vmem:[#allocation10_spill] sm:$0xff] %v6654_v44 }
 0x1fc   : > { %v5809_v5 = vpop.eup %5808  ;;  %v6646_v6 = vmax.f32 %v1104_v14, 1e-05 }
 0x1fd   : > { %v1147_v9 = vmul.f32 %v5809_v5, %v1119_v51  ;;  %v1139_v13 = vmul.f32 %v5807_v49, %v1138_v4 }
 0x1fe   : > { %5810 = vrsqrt.f32 %v6646_v6  ;;  %vm1165_vm7 = vcmp.eq.f32.partialorder %v6646_v6, inf  ;;  %vm1167_vm9 = vcmp.eq.f32.partialorder %v6646_v6, 0.0 }
 0x1ff   : > { %v1005_v10 = vpop.f32.mrf.mxu0  ;;  %v1148_v16 = vmul.f32 %v5809_v5, %v1147_v9  ;;  %v1140_v24 = vmul.f32 %v1139_v13, %v1118_v7 }
 0x200   : > { %v1089_v17 = vmul.f32 %v1005_v10, %v1005_v10  ;;  %v1581_v61 = vpack.c.bf16 %v1005_v10, %v1003_v53 }
 0x201   : > { %v1149_v18 = vmul.f32 0.5, %v1148_v16  ;;  %v1142_v38 = vsel %vm1141_vm3, %v1118_v7, %v1140_v24 }
 0x202   : > { %v1105_v23 = vadd.f32 %v1089_v17, %v6553_v30  ;;  %5369 = vmatmul.msk.bf16.gmra.mxu3 %vm832_vm2, %v1581_v61  ;;  %v1156_v30 = vand.u32 2147483648, %v1119_v51  ;;  %v1145_v59 = vsel %vm1143_vm5, %v1144_v46, %v1142_v38  ;;  %v6661_v61 = vpop.f32.mrf.mxu3 }
 0x203   : > { %v1150_v27 = vsub.f32 1.5, %v1149_v18  ;;  %8766 = vst [vmem:[#allocation11_spill] sm:$0xff] %v6661_v61 }
 0x204   : > { %v5811_v28 = vpop.eup %5810  ;;  %v1121_v1 = vmax.f32 %v1105_v23, 1e-05 }
 0x205   : > { %v1151_v29 = vmul.f32 %v5809_v5, %v1150_v27  ;;  %v1159_v35 = vmul.f32 %v5811_v28, %v6646_v6 }
 0x206   : > { %5812 = vrsqrt.f32 %v1121_v1  ;;  %vm1177_vm8 = vcmp.eq.f32.partialorder %v1121_v1, inf  ;;  %vm1179_vm10 = vcmp.eq.f32.partialorder %v1121_v1, 0.0 }
 0x207   : > { %v1008_v37 = vpop.f32.mrf.mxu0  ;;  %v1152_v41 = vmul.f32 %v1151_v29, %v1119_v51  ;;  %v1160_v43 = vmul.f32 %v5811_v28, %v1159_v35 }
 0x208   : > { %v1090_v45 = vmul.f32 %v1008_v37, %v1008_v37 }
 0x209   : > { %v1154_v49 = vsel %vm1153_vm4, %v1119_v51, %v1152_v41  ;;  %v1161_v52 = vmul.f32 0.5, %v1160_v43 }
 0x20a   : > { %v1106_v53 = vadd.f32 %v1090_v45, %v6561_v36  ;;  %v1157_v60 = vsel %vm1155_vm6, %v1156_v30, %v1154_v49  ;;  %v1180_v45 = vand.u32 2147483648, %v1121_v1  ;;  %vm1495_vm6 = vcmask 1043456  }
 0x20b   : > { %v1327_v63 = vpack.c.bf16 %v1157_v60, %v1145_v59  ;;  %v1162_v14 = vsub.f32 1.5, %v1161_v52 }
 0x20c   : > { %v5813_v4 = vpop.eup %5812  ;;  %v6657_v5 = vmax.f32 %v1106_v53, 1e-05 }
 0x20d   : > { %5304 = vmatmul.msk.bf16.vlgmr.msrb.gmra.mxu0 %vm832_vm2, %v1327_v63  ;;  %v1171_v9 = vmul.f32 %v5813_v4, %v1121_v1  ;;  %v1163_v13 = vmul.f32 %v5811_v28, %v1162_v14  ;;  %v6672_v14 = vpop.f32.mrf.mxu3 }
 0x20e   : > { %5814 = vrsqrt.f32 %v6657_v5  ;;  %vm1189_vm11 = vcmp.eq.f32.partialorder %v6657_v5, inf  ;;  %vm1191_vm13 = vcmp.eq.f32.partialorder %v6657_v5, 0.0 }
 0x20f   : > { %v1010_v10 = vpop.f32.mrf.mxu0  ;;  %v1172_v7 = vmul.f32 %v5813_v4, %v1171_v9  ;;  %v1164_v18 = vmul.f32 %v1163_v13, %v6646_v6 }
 0x210   : > { %v1091_v16 = vmul.f32 %v1010_v10, %v1010_v10  ;;  %v1582_v51 = vpack.c.bf16 %v1010_v10, %v1008_v37 }
 0x211   : > { %v1173_v17 = vmul.f32 0.5, %v1172_v7  ;;  %v1166_v37 = vsel %vm1165_vm7, %v6646_v6, %v1164_v18 }
 0x212   : > { %v1107_v36 = vadd.f32 %v1091_v16, %v6568_v42  ;;  %5370 = vmatmul.msk.bf16.gmra.mxu3 %vm832_vm2, %v1582_v51  ;;  %v1168_v42 = vand.u32 2147483648, %v6646_v6 }
 0x213   : > { %v1174_v23 = vsub.f32 1.5, %v1173_v17 }
 0x214   : > { %v5815_v24 = vpop.eup %5814  ;;  %v1123_v27 = vmax.f32 %v1107_v36, 1e-05  ;;  %v1169_v52 = vsel %vm1167_vm9, %v1168_v42, %v1166_v37 }
 0x215   : > { %v1175_v29 = vmul.f32 %v5813_v4, %v1174_v23  ;;  %v1183_v35 = vmul.f32 %v5815_v24, %v6657_v5 }
 0x216   : > { %5816 = vrsqrt.f32 %v1123_v27  ;;  %vm1201_vm12 = vcmp.eq.f32.partialorder %v1123_v27, inf  ;;  %vm1203_vm14 = vcmp.eq.f32.partialorder %v1123_v27, 0.0 }
 0x217   : > { %v1013_v28 = vpop.f32.mrf.mxu0  ;;  %v1176_v38 = vmul.f32 %v1175_v29, %v1121_v1  ;;  %v1184_v41 = vmul.f32 %v5815_v24, %v1183_v35  ;;  %v6684_v35 = vpop.f32.mrf.mxu3 }
 0x218   : > { %v1092_v43 = vmul.f32 %v1013_v28, %v1013_v28 }
 0x219   : > { %v1178_v46 = vsel %vm1177_vm8, %v1121_v1, %v1176_v38  ;;  %v1185_v30 = vmul.f32 0.5, %v1184_v41  ;;  %v1192_v41 = vand.u32 2147483648, %v6657_v5 }
 0x21a   : > { %v1108_v49 = vadd.f32 %v1092_v43, %v6576_v48  ;;  %v1181_v53 = vsel %vm1179_vm10, %v1180_v45, %v1178_v46  ;;  %v1204_v43 = vand.u32 2147483648, %v1123_v27 }
 0x21b   : > { %v1328_v59 = vpack.c.bf16 %v1181_v53, %v1169_v52  ;;  %v1186_v60 = vsub.f32 1.5, %v1185_v30 }
 0x21c   : > { %v5817_v63 = vpop.eup %5816  ;;  %v6674_v4 = vmax.f32 %v1108_v49, 1e-05 }
 0x21d   : > { %5305 = vmatmul.msk.bf16.gmra.mxu0 %vm832_vm2, %v1328_v59  ;;  %v1195_v9 = vmul.f32 %v5817_v63, %v1123_v27  ;;  %v1187_v10 = vmul.f32 %v5815_v24, %v1186_v60  ;;  %v1063_v60 = vmul.f32 %v6594_v3, %v6594_v3 }
 0x21e   : > { %5818 = vrsqrt.f32 %v6674_v4  ;;  %vm1213_vm15 = vcmp.eq.f32.partialorder %v6674_v4, inf  ;;  %vm1215_vm3 = vcmp.eq.f32.partialorder %v6674_v4, 0.0 }
 0x21f   : > { %v1015_v6 = vpop.f32.mrf.mxu0  ;;  %v1196_v1 = vmul.f32 %v5817_v63, %v1195_v9  ;;  %v1188_v51 = vmul.f32 %v1187_v10, %v6657_v5 }
 0x220   : > { %v1093_v13 = vmul.f32 %v1015_v6, %v1015_v6  ;;  %v1583_v7 = vpack.c.bf16 %v1015_v6, %v1013_v28 }
 0x221   : > { %v1197_v48 = vmul.f32 0.5, %v1196_v1  ;;  %v6701_v1 = vpop.f32.mrf.mxu3 }
 0x222   : > { %v1109_v16 = vadd.f32 %v1093_v13, %v6581_v55  ;;  %5371 = vmatmul.msk.bf16.gmra.mxu3 %vm832_vm2, %v1583_v7  ;;  %v1190_v55 = vsel %vm1189_vm11, %v6657_v5, %v1188_v51  ;;  %v1047_v5 = vmul.f32 %v6504_v58, %v6504_v58 }
 0x223   : > { %v1198_v17 = vsub.f32 1.5, %v1197_v48  ;;  %v1193_v30 = vsel %vm1191_vm13, %v1192_v41, %v1190_v55 }
 0x224   : > { %v5819_v36 = vpop.eup %5818  ;;  %v6681_v18 = vmax.f32 %v1109_v16, 1e-05  ;;  %v1079_v10 = vadd.f32 %v1063_v60, %v1047_v5  ;;  %v1065_v60 = vmul.f32 %v6606_v12, %v6606_v12 }
 0x225   : > { %v1199_v23 = vmul.f32 %v5817_v63, %v1198_v17  ;;  %v1207_v29 = vmul.f32 %v5819_v36, %v6674_v4 }
 0x226   : > { %5820 = vrsqrt.f32 %v6681_v18  ;;  %vm1225_vm0 = vcmp.eq.f32.partialorder %v6681_v18, inf  ;;  %v1228_v41 = vand.u32 2147483648, %v6681_v18  ;;  %vm1227_vm4 = vcmp.eq.f32.partialorder %v6681_v18, 0.0 }
 0x227   : > { %v1018_v24 = vpop.f32.mrf.mxu0  ;;  %v1200_v28 = vmul.f32 %v1199_v23, %v1123_v27  ;;  %v1208_v37 = vmul.f32 %v5819_v36, %v1207_v29 }
 0x228   : > { %v1094_v38 = vmul.f32 %v1018_v24, %v1018_v24 }
 0x229   : > { %v1202_v42 = vsel %vm1201_vm12, %v1123_v27, %v1200_v28  ;;  %v1209_v45 = vmul.f32 0.5, %v1208_v37 }
 0x22a   : > { %v1110_v46 = vadd.f32 %v1094_v38, %v6589_v0  ;;  %v1205_v49 = vsel %vm1203_vm14, %v1204_v43, %v1202_v42  ;;  %v1216_v38 = vand.u32 2147483648, %v6674_v4 }
 0x22b   : > { %v1329_v52 = vpack.c.bf16 %v1205_v49, %v1193_v30  ;;  %v1210_v53 = vsub.f32 1.5, %v1209_v45  ;;  %v6718_v45 = vpop.f32.mrf.mxu3 }
 0x22c   : > { %v5821_v59 = vpop.eup %5820  ;;  %v6694_v63 = vmax.f32 %v1110_v46, 1e-05 }
 0x22d   : > { %5306 = vmatmul.msk.bf16.gmra.mxu0 %vm832_vm2, %v1329_v52  ;;  %v1219_v9 = vmul.f32 %v5821_v59, %v6681_v18  ;;  %v1211_v27 = vmul.f32 %v5819_v36, %v1210_v53 }
 0x22e   : > { %5822 = vrsqrt.f32 %v6694_v63  ;;  %vm1237_vm5 = vcmp.eq.f32.partialorder %v6694_v63, inf  ;;  %vm1239_vm8 = vcmp.eq.f32.partialorder %v6694_v63, 0.0 }
 0x22f   : > { %v1020_v0 = vpop.f32.mrf.mxu0  ;;  %v1220_v6 = vmul.f32 %v5821_v59, %v1219_v9  ;;  %v1212_v16 = vmul.f32 %v1211_v27, %v6674_v4 }
 0x230   : > { %v1095_v13 = vmul.f32 %v1020_v0, %v1020_v0  ;;  %v1584_v7 = vpack.c.bf16 %v1020_v0, %v1018_v24 }
 0x231   : > { %v1221_v3 = vmul.f32 0.5, %v1220_v6  ;;  %v1214_v24 = vsel %vm1213_vm15, %v6674_v4, %v1212_v16 }
 0x232   : > { %v1111_v48 = vadd.f32 %v1095_v13, %v1079_v10  ;;  %5372 = vmatmul.msk.bf16.gmra.mxu3 %vm832_vm2, %v1584_v7  ;;  %v1217_v30 = vsel %vm1215_vm3, %v1216_v38, %v1214_v24  ;;  %v1240_v38 = vand.u32 2147483648, %v6694_v63 }
 0x233   : > { %v1222_v51 = vsub.f32 1.5, %v1221_v3  ;;  %v6732_v16 = vpop.f32.mrf.mxu3 }
 0x234   : > { %v5823_v17 = vpop.eup %5822  ;;  %v6705_v23 = vmax.f32 %v1111_v48, 1e-05 }
 0x235   : > { %v1223_v58 = vmul.f32 %v5821_v59, %v1222_v51  ;;  %v1231_v29 = vmul.f32 %v5823_v17, %v6694_v63 }
 0x236   : > { %5824 = vrsqrt.f32 %v6705_v23  ;;  %vm1249_vm7 = vcmp.eq.f32.partialorder %v6705_v23, inf  ;;  %vm1251_vm9 = vcmp.eq.f32.partialorder %v6705_v23, 0.0 }
 0x237   : > { %v1023_v36 = vpop.f32.mrf.mxu0  ;;  %v1224_v55 = vmul.f32 %v1223_v58, %v6681_v18  ;;  %v1232_v28 = vmul.f32 %v5823_v17, %v1231_v29 }
 0x238   : > { %v1096_v37 = vmul.f32 %v1023_v36, %v1023_v36 }
 0x239   : > { %v1226_v43 = vsel %vm1225_vm0, %v6681_v18, %v1224_v55  ;;  %v1233_v42 = vmul.f32 0.5, %v1232_v28  ;;  %v1049_v18 = vmul.f32 %v6513_v62, %v6513_v62 }
 0x23a   : > { %v1112_v46 = vadd.f32 %v1096_v37, %v6603_v11  ;;  %v1229_v49 = vsel %vm1227_vm4, %v1228_v41, %v1226_v43  ;;  %v1252_v41 = vand.u32 2147483648, %v6705_v23 }
 0x23b   : > { %v1330_v52 = vpack.c.bf16 %v1229_v49, %v1217_v30  ;;  %v1234_v53 = vsub.f32 1.5, %v1233_v42  ;;  %v1081_v27 = vadd.f32 %v1065_v60, %v1049_v18  ;;  %v1067_v60 = vmul.f32 %v6620_v22, %v6620_v22  ;;  %v6760_v18 = vpop.f32.mrf.mxu3 }
 0x23c   : > { %v5825_v59 = vpop.eup %5824  ;;  %v6723_v9 = vmax.f32 %v1112_v46, 1e-05 }
 0x23d   : > { %5307 = vmatmul.msk.bf16.vlgmr.msra.gmra.mxu2 %vm832_vm2, %v1330_v52  ;;  %v1243_v4 = vmul.f32 %v5825_v59, %v6705_v23  ;;  %v1235_v5 = vmul.f32 %v5823_v17, %v1234_v53  ;;  %v2105_v17 = vld [vmem:[%s8720_s5 + $0x10] sm:$0xf] }
 0x23e   : > { %5826 = vrsqrt.f32 %v6723_v9  ;;  %v2133_v28 = vsel %vm1495_vm6, %v2105_v17, 0  ;;  %vm1261_vm10 = vcmp.eq.f32.partialorder %v6723_v9, inf  ;;  %vm1263_vm12 = vcmp.eq.f32.partialorder %v6723_v9, 0.0 }
 0x23f   : > { %v1025_v11 = vpop.f32.mrf.mxu0  ;;  %v1244_v0 = vmul.f32 %v5825_v59, %v1243_v4  ;;  %v1236_v12 = vmul.f32 %v1235_v5, %v6694_v63  ;;  %5593 = vmatpush.bf16.msrb.mxu3 %v2133_v28  ;;  %2142 = vmatpush.bf16.msra.mxu1 %v2133_v28 }
 0x240   : > { %v1097_v6 = vmul.f32 %v1025_v11, %v1025_v11  ;;  %v1585_v10 = vpack.c.bf16 %v1025_v11, %v1023_v36 }
 0x241   : > { %v1245_v13 = vmul.f32 0.5, %v1244_v0  ;;  %v1238_v36 = vsel %vm1237_vm5, %v6694_v63, %v1236_v12 }
 0x242   : > { %v1113_v7 = vadd.f32 %v1097_v6, %v1081_v27  ;;  %5373 = vmatmul.msk.bf16.gmra.mxu3 %vm832_vm2, %v1585_v10  ;;  %v1241_v30 = vsel %vm1239_vm8, %v1240_v38, %v1238_v36 }
 0x243   : > { %v1246_v3 = vsub.f32 1.5, %v1245_v13  ;;  %v6772_v36 = vpop.f32.mrf.mxu3 }
 0x244   : > { %v5827_v48 = vpop.eup %5826  ;;  %v6734_v51 = vmax.f32 %v1113_v7, 1e-05 }
 0x245   : > { %v1247_v62 = vmul.f32 %v5825_v59, %v1246_v3  ;;  %v1255_v58 = vmul.f32 %v5827_v48, %v6723_v9 }
 0x246   : > { %5828 = vrsqrt.f32 %v6734_v51  ;;  %vm1273_vm11 = vcmp.eq.f32.partialorder %v6734_v51, inf  ;;  %v1276_v28 = vand.u32 2147483648, %v6734_v51  ;;  %vm1275_vm13 = vcmp.eq.f32.partialorder %v6734_v51, 0.0 }
 0x247   : > { %v1028_v29 = vpop.f32.mrf.mxu0  ;;  %v1248_v24 = vmul.f32 %v1247_v62, %v6705_v23  ;;  %v1256_v55 = vmul.f32 %v5827_v48, %v1255_v58 }
 0x248   : > { %v1098_v37 = vmul.f32 %v1028_v29, %v1028_v29 }
 0x249   : > { %v1250_v43 = vsel %vm1249_vm7, %v6705_v23, %v1248_v24  ;;  %v1257_v42 = vmul.f32 0.5, %v1256_v55  ;;  %v1051_v23 = vmul.f32 %v6522_v2, %v6522_v2  ;;  %v1264_v55 = vand.u32 2147483648, %v6723_v9 }
 0x24a   : > { %v1114_v46 = vadd.f32 %v1098_v37, %v6615_v20  ;;  %v1253_v49 = vsel %vm1251_vm9, %v1252_v41, %v1250_v43  ;;  %vm1470_vm9 = vcmask 64512  }
 0x24b   : > { %v1331_v52 = vpack.c.bf16 %v1253_v49, %v1241_v30  ;;  %v1258_v53 = vsub.f32 1.5, %v1257_v42  ;;  %v1083_v0 = vadd.f32 %v1067_v60, %v1051_v23 }
 0x24c   : > { %v5829_v59 = vpop.eup %5828  ;;  %v6754_v4 = vmax.f32 %v1114_v46, 1e-05 }
 0x24d   : > { %5308 = vmatmul.msk.bf16.gmra.mxu2 %vm832_vm2, %v1331_v52  ;;  %v1267_v63 = vmul.f32 %v5829_v59, %v6734_v51  ;;  %v1259_v11 = vmul.f32 %v5827_v48, %v1258_v53  ;;  %v1069_v52 = vmul.f32 %v6632_v33, %v6632_v33 }
 0x24e   : > { %5830 = vrsqrt.f32 %v6754_v4  ;;  %vm1285_vm14 = vcmp.eq.f32.partialorder %v6754_v4, inf  ;;  %vm1287_vm15 = vcmp.eq.f32.partialorder %v6754_v4, 0.0 }
 0x24f   : > { %v1030_v20 = vpop.f32.mrf.mxu0  ;;  %v1268_v5 = vmul.f32 %v5829_v59, %v1267_v63  ;;  %v1260_v13 = vmul.f32 %v1259_v11, %v6723_v9 }
 0x250   : > { %v1099_v27 = vmul.f32 %v1030_v20, %v1030_v20  ;;  %v1586_v6 = vpack.c.bf16 %v1030_v20, %v1028_v29 }
 0x251   : > { %v1269_v22 = vmul.f32 0.5, %v1268_v5  ;;  %v1262_v58 = vsel %vm1261_vm10, %v6723_v9, %v1260_v13  ;;  %v6787_v5 = vpop.f32.mrf.mxu3 }
 0x252   : > { %v1115_v10 = vadd.f32 %v1099_v27, %v1083_v0  ;;  %5374 = vmatmul.msk.bf16.gmra.mxu3 %vm832_vm2, %v1586_v6  ;;  %v1265_v43 = vsel %vm1263_vm12, %v1264_v55, %v1262_v58 }
 0x253   : > { %v1270_v7 = vsub.f32 1.5, %v1269_v22 }
 0x254   : > { %v5831_v12 = vpop.eup %5830  ;;  %v6765_v3 = vmax.f32 %v1115_v10, 1e-05 }
 0x255   : > { %v1271_v2 = vmul.f32 %v5829_v59, %v1270_v7  ;;  %v1279_v62 = vmul.f32 %v5831_v12, %v6754_v4  ;;  %v1053_v59 = vmul.f32 %v6535_v8, %v6535_v8 }
 0x256   : > { %5832 = vrsqrt.f32 %v6765_v3  ;;  %vm1297_vm0 = vcmp.eq.f32.partialorder %v6765_v3, inf  ;;  %vm1299_vm3 = vcmp.eq.f32.partialorder %v6765_v3, 0.0 }
 0x257   : > { %v1033_v48 = vpop.f32.mrf.mxu0  ;;  %v1272_v17 = vmul.f32 %v1271_v2, %v6734_v51  ;;  %v1280_v29 = vmul.f32 %v5831_v12, %v1279_v62  ;;  %v1085_v63 = vadd.f32 %v1069_v52, %v1053_v59  ;;  %v1288_v2 = vand.u32 2147483648, %v6754_v4 }
 0x258   : > { %v1100_v24 = vmul.f32 %v1033_v48, %v1033_v48  ;;  %v1300_v62 = vand.u32 2147483648, %v6765_v3 }
 0x259   : > { %v1274_v37 = vsel %vm1273_vm11, %v6734_v51, %v1272_v17  ;;  %v1281_v38 = vmul.f32 0.5, %v1280_v29 }
 0x25a   : > { %v1116_v41 = vadd.f32 %v1100_v24, %v6629_v32  ;;  %v1277_v42 = vsel %vm1275_vm13, %v1276_v28, %v1274_v37 }
 0x25b   : > { %v1332_v46 = vpack.c.bf16 %v1277_v42, %v1265_v43  ;;  %v1282_v30 = vsub.f32 1.5, %v1281_v38 }
 0x25c   : > { %v5833_v49 = vpop.eup %5832  ;;  %v1132_v53 = vmax.f32 %v1116_v41, 1e-05 }
 0x25d   : > { %5309 = vmatmul.msk.bf16.gmra.mxu2 %vm832_vm2, %v1332_v46  ;;  %v1291_v9 = vmul.f32 %v5833_v49, %v6765_v3  ;;  %v1283_v60 = vmul.f32 %v5831_v12, %v1282_v30 }
 0x25e   : > { %5834 = vrsqrt.f32 %v1132_v53  ;;  %vm1309_vm4 = vcmp.eq.f32.partialorder %v1132_v53, inf  ;;  %vm1311_vm7 = vcmp.eq.f32.partialorder %v1132_v53, 0.0 }
 0x25f   : > { %v1035_v51 = vpop.f32.mrf.mxu0  ;;  %v1292_v32 = vmul.f32 %v5833_v49, %v1291_v9  ;;  %v1284_v33 = vmul.f32 %v1283_v60, %v6754_v4  ;;  %v1312_v9 = vand.u32 2147483648, %v1132_v53 }
 0x260   : > { %v1101_v23 = vmul.f32 %v1035_v51, %v1035_v51  ;;  %v1587_v20 = vpack.c.bf16 %v1035_v51, %v1033_v48  ;;  %v1429_v48 = vld [vmem:[%s8720_s5 + $0x4] sm:$0xf] }
 0x261   : > { %v1293_v11 = vmul.f32 0.5, %v1292_v32  ;;  %v1286_v13 = vsel %vm1285_vm14, %v6754_v4, %v1284_v33  ;;  %v1497_v29 = vsel %vm1495_vm6, %v1429_v48, 0  ;;  %v3180_v48 = vld [vmem:[%s8720_s5 + $0x18] sm:$0xf] }
 0x262   : > { %v1117_v0 = vadd.f32 %v1101_v23, %v1085_v63  ;;  %5375 = vmatmul.msk.bf16.gmra.mxu3 %vm832_vm2, %v1587_v20  ;;  %v1289_v24 = vsel %vm1287_vm15, %v1288_v2, %v1286_v13  ;;  %1506 = vmatpush.bf16.msrb.mxu2 %v1497_v29  ;;  %v5558_v23 = vld [vmem:[%s6445_s19] sm:$0xff]  ;;  %v5559_v20 = vld [vmem:[%s6445_s19 + $0x8] sm:$0xff] }
 0x263   : > { %v1294_v27 = vsub.f32 1.5, %v1293_v11  ;;  %v5560_v11 = vld [vmem:[%s6445_s19 + $0x10] sm:$0xff] }
 0x264   : > { %v5835_v6 = vpop.eup %5834  ;;  %v1133_v22 = vmax.f32 %v1117_v0, 1e-05 }
 0x265   : > { %v1295_v10 = vmul.f32 %v5833_v49, %v1294_v27  ;;  %v1303_v8 = vmul.f32 %v5835_v6, %v1132_v53  ;;  %v5562_v27 = vld [vmem:[%s6445_s19 + $0x20] sm:$0xff] }
 0x266   : > { %5836 = vrsqrt.f32 %v1133_v22  ;;  %vm1321_vm5 = vcmp.eq.f32.partialorder %v1133_v22, inf  ;;  %v1324_v59 = vand.u32 2147483648, %v1133_v22  ;;  %vm1323_vm8 = vcmp.eq.f32.partialorder %v1133_v22, 0.0 }
 0x267   : > { %v1296_v7 = vmul.f32 %v1295_v10, %v6765_v3  ;;  %v1304_v12 = vmul.f32 %v5835_v6, %v1303_v8  ;;  %v5563_v10 = vld [vmem:[%s6445_s19 + $0x28] sm:$0xff] }
 0x269   : > { %v1298_v58 = vsel %vm1297_vm0, %v6765_v3, %v1296_v7  ;;  %v1305_v17 = vmul.f32 0.5, %v1304_v12  ;;  %v5564_v7 = vld [vmem:[%s6445_s19 + $0x30] sm:$0xff] }
 0x26a   : > { %v1301_v55 = vsel %vm1299_vm3, %v1300_v62, %v1298_v58  ;;  %v5565_v62 = vld [vmem:[%s6445_s19 + $0x38] sm:$0xff]  ;;  %v3206_v58 = vsel %vm1495_vm6, %v3180_v48, 0 }
 0x26b   : > { %v1333_v28 = vpack.c.bf16 %v1301_v55, %v1289_v24  ;;  %v1306_v4 = vsub.f32 1.5, %v1305_v17  ;;  %3215 = vmatpush.bf16.msra.mxu0 %v3206_v58  ;;  %v6849_v55 = vld [vmem:[%s8721_s6] ss:$0 sm:$0xff] }
 0x26c   : > { %v5837_v37 = vpop.eup %5836 }
 0x26d   : > { %5310 = vmatmul.msk.bf16.gmra.mxu2 %vm832_vm2, %v1333_v28  ;;  %v1315_v38 = vmul.f32 %v5837_v37, %v1133_v22  ;;  %v1307_v41 = vmul.f32 %v5835_v6, %v1306_v4 }
 0x26f   : > { %v1316_v43 = vmul.f32 %v5837_v37, %v1315_v38  ;;  %v1308_v46 = vmul.f32 %v1307_v41, %v1132_v53 }
 0x271   : > { %v1317_v42 = vmul.f32 0.5, %v1316_v43  ;;  %v1310_v3 = vsel %vm1309_vm4, %v1132_v53, %v1308_v46  ;;  %v5561_v53 = vld [vmem:[%s6445_s19 + $0x18] sm:$0xff]  ;;  %s6223_s19 = smov 8  }
 0x272   : > { %v1313_v60 = vsel %vm1311_vm7, %v1312_v9, %v1310_v3 }
 0x273   : > { %v1318_v30 = vsub.f32 1.5, %v1317_v42 }
 0x275   : > { %v1319_v49 = vmul.f32 %v5837_v37, %v1318_v30 }
 0x277   : > { %v1320_v52 = vmul.f32 %v1319_v49, %v1133_v22 }
 0x279   : > { %v1322_v51 = vsel %vm1321_vm5, %v1133_v22, %v1320_v52 }
 0x27a   : > { %v1325_v32 = vsel %vm1323_vm8, %v1324_v59, %v1322_v51 }
 0x27b   : > { %v1334_v63 = vpack.c.bf16 %v1325_v32, %v1313_v60  ;;  %v6853_v60 = vpop.f32.mrf.mxu3 }
 0x27d   : > { %5311 = vmatmul.msk.bf16.gmra.mxu2 %vm832_vm2, %v1334_v63 }
 0x283   : > { %v6858_v58 = vpop.f32.mrf.mxu3 }
 0x28a   : > { %v1372_v29 = vpop.f32.mrf.mxu0 }
 0x28b   : > { %v1413_v4 = vadd.f32 %v6849_v55, %v1372_v29 }
 0x28d   : > { %5344 = vmatmul.msk.bf16.vlgmr.msrb.gmra.mxu2 %vm1470_vm9, %v5558_v23 }
 0x292   : > { %v1374_v28 = vpop.f32.mrf.mxu0 }
 0x293   : > { %v1414_v42 = vadd.f32 %v6849_v55, %v1374_v28 }
 0x29a   : > { %v1377_v43 = vpop.f32.mrf.mxu0 }
 0x29b   : > { %v1415_v32 = vadd.f32 %v6849_v55, %v1377_v43 }
 0x29d   : > { %5345 = vmatmul.msk.bf16.gmra.mxu2 %vm1470_vm9, %v5559_v20 }
 0x2a2   : > { %v1379_v63 = vpop.f32.mrf.mxu0 }
 0x2ad   : > { %5346 = vmatmul.msk.bf16.gmra.mxu2 %vm1470_vm9, %v5560_v11 }
 0x2bd   : > { %5347 = vmatmul.msk.bf16.gmra.mxu2 %vm1470_vm9, %v5561_v53 }
 0x2c0   : > { %v6814_v0 = vpop.f32.mrf.mxu2 }
 0x2c8   : > { %v6816_v33 = vpop.f32.mrf.mxu2 }
 0x2cd   : > { %5348 = vmatmul.msk.bf16.gmra.mxu2 %vm1470_vm9, %v5562_v27 }
 0x2d0   : > { %v6820_v6 = vpop.f32.mrf.mxu2 }
 0x2d8   : > { %v6822_v22 = vpop.f32.mrf.mxu2 }
 0x2dd   : > { %5349 = vmatmul.msk.bf16.gmra.mxu2 %vm1470_vm9, %v5563_v10 }
 0x2e0   : > { %v6826_v8 = vpop.f32.mrf.mxu2 }
 0x2e8   : > { %v6828_v13 = vpop.f32.mrf.mxu2 }
 0x2ed   : > { %5350 = vmatmul.msk.bf16.gmra.mxu2 %vm1470_vm9, %v5564_v7 }
 0x2f0   : > { %v6832_v12 = vpop.f32.mrf.mxu2 }
 0x2f8   : > { %v6834_v2 = vpop.f32.mrf.mxu2 }
 0x2fd   : > { %5351 = vmatmul.msk.bf16.gmra.mxu2 %vm1470_vm9, %v5565_v62  ;;  %v1416_v62 = vadd.f32 %v6849_v55, %v1379_v63 }
 0x300   : > { %v6842_v17 = vpop.f32.mrf.mxu2 }
 0x308   : > { %v6844_v24 = vpop.f32.mrf.mxu2 }
 0x310   : > { %v1508_v37 = vpop.f32.mrf.mxu2 }
 0x311   : > { %v1548_v38 = vadd.f32 %v1508_v37, %v1413_v4  ;;  %v1382_v4 = vpop.f32.mrf.mxu0 }
 0x313   : > { %v5376_v41 = vmul.f32 -1.442695, %v1548_v38  ;;  %v2536_v3 = vmax.f32 %v1548_v38, 0.0 }
 0x315   : > { %5838 = vpow2.f32 %v5376_v41 }
 0x318   : > { %v1510_v46 = vpop.f32.mrf.mxu2 }
 0x319   : > { %v1549_v30 = vadd.f32 %v1510_v46, %v1414_v42 }
 0x31b   : > { %v5839_v49 = vpop.eup %5838  ;;  %v5377_v52 = vmul.f32 -1.442695, %v1549_v30  ;;  %v2537_v9 = vmax.f32 %v1549_v30, 0.0 }
 0x31c   : > { %v1841_v59 = vadd.f32 1.0, %v5839_v49 }
 0x31d   : > { %5840 = vpow2.f32 %v5377_v52  ;;  %v3172_v51 = vpack.c.bf16 %v2537_v9, %v2536_v3  ;;  %v1417_v52 = vadd.f32 %v6849_v55, %v1382_v4 }
 0x31e   : > { %5842 = vrcp.f32 %v1841_v59  ;;  %vm1862_vm11 = vweird.f32 %v1841_v59  ;;  %v1866_v63 = vand.u32 2147483647, %v1841_v59 }
 0x31f   : > { %5448 = vmatmul.msk.bf16.vlgmr.msra.gmra.mxu0 %vm1470_vm9, %v3172_v51 }
 0x320   : > { %v1513_v23 = vpop.f32.mrf.mxu2  ;;  %vm1867_vm15 = vcmp.eq.f32.partialorder %v1866_v63, 8.507059e+37 }
 0x321   : > { %v1550_v20 = vadd.f32 %v1513_v23, %v1415_v32  ;;  %v1868_v23 = vand.u32 2147483648, %v1841_v59 }
 0x323   : > { %v5841_v11 = vpop.eup %5840  ;;  %v5378_v53 = vmul.f32 -1.442695, %v1550_v20  ;;  %v2538_v38 = vmax.f32 %v1550_v20, 0.0 }
 0x324   : > { %v5843_v27 = vpop.eup %5842  ;;  %v1842_v10 = vadd.f32 1.0, %v5841_v11 }
 0x325   : > { %5844 = vpow2.f32 %v5378_v53  ;;  %v1858_v7 = vmul.f32 %v5843_v27, %v1841_v59  ;;  %vm1863_vm10 = vweird.f32 %v5843_v27  ;;  %v1384_v59 = vpop.f32.mrf.mxu0 }
 0x326   : > { %5846 = vrcp.f32 %v1842_v10  ;;  %v1883_v20 = vand.u32 2147483648, %v1842_v10  ;;  %vm6867_vm13 = vmor %vm1862_vm11, %vm1863_vm10  ;;  %vm1877_vm14 = vweird.f32 %v1842_v10 }
 0x327   : > { %v1859_v48 = vsub.f32 1.0, %v1858_v7  ;;  %v1881_v7 = vand.u32 2147483647, %v1842_v10 }
 0x328   : > { %v1515_v29 = vpop.f32.mrf.mxu2 }
 0x329   : > { %v1551_v28 = vadd.f32 %v1515_v29, %v1416_v62  ;;  %v1860_v42 = vmul.f32 %v5843_v27, %v1859_v48  ;;  %v6865_v62 = vpop.f32.mrf.mxu3  ;;  %vm1882_vm3 = vcmp.eq.f32.partialorder %v1881_v7, 8.507059e+37 }
 0x32b   : > { %v5845_v37 = vpop.eup %5844  ;;  %v5379_v41 = vmul.f32 -1.442695, %v1551_v28  ;;  %v2539_v43 = vmax.f32 %v1551_v28, 0.0  ;;  %v1861_v9 = vadd.f32 %v5843_v27, %v1860_v42  ;;  %v1884_v42 = vor.u32 1.1754944e-38, %v1883_v20 }
 0x32c   : > { %v5847_v46 = vpop.eup %5846  ;;  %v6860_v30 = vadd.f32 1.0, %v5845_v37 }
 0x32d   : > { %5848 = vpow2.f32 %v5379_v41  ;;  %v3173_v49 = vpack.c.bf16 %v2539_v43, %v2538_v38  ;;  %v1873_v3 = vmul.f32 %v5847_v46, %v1842_v10  ;;  %vm1878_vm12 = vweird.f32 %v5847_v46 }
 0x32e   : > { %5850 = vrcp.f32 %v6860_v30  ;;  %v1865_v4 = vsel %vm6867_vm13, %v5843_v27, %v1861_v9  ;;  %v1869_v43 = vor.u32 1.1754944e-38, %v1868_v23  ;;  %vm1879_vm0 = vmor %vm1877_vm14, %vm1878_vm12  ;;  %v1418_v27 = vadd.f32 %v6849_v55, %v1384_v59 }
 0x32f   : > { %5449 = vmatmul.msk.bf16.gmra.mxu0 %vm1470_vm9, %v3173_v49  ;;  %v1874_v51 = vsub.f32 1.0, %v1873_v3  ;;  %v1419_v59 = vadd.f32 %v6849_v55, %v6814_v0  ;;  %vm1892_vm5 = vweird.f32 %v6860_v30 }
 0x330   : > { %v1518_v32 = vpop.f32.mrf.mxu2 }
 0x331   : > { %v1552_v11 = vadd.f32 %v1518_v32, %v1417_v52  ;;  %v1875_v53 = vmul.f32 %v5847_v46, %v1874_v51  ;;  %v1870_v52 = vsel %vm1867_vm15, %v1869_v43, %v1865_v4 }
 0x333   : > { %v5849_v29 = vpop.eup %5848  ;;  %v5380_v28 = vmul.f32 -1.442695, %v1552_v11  ;;  %v1876_v37 = vadd.f32 %v5847_v46, %v1875_v53  ;;  %v2540_v23 = vmax.f32 %v1552_v11, 0.0 }
 0x334   : > { %v6873_v38 = vpop.eup %5850  ;;  %v1844_v41 = vadd.f32 1.0, %v5849_v29  ;;  %v6880_v29 = vpop.f32.mrf.mxu3 }
 0x335   : > { %5852 = vpow2.f32 %v5380_v28  ;;  %v1880_v49 = vsel %vm1879_vm0, %v5847_v46, %v1876_v37  ;;  %v1888_v3 = vmul.f32 %v6873_v38, %v6860_v30  ;;  %vm1893_vm4 = vweird.f32 %v6873_v38 }
 0x336   : > { %5854 = vrcp.f32 %v1844_v41  ;;  %v1885_v51 = vsel %vm1882_vm3, %v1884_v42, %v1880_v49  ;;  %v1896_v49 = vand.u32 2147483647, %v6860_v30  ;;  %vm6893_vm8 = vmor %vm1892_vm5, %vm1893_vm4  ;;  %vm1907_vm10 = vweird.f32 %v1844_v41 }
 0x337   : > { %v2097_v10 = vpack.c.bf16 %v1885_v51, %v1870_v52  ;;  %v1889_v9 = vsub.f32 1.0, %v1888_v3  ;;  %v1898_v3 = vand.u32 2147483648, %v6860_v30  ;;  %v1913_v52 = vand.u32 2147483648, %v1844_v41 }
 0x338   : > { %v1520_v32 = vpop.f32.mrf.mxu2  ;;  %vm1897_vm11 = vcmp.eq.f32.partialorder %v1896_v49, 8.507059e+37 }
 0x339   : > { %v1553_v53 = vadd.f32 %v1520_v32, %v1418_v27  ;;  %5392 = vmatmul.msk.bf16.vlgmr.msra.gmra.mxu1 %vm1470_vm9, %v2097_v10  ;;  %v1890_v46 = vmul.f32 %v6873_v38, %v1889_v9  ;;  %v1911_v10 = vand.u32 2147483647, %v1844_v41 }
 0x33b   : > { %v5853_v63 = vpop.eup %5852  ;;  %v5381_v20 = vmul.f32 -1.442695, %v1553_v53  ;;  %v2541_v48 = vmax.f32 %v1553_v53, 0.0  ;;  %v1891_v11 = vadd.f32 %v6873_v38, %v1890_v46  ;;  %vm1912_vm13 = vcmp.eq.f32.partialorder %v1911_v10, 8.507059e+37 }
 0x33c   : > { %v5855_v7 = vpop.eup %5854  ;;  %v6882_v28 = vadd.f32 1.0, %v5853_v63 }
 0x33d   : > { %5856 = vpow2.f32 %v5381_v20  ;;  %v3174_v4 = vpack.c.bf16 %v2541_v48, %v2540_v23  ;;  %v1903_v37 = vmul.f32 %v5855_v7, %v1844_v41  ;;  %vm1908_vm7 = vweird.f32 %v5855_v7 }
 0x33e   : > { %5858 = vrcp.f32 %v6882_v28  ;;  %v1895_v53 = vsel %vm6893_vm8, %v6873_v38, %v1891_v11  ;;  %v1899_v20 = vor.u32 1.1754944e-38, %v1898_v3  ;;  %vm1909_vm12 = vmor %vm1907_vm10, %vm1908_vm7  ;;  %v1914_v48 = vor.u32 1.1754944e-38, %v1913_v52 }
 0x33f   : > { %5450 = vmatmul.msk.bf16.gmra.mxu0 %vm1470_vm9, %v3174_v4  ;;  %v1904_v43 = vsub.f32 1.0, %v1903_v37  ;;  %v6904_v37 = vpop.f32.mrf.mxu3  ;;  %v1420_v41 = vadd.f32 %v6849_v55, %v6816_v33  ;;  %v1421_v33 = vadd.f32 %v6849_v55, %v6820_v6  ;;  %vm1922_vm15 = vweird.f32 %v6882_v28 }
 0x340   : > { %v1523_v42 = vpop.f32.mrf.mxu2 }
 0x341   : > { %v1554_v51 = vadd.f32 %v1523_v42, %v1419_v59  ;;  %v1905_v27 = vmul.f32 %v5855_v7, %v1904_v43  ;;  %v1900_v59 = vsel %vm1897_vm11, %v1899_v20, %v1895_v53 }
 0x343   : > { %v5857_v9 = vpop.eup %5856  ;;  %v5382_v32 = vmul.f32 -1.442695, %v1554_v51  ;;  %v1906_v63 = vadd.f32 %v5855_v7, %v1905_v27 }
 0x344   : > { %v6900_v23 = vpop.eup %5858  ;;  %v1846_v30 = vadd.f32 1.0, %v5857_v9 }
 0x345   : > { %5860 = vpow2.f32 %v5382_v32  ;;  %v1910_v46 = vsel %vm1909_vm12, %v5855_v7, %v1906_v63  ;;  %v1918_v4 = vmul.f32 %v6900_v23, %v6882_v28  ;;  %v2542_v7 = vmax.f32 %v1554_v51, 0.0 }
 0x346   : > { %5862 = vrcp.f32 %v1846_v30  ;;  %v1915_v38 = vsel %vm1912_vm13, %v1914_v48, %v1910_v46  ;;  %vm1923_vm14 = vweird.f32 %v6900_v23  ;;  %v1926_v46 = vand.u32 2147483647, %v6882_v28 }
 0x347   : > { %v2098_v11 = vpack.c.bf16 %v1915_v38, %v1900_v59  ;;  %v1919_v43 = vsub.f32 1.0, %v1918_v4  ;;  %v6918_v20 = vpop.f32.mrf.mxu3  ;;  %v1928_v4 = vand.u32 2147483648, %v6882_v28  ;;  %v1943_v59 = vand.u32 2147483648, %v1846_v30  ;;  %vm6923_vm3 = vmor %vm1922_vm15, %vm1923_vm14 }
 0x348   : > { %v1525_v42 = vpop.f32.mrf.mxu2  ;;  %v1941_v6 = vand.u32 2147483647, %v1846_v30  ;;  %vm1937_vm4 = vweird.f32 %v1846_v30  ;;  %vm1927_vm5 = vcmp.eq.f32.partialorder %v1926_v46, 8.507059e+37 }
 0x349   : > { %v1555_v49 = vadd.f32 %v1525_v42, %v1420_v41  ;;  %5393 = vmatmul.msk.bf16.gmra.mxu1 %vm1470_vm9, %v2098_v11  ;;  %v1920_v10 = vmul.f32 %v6900_v23, %v1919_v43 }
 0x34a   : > { %vm1942_vm8 = vcmp.eq.f32.partialorder %v1941_v6, 8.507059e+37 }
 0x34b   : > { %v5861_v3 = vpop.eup %5860  ;;  %v5383_v52 = vmul.f32 -1.442695, %v1555_v49  ;;  %v2543_v27 = vmax.f32 %v1555_v49, 0.0  ;;  %v1921_v63 = vadd.f32 %v6900_v23, %v1920_v10 }
 0x34c   : > { %v5863_v0 = vpop.eup %5862  ;;  %v6910_v9 = vadd.f32 1.0, %v5861_v3 }
 0x34d   : > { %5864 = vpow2.f32 %v5383_v52  ;;  %v3175_v32 = vpack.c.bf16 %v2543_v27, %v2542_v7  ;;  %v1933_v53 = vmul.f32 %v5863_v0, %v1846_v30  ;;  %vm1938_vm0 = vweird.f32 %v5863_v0 }
 0x34e   : > { %5866 = vrcp.f32 %v6910_v9  ;;  %v1925_v49 = vsel %vm6923_vm3, %v6900_v23, %v1921_v63  ;;  %v1929_v52 = vor.u32 1.1754944e-38, %v1928_v4  ;;  %vm1939_vm7 = vmor %vm1937_vm4, %vm1938_vm0  ;;  %v1944_v27 = vor.u32 1.1754944e-38, %v1943_v59 }
 0x34f   : > { %5451 = vmatmul.msk.bf16.gmra.mxu0 %vm1470_vm9, %v3175_v32  ;;  %v1934_v51 = vsub.f32 1.0, %v1933_v53  ;;  %v1422_v23 = vadd.f32 %v6849_v55, %v6822_v22  ;;  %v6937_v46 = vpop.f32.mrf.mxu3  ;;  %vm1952_vm11 = vweird.f32 %v6910_v9 }
 0x350   : > { %v1528_v48 = vpop.f32.mrf.mxu2  ;;  %v1930_v53 = vsel %vm1927_vm5, %v1929_v52, %v1925_v49  ;;  %8773 = vst [vmem:[#allocation12_spill] sm:$0xff] %v6937_v46  ;;  %v1423_v49 = vadd.f32 %v6849_v55, %v6826_v8 }
 0x351   : > { %v1556_v38 = vadd.f32 %v1528_v48, %v1421_v33  ;;  %v1935_v41 = vmul.f32 %v5863_v0, %v1934_v51 }
 0x353   : > { %v5865_v43 = vpop.eup %5864  ;;  %v5384_v42 = vmul.f32 -1.442695, %v1556_v38  ;;  %v1936_v3 = vadd.f32 %v5863_v0, %v1935_v41 }
 0x354   : > { %v6930_v7 = vpop.eup %5866  ;;  %v1848_v28 = vadd.f32 1.0, %v5865_v43 }
 0x355   : > { %5868 = vpow2.f32 %v5384_v42  ;;  %v1940_v10 = vsel %vm1939_vm7, %v5863_v0, %v1936_v3  ;;  %v1948_v32 = vmul.f32 %v6930_v7, %v6910_v9  ;;  %v2544_v0 = vmax.f32 %v1556_v38, 0.0 }
 0x356   : > { %5870 = vrcp.f32 %v1848_v28  ;;  %v1945_v33 = vsel %vm1942_vm8, %v1944_v27, %v1940_v10  ;;  %vm1953_vm10 = vweird.f32 %v6930_v7  ;;  %v1956_v27 = vand.u32 2147483647, %v6910_v9 }
 0x357   : > { %v2099_v30 = vpack.c.bf16 %v1945_v33, %v1930_v53  ;;  %v1949_v63 = vsub.f32 1.0, %v1948_v32  ;;  %v1958_v10 = vand.u32 2147483648, %v6910_v9  ;;  %v1973_v32 = vand.u32 2147483648, %v1848_v28  ;;  %vm6951_vm13 = vmor %vm1952_vm11, %vm1953_vm10  ;;  %v6960_v9 = vpop.f32.mrf.mxu3 }
 0x358   : > { %v1530_v51 = vpop.f32.mrf.mxu2  ;;  %vm1967_vm14 = vweird.f32 %v1848_v28  ;;  %8776 = vst [vmem:[#allocation13_spill] sm:$0xff] %v6960_v9  ;;  %vm1957_vm15 = vcmp.eq.f32.partialorder %v1956_v27, 8.507059e+37 }
 0x359   : > { %v1557_v48 = vadd.f32 %v1530_v51, %v1422_v23  ;;  %5394 = vmatmul.msk.bf16.gmra.mxu1 %vm1470_vm9, %v2099_v30  ;;  %v1950_v6 = vmul.f32 %v6930_v7, %v1949_v63  ;;  %v1971_v23 = vand.u32 2147483647, %v1848_v28 }
 0x35b   : > { %v5869_v4 = vpop.eup %5868  ;;  %v5385_v59 = vmul.f32 -1.442695, %v1557_v48  ;;  %v2545_v41 = vmax.f32 %v1557_v48, 0.0  ;;  %v1951_v3 = vadd.f32 %v6930_v7, %v1950_v6  ;;  %vm1972_vm3 = vcmp.eq.f32.partialorder %v1971_v23, 8.507059e+37 }
 0x35c   : > { %v5871_v11 = vpop.eup %5870  ;;  %v6940_v43 = vadd.f32 1.0, %v5869_v4 }
 0x35d   : > { %5872 = vpow2.f32 %v5385_v59  ;;  %v3176_v42 = vpack.c.bf16 %v2545_v41, %v2544_v0  ;;  %v1963_v22 = vmul.f32 %v5871_v11, %v1848_v28  ;;  %vm1968_vm12 = vweird.f32 %v5871_v11 }
 0x35e   : > { %5874 = vrcp.f32 %v6940_v43  ;;  %v1955_v51 = vsel %vm6951_vm13, %v6930_v7, %v1951_v3  ;;  %v1959_v59 = vor.u32 1.1754944e-38, %v1958_v10  ;;  %vm1969_vm0 = vmor %vm1967_vm14, %vm1968_vm12  ;;  %v1974_v41 = vor.u32 1.1754944e-38, %v1973_v32 }
 0x35f   : > { %5452 = vmatmul.msk.bf16.gmra.mxu0 %vm1470_vm9, %v3176_v42  ;;  %v1964_v38 = vsub.f32 1.0, %v1963_v22  ;;  %v1424_v28 = vadd.f32 %v6849_v55, %v6828_v13  ;;  %v1425_v13 = vadd.f32 %v6849_v55, %v6832_v12  ;;  %vm1982_vm5 = vweird.f32 %v6940_v43 }
 0x360   : > { %v1533_v52 = vpop.f32.mrf.mxu2  ;;  %v1960_v22 = vsel %vm1957_vm15, %v1959_v59, %v1955_v51  ;;  %v6970_v51 = vpop.f32.mrf.mxu3 }
 0x361   : > { %v1558_v53 = vadd.f32 %v1533_v52, %v1423_v49  ;;  %v1965_v33 = vmul.f32 %v5871_v11, %v1964_v38 }
 0x363   : > { %v5873_v30 = vpop.eup %5872  ;;  %v5386_v63 = vmul.f32 -1.442695, %v1558_v53  ;;  %v1966_v48 = vadd.f32 %v5871_v11, %v1965_v33  ;;  %v2546_v10 = vmax.f32 %v1558_v53, 0.0 }
 0x364   : > { %v6958_v4 = vpop.eup %5874  ;;  %v1850_v0 = vadd.f32 1.0, %v5873_v30 }
 0x365   : > { %5876 = vpow2.f32 %v5386_v63  ;;  %v1970_v6 = vsel %vm1969_vm0, %v5871_v11, %v1966_v48  ;;  %v1978_v42 = vmul.f32 %v6958_v4, %v6940_v43  ;;  %vm1983_vm4 = vweird.f32 %v6958_v4 }
 0x366   : > { %5878 = vrcp.f32 %v1850_v0  ;;  %v1975_v7 = vsel %vm1972_vm3, %v1974_v41, %v1970_v6  ;;  %v1986_v41 = vand.u32 2147483647, %v6940_v43  ;;  %v1988_v6 = vand.u32 2147483648, %v6940_v43  ;;  %vm6981_vm8 = vmor %vm1982_vm5, %vm1983_vm4 }
 0x367   : > { %v2100_v49 = vpack.c.bf16 %v1975_v7, %v1960_v22  ;;  %v1979_v3 = vsub.f32 1.0, %v1978_v42  ;;  %v2003_v42 = vand.u32 2147483648, %v1850_v0  ;;  %vm1997_vm10 = vweird.f32 %v1850_v0 }
 0x368   : > { %v1535_v38 = vpop.f32.mrf.mxu2  ;;  %vm1987_vm11 = vcmp.eq.f32.partialorder %v1986_v41, 8.507059e+37 }
 0x369   : > { %v1559_v52 = vadd.f32 %v1535_v38, %v1424_v28  ;;  %5395 = vmatmul.msk.bf16.gmra.mxu1 %vm1470_vm9, %v2100_v49  ;;  %v1980_v33 = vmul.f32 %v6958_v4, %v1979_v3  ;;  %v2001_v28 = vand.u32 2147483647, %v1850_v0 }
 0x36b   : > { %v5877_v27 = vpop.eup %5876  ;;  %v5387_v32 = vmul.f32 -1.442695, %v1559_v52  ;;  %v2547_v11 = vmax.f32 %v1559_v52, 0.0  ;;  %v1981_v53 = vadd.f32 %v6958_v4, %v1980_v33  ;;  %vm2002_vm13 = vcmp.eq.f32.partialorder %v2001_v28, 8.507059e+37 }
 0x36c   : > { %v5879_v23 = vpop.eup %5878  ;;  %v6968_v8 = vadd.f32 1.0, %v5877_v27 }
 0x36d   : > { %5880 = vpow2.f32 %v5387_v32  ;;  %v3177_v30 = vpack.c.bf16 %v2547_v11, %v2546_v10  ;;  %v1993_v63 = vmul.f32 %v5879_v23, %v1850_v0  ;;  %vm1998_vm7 = vweird.f32 %v5879_v23 }
 0x36e   : > { %5882 = vrcp.f32 %v6968_v8  ;;  %v1985_v38 = vsel %vm6981_vm8, %v6958_v4, %v1981_v53  ;;  %v1989_v10 = vor.u32 1.1754944e-38, %v1988_v6  ;;  %vm1999_vm12 = vmor %vm1997_vm10, %vm1998_vm7  ;;  %v2004_v32 = vor.u32 1.1754944e-38, %v2003_v42  ;;  %v6994_v53 = vpop.f32.mrf.mxu3 }
 0x36f   : > { %5453 = vmatmul.msk.bf16.gmra.mxu0 %vm1470_vm9, %v3177_v30  ;;  %v1994_v48 = vsub.f32 1.0, %v1993_v63  ;;  %v1426_v4 = vadd.f32 %v6849_v55, %v6834_v2  ;;  %vm2012_vm15 = vweird.f32 %v6968_v8 }
 0x370   : > { %v1538_v59 = vpop.f32.mrf.mxu2  ;;  %v1990_v30 = vsel %vm1987_vm11, %v1989_v10, %v1985_v38 }
 0x371   : > { %v1560_v22 = vadd.f32 %v1538_v59, %v1425_v13  ;;  %v1995_v7 = vmul.f32 %v5879_v23, %v1994_v48 }
 0x373   : > { %v5881_v49 = vpop.eup %5880  ;;  %v5388_v3 = vmul.f32 -1.442695, %v1560_v22  ;;  %v1996_v52 = vadd.f32 %v5879_v23, %v1995_v7  ;;  %v2548_v42 = vmax.f32 %v1560_v22, 0.0  ;;  %v2018_v22 = vand.u32 2147483648, %v6968_v8 }
 0x374   : > { %v6988_v27 = vpop.eup %5882  ;;  %v1852_v43 = vadd.f32 1.0, %v5881_v49 }
 0x375   : > { %v2008_v11 = vmul.f32 %v6988_v27, %v6968_v8  ;;  %5884 = vpow2.f32 %v5388_v3  ;;  %v2000_v33 = vsel %vm1999_vm12, %v5879_v23, %v1996_v52  ;;  %v1427_v3 = vadd.f32 %v6849_v55, %v6842_v17 }
 0x376   : > { %5886 = vrcp.f32 %v1852_v43  ;;  %v2005_v63 = vsel %vm2002_vm13, %v2004_v32, %v2000_v33  ;;  %vm2013_vm14 = vweird.f32 %v6988_v27  ;;  %v2016_v32 = vand.u32 2147483647, %v6968_v8  ;;  %v7009_v17 = vpop.f32.mrf.mxu3 }
 0x377   : > { %v2009_v0 = vsub.f32 1.0, %v2008_v11  ;;  %v2101_v13 = vpack.c.bf16 %v2005_v63, %v1990_v30  ;;  %v2033_v11 = vand.u32 2147483648, %v1852_v43  ;;  %v2031_v63 = vand.u32 2147483647, %v1852_v43  ;;  %vm7011_vm3 = vmor %vm2012_vm15, %vm2013_vm14 }
 0x378   : > { %v1540_v48 = vpop.f32.mrf.mxu2  ;;  %vm2027_vm4 = vweird.f32 %v1852_v43  ;;  %vm2017_vm5 = vcmp.eq.f32.partialorder %v2016_v32, 8.507059e+37 }
 0x379   : > { %v1561_v59 = vadd.f32 %v1540_v48, %v1426_v4  ;;  %5396 = vmatmul.msk.bf16.gmra.mxu1 %vm1470_vm9, %v2101_v13  ;;  %v2010_v6 = vmul.f32 %v6988_v27, %v2009_v0  ;;  %vm2032_vm8 = vcmp.eq.f32.partialorder %v2031_v63, 8.507059e+37 }
 0x37b   : > { %v5885_v41 = vpop.eup %5884  ;;  %v5389_v23 = vmul.f32 -1.442695, %v1561_v59  ;;  %v2549_v7 = vmax.f32 %v1561_v59, 0.0  ;;  %v2011_v52 = vadd.f32 %v6988_v27, %v2010_v6  ;;  %v2019_v6 = vor.u32 1.1754944e-38, %v2018_v22 }
 0x37c   : > { %v5887_v28 = vpop.eup %5886  ;;  %v6998_v12 = vadd.f32 1.0, %v5885_v41 }
 0x37d   : > { %v2023_v49 = vmul.f32 %v5887_v28, %v1852_v43  ;;  %5888 = vpow2.f32 %v5389_v23  ;;  %v3178_v2 = vpack.c.bf16 %v2549_v7, %v2548_v42  ;;  %vm2028_vm0 = vweird.f32 %v5887_v28 }
 0x37e   : > { %5890 = vrcp.f32 %v6998_v12  ;;  %v2015_v48 = vsel %vm7011_vm3, %v6988_v27, %v2011_v52  ;;  %vm2029_vm7 = vmor %vm2027_vm4, %vm2028_vm0  ;;  %v2034_v42 = vor.u32 1.1754944e-38, %v2033_v11  ;;  %vm2042_vm11 = vweird.f32 %v6998_v12 }
 0x37f   : > { %v2024_v38 = vsub.f32 1.0, %v2023_v49  ;;  %5454 = vmatmul.msk.bf16.gmra.mxu0 %vm1470_vm9, %v3178_v2  ;;  %v2020_v49 = vsel %vm2017_vm5, %v2019_v6, %v2015_v48 }
 0x380   : > { %v1543_v10 = vpop.f32.mrf.mxu2 }
 0x381   : > { %v2025_v33 = vmul.f32 %v5887_v28, %v2024_v38  ;;  %v1562_v30 = vadd.f32 %v1543_v10, %v1427_v3  ;;  %v1428_v3 = vadd.f32 %v6849_v55, %v6844_v24 }
 0x383   : > { %v5889_v0 = vpop.eup %5888  ;;  %v5390_v13 = vmul.f32 -1.442695, %v1562_v30  ;;  %v2026_v59 = vadd.f32 %v5887_v28, %v2025_v33  ;;  %v2550_v10 = vmax.f32 %v1562_v30, 0.0  ;;  %v2048_v30 = vand.u32 2147483648, %v6998_v12 }
 0x384   : > { %v5891_v8 = vpop.eup %5890  ;;  %v1854_v41 = vadd.f32 1.0, %v5889_v0 }
 0x385   : > { %v2038_v23 = vmul.f32 %v5891_v8, %v6998_v12  ;;  %5892 = vpow2.f32 %v5390_v13  ;;  %v2030_v7 = vsel %vm2029_vm7, %v5887_v28, %v2026_v59  ;;  %v7022_v28 = vpop.f32.mrf.mxu3  ;;  %vm2043_vm10 = vweird.f32 %v5891_v8 }
 0x386   : > { %5894 = vrcp.f32 %v1854_v41  ;;  %v2035_v2 = vsel %vm2032_vm8, %v2034_v42, %v2030_v7  ;;  %v2063_v48 = vand.u32 2147483648, %v1854_v41  ;;  %v2046_v59 = vand.u32 2147483647, %v6998_v12  ;;  %vm7028_vm13 = vmor %vm2042_vm11, %vm2043_vm10 }
 0x387   : > { %v2039_v27 = vsub.f32 1.0, %v2038_v23  ;;  %v2102_v38 = vpack.c.bf16 %v2035_v2, %v2020_v49  ;;  %v2061_v42 = vand.u32 2147483647, %v1854_v41  ;;  %vm2057_vm14 = vweird.f32 %v1854_v41 }
 0x388   : > { %v1545_v43 = vpop.f32.mrf.mxu2  ;;  %vm2047_vm0 = vcmp.eq.f32.partialorder %v2046_v59, 8.507059e+37 }
 0x389   : > { %v1563_v52 = vadd.f32 %v1545_v43, %v1428_v3  ;;  %5397 = vmatmul.msk.bf16.vlgmr.msrb.gmra.mxu3 %vm1470_vm9, %v2102_v38  ;;  %v2040_v33 = vmul.f32 %v5891_v8, %v2039_v27  ;;  %v2049_v38 = vor.u32 1.1754944e-38, %v2048_v30  ;;  %v2064_v43 = vor.u32 1.1754944e-38, %v2063_v48 }
 0x38a   : > { %vm2062_vm3 = vcmp.eq.f32.partialorder %v2061_v42, 8.507059e+37 }
 0x38b   : > { %v5893_v22 = vpop.eup %5892  ;;  %v5391_v32 = vmul.f32 -1.442695, %v1563_v52  ;;  %v2551_v11 = vmax.f32 %v1563_v52, 0.0  ;;  %v2041_v55 = vadd.f32 %v5891_v8, %v2040_v33 }
 0x38c   : > { %v5895_v4 = vpop.eup %5894  ;;  %v1855_v63 = vadd.f32 1.0, %v5893_v22 }
 0x38d   : > { %v2053_v0 = vmul.f32 %v5895_v4, %v1854_v41  ;;  %5896 = vpow2.f32 %v5391_v32  ;;  %v3179_v13 = vpack.c.bf16 %v2551_v11, %v2550_v10  ;;  %vm2058_vm12 = vweird.f32 %v5895_v4  ;;  %v7034_v22 = vpop.f32.mrf.mxu3 }
 0x38e   : > { %5898 = vrcp.f32 %v1855_v63  ;;  %v2045_v49 = vsel %vm7028_vm13, %v5891_v8, %v2041_v55  ;;  %vm2059_vm15 = vmor %vm2057_vm14, %vm2058_vm12  ;;  %vm2072_vm5 = vweird.f32 %v1855_v63  ;;  %v2076_v48 = vand.u32 2147483647, %v1855_v63 }
 0x38f   : > { %v2054_v24 = vsub.f32 1.0, %v2053_v0  ;;  %5455 = vmatmul.msk.bf16.gmra.mxu0 %vm1470_vm9, %v3179_v13  ;;  %v2050_v10 = vsel %vm2047_vm0, %v2049_v38, %v2045_v49 }
 0x390   : > { %vm2077_vm12 = vcmp.eq.f32.partialorder %v2076_v48, 8.507059e+37 }
 0x391   : > { %v2055_v6 = vmul.f32 %v5895_v4, %v2054_v24 }
 0x393   : > { %v5897_v7 = vpop.eup %5896  ;;  %v2056_v2 = vadd.f32 %v5895_v4, %v2055_v6 }
 0x394   : > { %v5899_v3 = vpop.eup %5898  ;;  %v1856_v27 = vadd.f32 1.0, %v5897_v7 }
 0x395   : > { %v2068_v52 = vmul.f32 %v5899_v3, %v1855_v63  ;;  %v2060_v12 = vsel %vm2059_vm15, %v5895_v4, %v2056_v2  ;;  %vm2073_vm4 = vweird.f32 %v5899_v3  ;;  %v7037_v55 = vpop.f32.mrf.mxu3  ;;  %v2078_v4 = vand.u32 2147483648, %v1855_v63  ;;  %v7045_v63 = vld [vmem:[%s8721_s6 + $0x1] ss:$0 sm:$0xff] }
 0x396   : > { %5900 = vrcp.f32 %v1856_v27  ;;  %v2065_v32 = vsel %vm2062_vm3, %v2064_v43, %v2060_v12  ;;  %v2093_v30 = vand.u32 2147483648, %v1856_v27  ;;  %v2091_v6 = vand.u32 2147483647, %v1856_v27  ;;  %vm2074_vm8 = vmor %vm2072_vm5, %vm2073_vm4 }
 0x397   : > { %v2069_v11 = vsub.f32 1.0, %v2068_v52  ;;  %v2103_v33 = vpack.c.bf16 %v2065_v32, %v2050_v10  ;;  %vm2087_vm10 = vweird.f32 %v1856_v27  ;;  %v2079_v7 = vor.u32 1.1754944e-38, %v2078_v4 }
 0x398   : > { %v2094_v49 = vor.u32 1.1754944e-38, %v2093_v30  ;;  %vm2092_vm13 = vcmp.eq.f32.partialorder %v2091_v6, 8.507059e+37 }
 0x399   : > { %5398 = vmatmul.msk.bf16.gmra.mxu3 %vm1470_vm9, %v2103_v33  ;;  %v2070_v8 = vmul.f32 %v5899_v3, %v2069_v11  ;;  %v2576_v11 = vld [vmem:[%s8720_s5 + $0x14] sm:$0x3] }
 0x39a   : > { %v2650_v33 = vsel %vm905_vm1, %v2576_v11, 0 }
 0x39b   : > { %v2071_v24 = vadd.f32 %v5899_v3, %v2070_v8  ;;  %2659 = vmatpush.bf16.msra.mxu2 %v2650_v33 }
 0x39c   : > { %v5901_v41 = vpop.eup %5900 }
 0x39d   : > { %v2083_v0 = vmul.f32 %v5901_v41, %v1856_v27  ;;  %vm2088_vm7 = vweird.f32 %v5901_v41  ;;  %v2075_v42 = vsel %vm2074_vm8, %v5899_v3, %v2071_v24  ;;  %v7040_v12 = vpop.f32.mrf.mxu3 }
 0x39e   : > { %vm2089_vm11 = vmor %vm2087_vm10, %vm2088_vm7  ;;  %v2080_v38 = vsel %vm2077_vm12, %v2079_v7, %v2075_v42 }
 0x39f   : > { %v2084_v13 = vsub.f32 1.0, %v2083_v0 }
 0x3a1   : > { %v2085_v59 = vmul.f32 %v5901_v41, %v2084_v13 }
 0x3a3   : > { %v2086_v23 = vadd.f32 %v5901_v41, %v2085_v59 }
 0x3a5   : > { %v2090_v2 = vsel %vm2089_vm11, %v5901_v41, %v2086_v23  ;;  %v7047_v3 = vpop.f32.mrf.mxu3 }
 0x3a6   : > { %v2095_v43 = vsel %vm2092_vm13, %v2094_v49, %v2090_v2 }
 0x3a7   : > { %v2104_v52 = vpack.c.bf16 %v2095_v43, %v2080_v38 }
 0x3a9   : > { %5399 = vmatmul.msk.bf16.gmra.mxu3 %vm1470_vm9, %v2104_v52 }
 0x3ad   : > { %v7054_v8 = vpop.f32.mrf.mxu3 }
 0x3b5   : > { %v7058_v59 = vpop.f32.mrf.mxu3 }
 0x3b6   : > { %v2144_v27 = vpop.f32.mrf.mxu1 }
 0x3b7   : > { %v2145_v10 = vadd.f32 %v7045_v63, %v2144_v27 }
 0x3b9   : > { %v5400_v32 = vmul.f32 -1.442695, %v2145_v10 }
 0x3bb   : > { %5902 = vpow2.f32 %v5400_v32 }
 0x3bd   : > { %v7061_v11 = vpop.f32.mrf.mxu3 }
 0x3be   : > { %v2146_v41 = vpop.f32.mrf.mxu1 }
 0x3bf   : > { %v2147_v0 = vadd.f32 %v7045_v63, %v2146_v41 }
 0x3c1   : > { %v5903_v13 = vpop.eup %5902  ;;  %v5401_v24 = vmul.f32 -1.442695, %v2147_v0 }
 0x3c2   : > { %v2232_v4 = vadd.f32 1.0, %v5903_v13 }
 0x3c3   : > { %5904 = vpow2.f32 %v5401_v24 }
 0x3c4   : > { %5906 = vrcp.f32 %v2232_v4  ;;  %v2259_v13 = vand.u32 2147483648, %v2232_v4  ;;  %vm2253_vm15 = vweird.f32 %v2232_v4  ;;  %v2257_v24 = vand.u32 2147483647, %v2232_v4 }
 0x3c6   : > { %v2149_v30 = vpop.f32.mrf.mxu1  ;;  %vm2258_vm4 = vcmp.eq.f32.partialorder %v2257_v24, 8.507059e+37 }
 0x3c7   : > { %v2150_v48 = vadd.f32 %v7045_v63, %v2149_v30 }
 0x3c9   : > { %v5905_v6 = vpop.eup %5904  ;;  %v5402_v42 = vmul.f32 -1.442695, %v2150_v48 }
 0x3ca   : > { %v5907_v23 = vpop.eup %5906  ;;  %v2233_v7 = vadd.f32 1.0, %v5905_v6 }
 0x3cb   : > { %v2249_v49 = vmul.f32 %v5907_v23, %v2232_v4  ;;  %5908 = vpow2.f32 %v5402_v42  ;;  %vm2254_vm14 = vweird.f32 %v5907_v23 }
 0x3cc   : > { %5910 = vrcp.f32 %v2233_v7  ;;  %vm7066_vm0 = vmor %vm2253_vm15, %vm2254_vm14  ;;  %v2272_v6 = vand.u32 2147483647, %v2233_v7  ;;  %v2274_v42 = vand.u32 2147483648, %v2233_v7  ;;  %vm2268_vm5 = vweird.f32 %v2233_v7 }
 0x3cd   : > { %v2250_v2 = vsub.f32 1.0, %v2249_v49 }
 0x3ce   : > { %v2151_v38 = vpop.f32.mrf.mxu1  ;;  %v2275_v61 = vor.u32 1.1754944e-38, %v2274_v42  ;;  %vm2273_vm8 = vcmp.eq.f32.partialorder %v2272_v6, 8.507059e+37 }
 0x3cf   : > { %v2251_v43 = vmul.f32 %v5907_v23, %v2250_v2  ;;  %v2152_v52 = vadd.f32 %v7045_v63, %v2151_v38 }
 0x3d1   : > { %v5909_v27 = vpop.eup %5908  ;;  %v5403_v10 = vmul.f32 -1.442695, %v2152_v52  ;;  %v2252_v41 = vadd.f32 %v5907_v23, %v2251_v43  ;;  %v2260_v52 = vor.u32 1.1754944e-38, %v2259_v13 }
 0x3d2   : > { %v5911_v32 = vpop.eup %5910  ;;  %v7063_v33 = vadd.f32 1.0, %v5909_v27 }
 0x3d3   : > { %v2264_v0 = vmul.f32 %v5911_v32, %v2233_v7  ;;  %5912 = vpow2.f32 %v5403_v10  ;;  %v2256_v2 = vsel %vm7066_vm0, %v5907_v23, %v2252_v41  ;;  %vm2269_vm3 = vweird.f32 %v5911_v32  ;;  %v7074_v23 = vpop.f32.mrf.mxu3 }
 0x3d4   : > { %5914 = vrcp.f32 %v7063_v33  ;;  %v2261_v9 = vsel %vm2258_vm4, %v2260_v52, %v2256_v2  ;;  %vm2270_vm7 = vmor %vm2268_vm5, %vm2269_vm3  ;;  %vm2283_vm11 = vweird.f32 %v7063_v33 }
 0x3d5   : > { %v2265_v30 = vsub.f32 1.0, %v2264_v0  ;;  %v2488_v24 = vmul.f32 %v2261_v9, %v6551_v25  ;;  %v7082_v42 = vmul.f32 %v2261_v9, %v6672_v14 }
 0x3d6   : > { %v2154_v49 = vpop.f32.mrf.mxu1 }
 0x3d7   : > { %v2266_v38 = vmul.f32 %v5911_v32, %v2265_v30  ;;  %v2155_v43 = vadd.f32 %v7045_v63, %v2154_v49 }
 0x3d9   : > { %v5913_v27 = vpop.eup %5912  ;;  %v2267_v10 = vadd.f32 %v5911_v32, %v2266_v38  ;;  %v5404_v4 = vmul.f32 -1.442695, %v2155_v43  ;;  %v2289_v43 = vand.u32 2147483648, %v7063_v33 }
 0x3da   : > { %v5915_v0 = vpop.eup %5914  ;;  %v2235_v46 = vadd.f32 1.0, %v5913_v27  ;;  %v2287_v27 = vand.u32 2147483647, %v7063_v33 }
 0x3db   : > { %v2271_v44 = vsel %vm2270_vm7, %v5911_v32, %v2267_v10  ;;  %v2279_v48 = vmul.f32 %v5915_v0, %v7063_v33  ;;  %5916 = vpow2.f32 %v5404_v4  ;;  %v7085_v32 = vmul.f32 %v2261_v9, %v6970_v51  ;;  %v7102_v10 = vpop.f32.mrf.mxu3 }
 0x3dc   : > { %v2276_v41 = vsel %vm2273_vm8, %v2275_v61, %v2271_v44  ;;  %5918 = vrcp.f32 %v2235_v46  ;;  %vm2284_vm10 = vweird.f32 %v5915_v0  ;;  %vm2298_vm14 = vweird.f32 %v2235_v46 }
 0x3dd   : > { %v2280_v13 = vsub.f32 1.0, %v2279_v48  ;;  %v2489_v7 = vmul.f32 %v2276_v41, %v6556_v31  ;;  %v7079_v30 = vmul.f32 %v2276_v41, %v6684_v35  ;;  %v7088_v6 = vmul.f32 %v2276_v41, %v6994_v53  ;;  %vm7104_vm12 = vmor %vm2283_vm11, %vm2284_vm10 }
 0x3de   : > { %v2156_v49 = vpop.f32.mrf.mxu1  ;;  %v2302_v41 = vand.u32 2147483647, %v2235_v46  ;;  %vm2288_vm15 = vcmp.eq.f32.partialorder %v2287_v27, 8.507059e+37 }
 0x3df   : > { %v2281_v44 = vmul.f32 %v5915_v0, %v2280_v13  ;;  %v2157_v61 = vadd.f32 %v7045_v63, %v2156_v49  ;;  %v2552_v2 = vpack.c.bf16 %v2489_v7, %v2488_v24  ;;  %v2304_v13 = vand.u32 2147483648, %v2235_v46 }
 0x3e0   : > { %vm2303_vm3 = vcmp.eq.f32.partialorder %v2302_v41, 8.507059e+37 }
 0x3e1   : > { %v5917_v35 = vpop.eup %5916  ;;  %v5405_v38 = vmul.f32 -1.442695, %v2157_v61  ;;  %5416 = vmatmul.msk.bf16.vlgmr.msra.gmra.mxu2 %vm832_vm2, %v2552_v2  ;;  %v2282_v53 = vadd.f32 %v5915_v0, %v2281_v44  ;;  %v2290_v44 = vor.u32 1.1754944e-38, %v2289_v43  ;;  %v2305_v31 = vor.u32 1.1754944e-38, %v2304_v13 }
 0x3e2   : > { %v5919_v14 = vpop.eup %5918  ;;  %v7096_v9 = vadd.f32 1.0, %v5917_v35 }
 0x3e3   : > { %v2294_v51 = vmul.f32 %v5919_v14, %v2235_v46  ;;  %5920 = vpow2.f32 %v5405_v38  ;;  %v2286_v49 = vsel %vm7104_vm12, %v5915_v0, %v2282_v53  ;;  %vm2299_vm13 = vweird.f32 %v5919_v14 }
 0x3e4   : > { %5922 = vrcp.f32 %v7096_v9  ;;  %vm2300_vm0 = vmor %vm2298_vm14, %vm2299_vm13  ;;  %vm2313_vm5 = vweird.f32 %v7096_v9 }
 0x3e5   : > { %v2295_v52 = vsub.f32 1.0, %v2294_v51  ;;  %v2291_v51 = vsel %vm2288_vm15, %v2290_v44, %v2286_v49  ;;  %v2319_v44 = vand.u32 2147483648, %v7096_v9 }
 0x3e6   : > { %v2159_v4 = vpop.f32.mrf.mxu1  ;;  %v2490_v53 = vmul.f32 %v2291_v51, %v6566_v39  ;;  %v7118_v48 = vmul.f32 %v2291_v51, %v6701_v1  ;;  %v7121_v13 = vmul.f32 %v2291_v51, %v7009_v17  ;;  %v7127_v39 = vpop.f32.mrf.mxu3 }
 0x3e7   : > { %v2296_v24 = vmul.f32 %v5919_v14, %v2295_v52  ;;  %v2160_v7 = vadd.f32 %v7045_v63, %v2159_v4 }
 0x3e9   : > { %v5921_v61 = vpop.eup %5920  ;;  %v5406_v33 = vmul.f32 -1.442695, %v2160_v7  ;;  %v2297_v2 = vadd.f32 %v5919_v14, %v2296_v24 }
 0x3ea   : > { %v5923_v35 = vpop.eup %5922  ;;  %v2237_v38 = vadd.f32 1.0, %v5921_v61 }
 0x3eb   : > { %v2309_v25 = vmul.f32 %v5923_v35, %v7096_v9  ;;  %5924 = vpow2.f32 %v5406_v33  ;;  %v2301_v52 = vsel %vm2300_vm0, %v5919_v14, %v2297_v2  ;;  %vm2314_vm4 = vweird.f32 %v5923_v35 }
 0x3ec   : > { %5926 = vrcp.f32 %v2237_v38  ;;  %v2306_v4 = vsel %vm2303_vm3, %v2305_v31, %v2301_v52  ;;  %v2317_v33 = vand.u32 2147483647, %v7096_v9  ;;  %vm7140_vm7 = vmor %vm2313_vm5, %vm2314_vm4  ;;  %v2332_v52 = vand.u32 2147483647, %v2237_v38 }
 0x3ed   : > { %v2310_v0 = vsub.f32 1.0, %v2309_v25  ;;  %v2491_v46 = vmul.f32 %v2306_v4, %v6574_v47  ;;  %v7115_v43 = vmul.f32 %v2306_v4, %v6718_v45  ;;  %v7124_v14 = vmul.f32 %v2306_v4, %v7022_v28 }
 0x3ee   : > { %v2161_v27 = vpop.f32.mrf.mxu1  ;;  %v2334_v4 = vand.u32 2147483648, %v2237_v38  ;;  %vm2328_vm10 = vweird.f32 %v2237_v38  ;;  %vm2318_vm11 = vcmp.eq.f32.partialorder %v2317_v33, 8.507059e+37  ;;  %vm2333_vm13 = vcmp.eq.f32.partialorder %v2332_v52, 8.507059e+37 }
 0x3ef   : > { %v2311_v41 = vmul.f32 %v5923_v35, %v2310_v0  ;;  %v2162_v25 = vadd.f32 %v7045_v63, %v2161_v27  ;;  %v2553_v31 = vpack.c.bf16 %v2491_v46, %v2490_v53  ;;  %v2561_v47 = vpack.c.bf16 %v7115_v43, %v7118_v48 }
 0x3f0   : > { %v2320_v27 = vor.u32 1.1754944e-38, %v2319_v44  ;;  %v2335_v45 = vor.u32 1.1754944e-38, %v2334_v4 }
 0x3f1   : > { %v5925_v1 = vpop.eup %5924  ;;  %v5407_v24 = vmul.f32 -1.442695, %v2162_v25  ;;  %5417 = vmatmul.msk.bf16.gmra.mxu2 %vm832_vm2, %v2553_v31  ;;  %v2312_v49 = vadd.f32 %v5923_v35, %v2311_v41 }
 0x3f2   : > { %v5927_v17 = vpop.eup %5926  ;;  %v7134_v7 = vadd.f32 1.0, %v5925_v1  ;;  %v7147_v1 = vpop.f32.mrf.mxu3 }
 0x3f3   : > { %v2324_v28 = vmul.f32 %v5927_v17, %v2237_v38  ;;  %5928 = vpow2.f32 %v5407_v24  ;;  %v2316_v46 = vsel %vm7140_vm7, %v5923_v35, %v2312_v49  ;;  %vm2329_vm8 = vweird.f32 %v5927_v17 }
 0x3f4   : > { %5930 = vrcp.f32 %v7134_v7  ;;  %vm2330_vm12 = vmor %vm2328_vm10, %vm2329_vm8  ;;  %vm2343_vm15 = vweird.f32 %v7134_v7 }
 0x3f5   : > { %v2325_v61 = vsub.f32 1.0, %v2324_v28  ;;  %v2321_v28 = vsel %vm2318_vm11, %v2320_v27, %v2316_v46 }
 0x3f6   : > { %v2164_v2 = vpop.f32.mrf.mxu1  ;;  %v2492_v38 = vmul.f32 %v2321_v28, %v6584_v56  ;;  %v7159_v4 = vmul.f32 %v2321_v28, %v7034_v22 }
 0x3f7   : > { %v2326_v0 = vmul.f32 %v5927_v17, %v2325_v61  ;;  %v2165_v53 = vadd.f32 %v7045_v63, %v2164_v2 }
 0x3f9   : > { %v5929_v41 = vpop.eup %5928  ;;  %v5408_v25 = vmul.f32 -1.442695, %v2165_v53  ;;  %v2327_v9 = vadd.f32 %v5927_v17, %v2326_v0  ;;  %v7156_v0 = vmul.f32 %v2321_v28, %v6732_v16  ;;  %v2347_v28 = vand.u32 2147483647, %v7134_v7 }
 0x3fa   : > { %v5931_v31 = vpop.eup %5930  ;;  %v2239_v24 = vadd.f32 1.0, %v5929_v41  ;;  %v7172_v41 = vpop.f32.mrf.mxu3 }
 0x3fb   : > { %v2339_v61 = vmul.f32 %v5931_v31, %v7134_v7  ;;  %5932 = vpow2.f32 %v5408_v25  ;;  %v2331_v2 = vsel %vm2330_vm12, %v5927_v17, %v2327_v9  ;;  %vm2344_vm14 = vweird.f32 %v5931_v31 }
 0x3fc   : > { %5934 = vrcp.f32 %v2239_v24  ;;  %v2336_v35 = vsel %vm2333_vm13, %v2335_v45, %v2331_v2  ;;  %v2349_v25 = vand.u32 2147483648, %v7134_v7  ;;  %vm2345_vm0 = vmor %vm2343_vm15, %vm2344_vm14  ;;  %vm2358_vm4 = vweird.f32 %v2239_v24 }
 0x3fd   : > { %v2340_v49 = vsub.f32 1.0, %v2339_v61  ;;  %v2493_v44 = vmul.f32 %v2336_v35, %v6592_v54  ;;  %v7153_v33 = vmul.f32 %v2336_v35, %v6760_v18  ;;  %v7162_v17 = vmul.f32 %v2336_v35, %v7037_v55 }
 0x3fe   : > { %v2166_v51 = vpop.f32.mrf.mxu1  ;;  %v2364_v61 = vand.u32 2147483648, %v2239_v24  ;;  %vm2348_vm5 = vcmp.eq.f32.partialorder %v2347_v28, 8.507059e+37 }
 0x3ff   : > { %v2341_v52 = vmul.f32 %v5931_v31, %v2340_v49  ;;  %v2167_v45 = vadd.f32 %v7045_v63, %v2166_v51  ;;  %v2554_v53 = vpack.c.bf16 %v2493_v44, %v2492_v38  ;;  %v2562_v56 = vpack.c.bf16 %v7153_v33, %v7156_v0 }
 0x400   : > { %v2570_v54 = vpack.c.bf16 %v7162_v17, %v7159_v4  ;;  %v2362_v49 = vand.u32 2147483647, %v2239_v24  ;;  %v2350_v38 = vor.u32 1.1754944e-38, %v2349_v25 }
 0x401   : > { %v5933_v18 = vpop.eup %5932  ;;  %v5409_v46 = vmul.f32 -1.442695, %v2167_v45  ;;  %5418 = vmatmul.msk.bf16.gmra.mxu2 %vm832_vm2, %v2554_v53  ;;  %v2342_v55 = vadd.f32 %v5931_v31, %v2341_v52 }
 0x402   : > { %v5935_v16 = vpop.eup %5934  ;;  %v7170_v22 = vadd.f32 1.0, %v5933_v18  ;;  %v2365_v18 = vor.u32 1.1754944e-38, %v2364_v61  ;;  %vm2363_vm8 = vcmp.eq.f32.partialorder %v2362_v49, 8.507059e+37 }
 0x403   : > { %v2354_v27 = vmul.f32 %v5935_v16, %v2239_v24  ;;  %5936 = vpow2.f32 %v5409_v46  ;;  %v2346_v35 = vsel %vm2345_vm0, %v5931_v31, %v2342_v55  ;;  %vm2359_vm3 = vweird.f32 %v5935_v16 }
 0x404   : > { %5938 = vrcp.f32 %v7170_v22  ;;  %v2351_v53 = vsel %vm2348_vm5, %v2350_v38, %v2346_v35  ;;  %vm2360_vm7 = vmor %vm2358_vm4, %vm2359_vm3  ;;  %vm2373_vm11 = vweird.f32 %v7170_v22 }
 0x405   : > { %v2355_v9 = vsub.f32 1.0, %v2354_v27  ;;  %v2494_v25 = vmul.f32 %v2351_v53, %v6601_v57  ;;  %v7183_v28 = vmul.f32 %v2351_v53, %v6772_v36  ;;  %v7189_v61 = vmul.f32 %v2351_v53, %v7040_v12 }
 0x407   : > { %v2356_v2 = vmul.f32 %v5935_v16, %v2355_v9 }
 0x409   : > { %v5937_v44 = vpop.eup %5936  ;;  %v2357_v51 = vadd.f32 %v5935_v16, %v2356_v2 }
 0x40a   : > { %v5939_v52 = vpop.eup %5938  ;;  %v2241_v45 = vadd.f32 1.0, %v5937_v44 }
 0x40b   : > { %v2369_v46 = vmul.f32 %v5939_v52, %v7170_v22  ;;  %v2361_v27 = vsel %vm2360_vm7, %v5935_v16, %v2357_v51  ;;  %vm2374_vm10 = vweird.f32 %v5939_v52  ;;  %v2377_v51 = vand.u32 2147483647, %v7170_v22 }
 0x40c   : > { %5940 = vrcp.f32 %v2241_v45  ;;  %v2169_v7 = vpop.f32.mrf.mxu3  ;;  %v2366_v9 = vsel %vm2363_vm8, %v2365_v18, %v2361_v27  ;;  %vm2375_vm12 = vmor %vm2373_vm11, %vm2374_vm10  ;;  %vm2388_vm15 = vweird.f32 %v2241_v45 }
 0x40d   : > { %v2370_v31 = vsub.f32 1.0, %v2369_v46  ;;  %v2170_v55 = vadd.f32 %v7045_v63, %v2169_v7  ;;  %v2495_v24 = vmul.f32 %v2366_v9, %v6609_v15  ;;  %v7186_v2 = vmul.f32 %v2366_v9, %v6787_v5 }
 0x40e   : > { %v7192_v16 = vmul.f32 %v2366_v9, %v7047_v3  ;;  %v2379_v5 = vand.u32 2147483648, %v7170_v22  ;;  %v2394_v7 = vand.u32 2147483648, %v2241_v45  ;;  %vm2378_vm14 = vcmp.eq.f32.partialorder %v2377_v51, 8.507059e+37 }
 0x40f   : > { %v2371_v35 = vmul.f32 %v5939_v52, %v2370_v31  ;;  %v5410_v49 = vmul.f32 -1.442695, %v2170_v55  ;;  %v2555_v38 = vpack.c.bf16 %v2495_v24, %v2494_v25  ;;  %v2563_v57 = vpack.c.bf16 %v7186_v2, %v7183_v28 }
 0x410   : > { %v2380_v27 = vor.u32 1.1754944e-38, %v2379_v5  ;;  %v2392_v25 = vand.u32 2147483647, %v2241_v45  ;;  %v2395_v22 = vor.u32 1.1754944e-38, %v2394_v7 }
 0x411   : > { %5942 = vpow2.f32 %v5410_v49  ;;  %5419 = vmatmul.msk.bf16.gmra.mxu2 %vm832_vm2, %v2555_v38  ;;  %v2372_v12 = vadd.f32 %v5939_v52, %v2371_v35 }
 0x412   : > { %v5941_v36 = vpop.eup %5940  ;;  %vm2393_vm3 = vcmp.eq.f32.partialorder %v2392_v25, 8.507059e+37 }
 0x413   : > { %v2384_v44 = vmul.f32 %v5941_v36, %v2241_v45  ;;  %v2376_v46 = vsel %vm2375_vm12, %v5939_v52, %v2372_v12  ;;  %vm2389_vm13 = vweird.f32 %v5941_v36 }
 0x414   : > { %v2171_v3 = vpop.f32.mrf.mxu3  ;;  %v2381_v35 = vsel %vm2378_vm14, %v2380_v27, %v2376_v46  ;;  %vm2390_vm0 = vmor %vm2388_vm15, %vm2389_vm13 }
 0x415   : > { %v2385_v53 = vsub.f32 1.0, %v2384_v44  ;;  %v2172_v18 = vadd.f32 %v7045_v63, %v2171_v3  ;;  %v2496_v5 = vmul.f32 %v2381_v35, %v6618_v21  ;;  %v7205_v12 = vmul.f32 %v2381_v35, %v6853_v60 }
 0x416   : > { %v7208_v3 = vmul.f32 %v2381_v35, %v7054_v8 }
 0x417   : > { %v5943_v9 = vpop.eup %5942  ;;  %v2386_v31 = vmul.f32 %v5941_v36, %v2385_v53  ;;  %v5411_v55 = vmul.f32 -1.442695, %v2172_v18 }
 0x418   : > { %v2242_v24 = vadd.f32 1.0, %v5943_v9 }
 0x419   : > { %5944 = vpow2.f32 %v5411_v55  ;;  %v2387_v49 = vadd.f32 %v5941_v36, %v2386_v31 }
 0x41a   : > { %5946 = vrcp.f32 %v2242_v24  ;;  %vm2403_vm5 = vweird.f32 %v2242_v24 }
 0x41b   : > { %v2391_v38 = vsel %vm2390_vm0, %v5941_v36, %v2387_v49 }
 0x41c   : > { %v2174_v44 = vpop.f32.mrf.mxu3  ;;  %v2396_v52 = vsel %vm2393_vm3, %v2395_v22, %v2391_v38 }
 0x41d   : > { %v2175_v45 = vadd.f32 %v7045_v63, %v2174_v44  ;;  %v2497_v51 = vmul.f32 %v2396_v52, %v6624_v26  ;;  %v7213_v53 = vmul.f32 %v2396_v52, %v6858_v58  ;;  %v7216_v36 = vmul.f32 %v2396_v52, %v7058_v59 }
 0x41e   : > { %v2409_v44 = vand.u32 2147483648, %v2242_v24 }
 0x41f   : > { %v5945_v18 = vpop.eup %5944  ;;  %v5412_v46 = vmul.f32 -1.442695, %v2175_v45  ;;  %v2556_v27 = vpack.c.bf16 %v2497_v51, %v2496_v5  ;;  %v2564_v21 = vpack.c.bf16 %v7213_v53, %v7205_v12  ;;  %v2407_v5 = vand.u32 2147483647, %v2242_v24 }
 0x420   : > { %v5947_v8 = vpop.eup %5946  ;;  %v2243_v7 = vadd.f32 1.0, %v5945_v18 }
 0x421   : > { %v2399_v9 = vmul.f32 %v5947_v8, %v2242_v24  ;;  %5948 = vpow2.f32 %v5412_v46  ;;  %5420 = vmatmul.msk.bf16.gmra.mxu2 %vm832_vm2, %v2556_v27  ;;  %vm2404_vm4 = vweird.f32 %v5947_v8  ;;  %vm2408_vm11 = vcmp.eq.f32.partialorder %v2407_v5, 8.507059e+37 }
 0x422   : > { %5950 = vrcp.f32 %v2243_v7  ;;  %v2424_v45 = vand.u32 2147483648, %v2243_v7  ;;  %vm2405_vm7 = vmor %vm2403_vm5, %vm2404_vm4  ;;  %v2422_v18 = vand.u32 2147483647, %v2243_v7  ;;  %vm2418_vm10 = vweird.f32 %v2243_v7 }
 0x423   : > { %v2400_v26 = vsub.f32 1.0, %v2399_v9 }
 0x424   : > { %v2176_v58 = vpop.f32.mrf.mxu3  ;;  %v2425_v24 = vor.u32 1.1754944e-38, %v2424_v45  ;;  %vm2423_vm13 = vcmp.eq.f32.partialorder %v2422_v18, 8.507059e+37 }
 0x425   : > { %v2401_v59 = vmul.f32 %v5947_v8, %v2400_v26  ;;  %v2177_v31 = vadd.f32 %v7045_v63, %v2176_v58  ;;  %v2410_v26 = vor.u32 1.1754944e-38, %v2409_v44 }
 0x427   : > { %v5949_v55 = vpop.eup %5948  ;;  %v5413_v25 = vmul.f32 -1.442695, %v2177_v31  ;;  %v2402_v38 = vadd.f32 %v5947_v8, %v2401_v59 }
 0x428   : > { %v5951_v35 = vpop.eup %5950  ;;  %v7224_v49 = vadd.f32 1.0, %v5949_v55 }
 0x429   : > { %v2414_v22 = vmul.f32 %v5951_v35, %v2243_v7  ;;  %5952 = vpow2.f32 %v5413_v25  ;;  %v2406_v9 = vsel %vm2405_vm7, %v5947_v8, %v2402_v38  ;;  %vm2419_vm8 = vweird.f32 %v5951_v35 }
 0x42a   : > { %5954 = vrcp.f32 %v7224_v49  ;;  %v2411_v60 = vsel %vm2408_vm11, %v2410_v26, %v2406_v9  ;;  %vm2420_vm12 = vmor %vm2418_vm10, %vm2419_vm8  ;;  %vm2433_vm15 = vweird.f32 %v7224_v49 }
 0x42b   : > { %v2415_v52 = vsub.f32 1.0, %v2414_v22  ;;  %v2498_v38 = vmul.f32 %v2411_v60, %v6634_v34  ;;  %v7238_v45 = vmul.f32 %v2411_v60, %v7061_v11 }
 0x42c   : > { %v2179_v51 = vpop.f32.mrf.mxu3 }
 0x42d   : > { %v2416_v46 = vmul.f32 %v5951_v35, %v2415_v52  ;;  %v2180_v27 = vadd.f32 %v7045_v63, %v2179_v51  ;;  %v7235_v51 = vmul.f32 %v2411_v60, %v6865_v62 }
 0x42f   : > { %v5953_v58 = vpop.eup %5952  ;;  %v5414_v59 = vmul.f32 -1.442695, %v2180_v27  ;;  %v2417_v31 = vadd.f32 %v5951_v35, %v2416_v46 }
 0x430   : > { %v5955_v55 = vpop.eup %5954  ;;  %v2245_v25 = vadd.f32 1.0, %v5953_v58 }
 0x431   : > { %v2429_v22 = vmul.f32 %v5955_v55, %v7224_v49  ;;  %5956 = vpow2.f32 %v5414_v59  ;;  %v2421_v15 = vsel %vm2420_vm12, %v5951_v35, %v2417_v31  ;;  %vm2434_vm14 = vweird.f32 %v5955_v55 }
 0x432   : > { %5958 = vrcp.f32 %v2245_v25  ;;  %v2426_v52 = vsel %vm2423_vm13, %v2425_v24, %v2421_v15  ;;  %vm2435_vm0 = vmor %vm2433_vm15, %vm2434_vm14  ;;  %v2454_v58 = vand.u32 2147483648, %v2245_v25  ;;  %vm2448_vm5 = vweird.f32 %v2245_v25 }
 0x433   : > { %v2430_v8 = vsub.f32 1.0, %v2429_v22  ;;  %v2499_v7 = vmul.f32 %v2426_v52, %v6638_v40  ;;  %v7232_v44 = vmul.f32 %v2426_v52, %v6880_v29  ;;  %v7241_v35 = vmul.f32 %v2426_v52, %v7074_v23 }
 0x434   : > { %v2181_v5 = vpop.f32.mrf.mxu3  ;;  %v2439_v23 = vand.u32 2147483648, %v7224_v49  ;;  %v2452_v22 = vand.u32 2147483647, %v2245_v25 }
 0x435   : > { %v2431_v18 = vmul.f32 %v5955_v55, %v2430_v8  ;;  %v2182_v15 = vadd.f32 %v7045_v63, %v2181_v5  ;;  %v2557_v46 = vpack.c.bf16 %v2499_v7, %v2498_v38  ;;  %v2565_v34 = vpack.c.bf16 %v7232_v44, %v7235_v51 }
 0x436   : > { %v2573_v40 = vpack.c.bf16 %v7241_v35, %v7238_v45  ;;  %v2437_v63 = vand.u32 2147483647, %v7224_v49  ;;  %v2440_v24 = vor.u32 1.1754944e-38, %v2439_v23  ;;  %vm2453_vm8 = vcmp.eq.f32.partialorder %v2452_v22, 8.507059e+37 }
 0x437   : > { %v5957_v29 = vpop.eup %5956  ;;  %v5415_v27 = vmul.f32 -1.442695, %v2182_v15  ;;  %5421 = vmatmul.msk.bf16.gmra.mxu2 %vm832_vm2, %v2557_v46  ;;  %v2432_v60 = vadd.f32 %v5955_v55, %v2431_v18  ;;  %v2455_v18 = vor.u32 1.1754944e-38, %v2454_v58 }
 0x438   : > { %v5959_v62 = vpop.eup %5958  ;;  %v2246_v11 = vadd.f32 1.0, %v5957_v29  ;;  %vm2438_vm4 = vcmp.eq.f32.partialorder %v2437_v63, 8.507059e+37 }
 0x439   : > { %v2444_v9 = vmul.f32 %v5959_v62, %v2245_v25  ;;  %5960 = vpow2.f32 %v5415_v27  ;;  %v2436_v59 = vsel %vm2435_vm0, %v5955_v55, %v2432_v60  ;;  %vm2449_vm3 = vweird.f32 %v5959_v62 }
 0x43a   : > { %5962 = vrcp.f32 %v2246_v11  ;;  %v2441_v8 = vsel %vm2438_vm4, %v2440_v24, %v2436_v59  ;;  %vm2450_vm7 = vmor %vm2448_vm5, %vm2449_vm3  ;;  %vm2463_vm11 = vweird.f32 %v2246_v11 }
 0x43b   : > { %v2445_v26 = vsub.f32 1.0, %v2444_v9  ;;  %v2500_v55 = vmul.f32 %v2441_v8, %v6643_v50  ;;  %v7255_v60 = vmul.f32 %v2441_v8, %v6904_v37  ;;  %v7261_v23 = vmul.f32 %v2441_v8, %v7102_v10 }
 0x43c   : > { %v2467_v10 = vand.u32 2147483647, %v2246_v11 }
 0x43d   : > { %v2446_v31 = vmul.f32 %v5959_v62, %v2445_v26 }
 0x43e   : > { %vm2468_vm14 = vcmp.eq.f32.partialorder %v2467_v10, 8.507059e+37 }
 0x43f   : > { %v5961_v52 = vpop.eup %5960  ;;  %v2447_v38 = vadd.f32 %v5959_v62, %v2446_v31 }
 0x440   : > { %v5963_v7 = vpop.eup %5962  ;;  %v2247_v5 = vadd.f32 1.0, %v5961_v52 }
 0x441   : > { %v2459_v15 = vmul.f32 %v5963_v7, %v2246_v11  ;;  %v2451_v46 = vsel %vm2450_vm7, %v5959_v62, %v2447_v38  ;;  %vm2464_vm10 = vweird.f32 %v5963_v7 }
 0x442   : > { %5964 = vrcp.f32 %v2247_v5  ;;  %v2456_v49 = vsel %vm2453_vm8, %v2455_v18, %v2451_v46  ;;  %vm2465_vm12 = vmor %vm2463_vm11, %vm2464_vm10  ;;  %v2482_v52 = vand.u32 2147483647, %v2247_v5  ;;  %vm2478_vm15 = vweird.f32 %v2247_v5 }
 0x443   : > { %v2460_v29 = vsub.f32 1.0, %v2459_v15  ;;  %v2501_v27 = vmul.f32 %v2456_v49, %v6648_v19  ;;  %v7258_v25 = vmul.f32 %v2456_v49, %v6918_v20  ;;  %v7264_v9 = vmul.f32 %v2456_v49, %v7127_v39  ;;  %v8789_v49 = vld [vmem:[#allocation10_spill] sm:$0xff] }
 0x444   : > { %v2469_v20 = vand.u32 2147483648, %v2246_v11  ;;  %v2484_v39 = vand.u32 2147483648, %v2247_v5  ;;  %vm2483_vm3 = vcmp.eq.f32.partialorder %v2482_v52, 8.507059e+37  ;;  %v8790_v11 = vld [vmem:[#allocation12_spill] sm:$0xff] }
 0x445   : > { %v2461_v62 = vmul.f32 %v5963_v7, %v2460_v29  ;;  %v2558_v63 = vpack.c.bf16 %v2501_v27, %v2500_v55  ;;  %v2566_v50 = vpack.c.bf16 %v7258_v25, %v7255_v60  ;;  %v2574_v19 = vpack.c.bf16 %v7264_v9, %v7261_v23  ;;  %v8791_v27 = vld [vmem:[#allocation11_spill] sm:$0xff] }
 0x446   : > { %v2470_v22 = vor.u32 1.1754944e-38, %v2469_v20  ;;  %v2485_v18 = vor.u32 1.1754944e-38, %v2484_v39 }
 0x447   : > { %5422 = vmatmul.msk.bf16.gmra.mxu2 %vm832_vm2, %v2558_v63  ;;  %v2462_v26 = vadd.f32 %v5963_v7, %v2461_v62 }
 0x448   : > { %v5965_v37 = vpop.eup %5964 }
 0x449   : > { %v2474_v58 = vmul.f32 %v5965_v37, %v2247_v5  ;;  %v2466_v31 = vsel %vm2465_vm12, %v5963_v7, %v2462_v26  ;;  %vm2479_vm13 = vweird.f32 %v5965_v37  ;;  %v8792_v7 = vld [vmem:[#allocation13_spill] sm:$0xff] }
 0x44a   : > { %v2471_v8 = vsel %vm2468_vm14, %v2470_v22, %v2466_v31  ;;  %vm2480_vm0 = vmor %vm2478_vm15, %vm2479_vm13 }
 0x44b   : > { %v2475_v59 = vsub.f32 1.0, %v2474_v58  ;;  %v2502_v55 = vmul.f32 %v2471_v8, %v8789_v49  ;;  %v2518_v29 = vmul.f32 %v2471_v8, %v8790_v11  ;;  %v7276_v62 = vmul.f32 %v2471_v8, %v7147_v1 }
 0x44c   : > { %v8793_v58 = vpack.c.bf16 %v7079_v30, %v7082_v42 }
 0x44d   : > { %v2476_v24 = vmul.f32 %v5965_v37, %v2475_v59 }
 0x44f   : > { %v2477_v38 = vadd.f32 %v5965_v37, %v2476_v24  ;;  %v8794_v24 = vpack.c.bf16 %v7088_v6, %v7085_v32 }
 0x451   : > { %v2481_v15 = vsel %vm2480_vm0, %v5965_v37, %v2477_v38 }
 0x452   : > { %v2486_v46 = vsel %vm2483_vm3, %v2485_v18, %v2481_v15 }
 0x453   : > { %v2503_v60 = vmul.f32 %v2486_v46, %v8791_v27  ;;  %v2519_v25 = vmul.f32 %v2486_v46, %v8792_v7  ;;  %v7279_v5 = vmul.f32 %v2486_v46, %v7172_v41  ;;  %v8795_v46 = vpack.c.bf16 %v7124_v14, %v7121_v13 }
 0x455   : > { %v2559_v63 = vpack.c.bf16 %v2503_v60, %v2502_v55  ;;  %v2567_v26 = vpack.c.bf16 %v2519_v25, %v2518_v29  ;;  %v2575_v37 = vpack.c.bf16 %v7279_v5, %v7276_v62 }
 0x457   : > { %5423 = vmatmul.msk.bf16.gmra.mxu2 %vm832_vm2, %v2559_v63 }
 0x464   : > { %v7284_v20 = vpop.f32.mrf.mxu2 }
 0x465   : > { %v2781_v22 = vmul.f32 %v7284_v20, %v7284_v20 }
 0x467   : > { %5424 = vmatmul.msk.bf16.gmra.mxu2 %vm832_vm2, %v8793_v58 }
 0x46c   : > { %v7290_v10 = vpop.f32.mrf.mxu2 }
 0x46d   : > { %v2782_v18 = vmul.f32 %v7290_v10, %v7290_v10 }
 0x474   : > { %v7294_v41 = vpop.f32.mrf.mxu2 }
 0x475   : > { %v2783_v55 = vmul.f32 %v7294_v41, %v7294_v41 }
 0x477   : > { %5425 = vmatmul.msk.bf16.gmra.mxu2 %vm832_vm2, %v2561_v47 }
 0x47c   : > { %v7300_v59 = vpop.f32.mrf.mxu2 }
 0x47d   : > { %v2784_v60 = vmul.f32 %v7300_v59, %v7300_v59 }
 0x484   : > { %v7304_v30 = vpop.f32.mrf.mxu2 }
 0x485   : > { %v2785_v63 = vmul.f32 %v7304_v30, %v7304_v30 }
 0x487   : > { %5426 = vmatmul.msk.bf16.gmra.mxu2 %vm832_vm2, %v2562_v56 }
 0x48c   : > { %v7310_v42 = vpop.f32.mrf.mxu2 }
 0x494   : > { %v7314_v43 = vpop.f32.mrf.mxu2 }
 0x497   : > { %5427 = vmatmul.msk.bf16.gmra.mxu2 %vm832_vm2, %v2563_v57 }
 0x49c   : > { %v7320_v48 = vpop.f32.mrf.mxu2 }
 0x4a4   : > { %v7324_v33 = vpop.f32.mrf.mxu2 }
 0x4a7   : > { %5428 = vmatmul.msk.bf16.gmra.mxu2 %vm832_vm2, %v2564_v21 }
 0x4ac   : > { %v7330_v0 = vpop.f32.mrf.mxu2 }
 0x4b7   : > { %5429 = vmatmul.msk.bf16.gmra.mxu2 %vm832_vm2, %v2565_v34 }
 0x4ba   : > { %v7338_v28 = vpop.f32.mrf.mxu2 }
 0x4c2   : > { %v7340_v2 = vpop.f32.mrf.mxu2 }
 0x4c7   : > { %5430 = vmatmul.msk.bf16.gmra.mxu2 %vm832_vm2, %v2566_v50 }
 0x4ca   : > { %v7345_v12 = vpop.f32.mrf.mxu2 }
 0x4d2   : > { %v7347_v53 = vpop.f32.mrf.mxu2 }
 0x4d7   : > { %5431 = vmatmul.msk.bf16.gmra.mxu2 %vm832_vm2, %v2567_v26 }
 0x4da   : > { %v7352_v44 = vpop.f32.mrf.mxu2 }
 0x4e2   : > { %v7354_v51 = vpop.f32.mrf.mxu2 }
 0x4e7   : > { %5432 = vmatmul.msk.bf16.gmra.mxu2 %vm832_vm2, %v8794_v24 }
 0x4ea   : > { %v7362_v50 = vpop.f32.mrf.mxu2 }
 0x4eb   : > { %v2797_v52 = vmul.f32 %v7362_v50, %v7362_v50 }
 0x4ed   : > { %v7368_v8 = vadd.f32 %v2797_v52, %v2781_v22  ;;  %v2786_v22 = vmul.f32 %v7310_v42, %v7310_v42  ;;  %v8796_v52 = vpack.c.bf16 %v7192_v16, %v7189_v61 }
 0x4f2   : > { %v7370_v38 = vpop.f32.mrf.mxu2 }
 0x4f3   : > { %v2798_v32 = vmul.f32 %v7370_v38, %v7370_v38 }
 0x4f5   : > { %v7378_v15 = vadd.f32 %v2798_v32, %v2782_v18  ;;  %v2787_v32 = vmul.f32 %v7314_v43, %v7314_v43 }
 0x4f7   : > { %5433 = vmatmul.msk.bf16.gmra.mxu2 %vm832_vm2, %v8795_v46 }
 0x4fa   : > { %v7384_v49 = vpop.f32.mrf.mxu2 }
 0x4fb   : > { %v2799_v11 = vmul.f32 %v7384_v49, %v7384_v49 }
 0x4fd   : > { %v7390_v29 = vadd.f32 %v2799_v11, %v2783_v55 }
 0x502   : > { %v7392_v27 = vpop.f32.mrf.mxu2 }
 0x503   : > { %v2800_v13 = vmul.f32 %v7392_v27, %v7392_v27 }
 0x505   : > { %v7400_v7 = vadd.f32 %v2800_v13, %v2784_v60  ;;  %v2788_v60 = vmul.f32 %v7320_v48, %v7320_v48 }
 0x507   : > { %5434 = vmatmul.msk.bf16.gmra.mxu2 %vm832_vm2, %v2570_v54 }
 0x50a   : > { %v7406_v25 = vpop.f32.mrf.mxu2 }
 0x50b   : > { %v2801_v26 = vmul.f32 %v7406_v25, %v7406_v25 }
 0x50d   : > { %v7412_v58 = vadd.f32 %v2801_v26, %v2785_v63  ;;  %v8797_v63 = vpack.c.bf16 %v7216_v36, %v7208_v3 }
 0x512   : > { %v7414_v24 = vpop.f32.mrf.mxu2 }
 0x513   : > { %v2802_v4 = vmul.f32 %v7414_v24, %v7414_v24 }
 0x515   : > { %v7422_v54 = vadd.f32 %v2802_v4, %v2786_v22  ;;  %v2789_v22 = vmul.f32 %v7324_v33, %v7324_v33 }
 0x517   : > { %5435 = vmatmul.msk.bf16.gmra.mxu2 %vm832_vm2, %v8796_v52 }
 0x51a   : > { %v7428_v18 = vpop.f32.mrf.mxu2 }
 0x51b   : > { %v2803_v46 = vmul.f32 %v7428_v18, %v7428_v18 }
 0x51d   : > { %v7434_v55 = vadd.f32 %v2803_v46, %v2787_v32  ;;  %v2790_v46 = vmul.f32 %v7330_v0, %v7330_v0 }
 0x522   : > { %v7436_v11 = vpop.f32.mrf.mxu2 }
 0x523   : > { %v2804_v61 = vmul.f32 %v7436_v11, %v7436_v11 }
 0x525   : > { %v7444_v13 = vadd.f32 %v2804_v61, %v2788_v60 }
 0x527   : > { %5436 = vmatmul.msk.bf16.gmra.mxu2 %vm832_vm2, %v8797_v63  ;;  %v2791_v63 = vmul.f32 %v7338_v28, %v7338_v28 }
 0x52a   : > { %v7450_v26 = vpop.f32.mrf.mxu2 }
 0x52b   : > { %v2805_v4 = vmul.f32 %v7450_v26, %v7450_v26 }
 0x52d   : > { %v7456_v52 = vadd.f32 %v2805_v4, %v2789_v22 }
 0x532   : > { %v7458_v32 = vpop.f32.mrf.mxu2 }
 0x533   : > { %v2806_v3 = vmul.f32 %v7458_v32, %v7458_v32 }
 0x535   : > { %v7466_v60 = vadd.f32 %v2806_v3, %v2790_v46  ;;  %v2792_v46 = vmul.f32 %v7340_v2, %v7340_v2 }
 0x537   : > { %5437 = vmatmul.msk.bf16.gmra.mxu2 %vm832_vm2, %v2573_v40 }
 0x53a   : > { %v7472_v61 = vpop.f32.mrf.mxu2 }
 0x53b   : > { %v2807_v22 = vmul.f32 %v7472_v61, %v7472_v61 }
 0x53d   : > { %v7478_v4 = vadd.f32 %v2807_v22, %v2791_v63  ;;  %v2793_v63 = vmul.f32 %v7345_v12, %v7345_v12 }
 0x542   : > { %v7480_v16 = vpop.f32.mrf.mxu2 }
 0x543   : > { %v2808_v45 = vmul.f32 %v7480_v16, %v7480_v16 }
 0x545   : > { %v7488_v40 = vadd.f32 %v2808_v45, %v2792_v46  ;;  %v2794_v46 = vmul.f32 %v7347_v53, %v7347_v53 }
 0x547   : > { %5438 = vmatmul.msk.bf16.gmra.mxu2 %vm832_vm2, %v2574_v19 }
 0x54a   : > { %v7494_v3 = vpop.f32.mrf.mxu2 }
 0x54b   : > { %8798 = vst [vmem:[#allocation10_spill] sm:$0xff] %v7494_v3  ;;  %v2809_v22 = vmul.f32 %v7494_v3, %v7494_v3 }
 0x54d   : > { %v7500_v36 = vadd.f32 %v2809_v22, %v2793_v63  ;;  %v2795_v63 = vmul.f32 %v7352_v44, %v7352_v44 }
 0x552   : > { %v7502_v17 = vpop.f32.mrf.mxu2 }
 0x553   : > { %v2810_v23 = vmul.f32 %v7502_v17, %v7502_v17 }
 0x555   : > { %v7510_v19 = vadd.f32 %v2810_v23, %v2794_v46  ;;  %v2796_v46 = vmul.f32 %v7354_v51, %v7354_v51 }
 0x557   : > { %5439 = vmatmul.msk.bf16.gmra.mxu2 %vm832_vm2, %v2575_v37 }
 0x55a   : > { %v7516_v45 = vpop.f32.mrf.mxu2 }
 0x55b   : > { %8799 = vst [vmem:[#allocation12_spill] sm:$0xff] %v7516_v45  ;;  %v2811_v22 = vmul.f32 %v7516_v45, %v7516_v45 }
 0x55d   : > { %v7522_v35 = vadd.f32 %v2811_v22, %v2795_v63  ;;  %v3078_v22 = vld [vmem:[%s8720_s5 + $0x1c] sm:$0x3] }
 0x55e   : > { %v3104_v6 = vsel %vm905_vm1, %v3078_v22, 0 }
 0x55f   : > { %3113 = vmatpush.bf16.msrb.mxu1 %v3104_v6 }
 0x562   : > { %v7524_v14 = vpop.f32.mrf.mxu2 }
 0x563   : > { %8800 = vst [vmem:[#allocation11_spill] sm:$0xff] %v7524_v14  ;;  %v2812_v62 = vmul.f32 %v7524_v14, %v7524_v14 }
 0x565   : > { %v7532_v37 = vadd.f32 %v2812_v62, %v2796_v46 }
 0x56a   : > { %v7534_v23 = vpop.f32.mrf.mxu2 }
 0x56b   : > { %8801 = vst [vmem:[#allocation13_spill] sm:$0xff] %v7534_v23  ;;  %v2829_v9 = vmul.f32 %v7534_v23, %v7534_v23 }
 0x56d   : > { %v2845_v63 = vadd.f32 %v2829_v9, %v7368_v8 }
 0x56f   : > { %v2861_v34 = vmax.f32 %v2845_v63, 1e-05 }
 0x571   : > { %5966 = vrsqrt.f32 %v2861_v34  ;;  %vm2884_vm4 = vcmp.eq.f32.partialorder %v2861_v34, inf  ;;  %vm2886_vm7 = vcmp.eq.f32.partialorder %v2861_v34, 0.0 }
 0x572   : > { %v7543_v21 = vpop.f32.mrf.mxu2 }
 0x573   : > { %8802 = vst [vmem:[#allocation14_spill] sm:$0xff] %v7543_v21  ;;  %v2830_v46 = vmul.f32 %v7543_v21, %v7543_v21 }
 0x575   : > { %v2846_v5 = vadd.f32 %v2830_v46, %v7378_v15 }
 0x577   : > { %v5967_v8 = vpop.eup %5966  ;;  %v2862_v9 = vmax.f32 %v2846_v5, 1e-05 }
 0x578   : > { %v2878_v57 = vmul.f32 %v5967_v8, %v2861_v34 }
 0x579   : > { %5968 = vrsqrt.f32 %v2862_v9  ;;  %vm2896_vm5 = vcmp.eq.f32.partialorder %v2862_v9, inf  ;;  %vm2898_vm8 = vcmp.eq.f32.partialorder %v2862_v9, 0.0 }
 0x57a   : > { %v7550_v56 = vpop.f32.mrf.mxu2  ;;  %v2879_v22 = vmul.f32 %v5967_v8, %v2878_v57 }
 0x57b   : > { %8803 = vst [vmem:[#allocation15_spill] sm:$0xff] %v7550_v56  ;;  %v2831_v6 = vmul.f32 %v7550_v56, %v7550_v56 }
 0x57c   : > { %v2880_v63 = vmul.f32 0.5, %v2879_v22 }
 0x57d   : > { %v2847_v47 = vadd.f32 %v2831_v6, %v7390_v29 }
 0x57e   : > { %v2881_v31 = vsub.f32 1.5, %v2880_v63 }
 0x57f   : > { %v5969_v39 = vpop.eup %5968  ;;  %v7555_v1 = vmax.f32 %v2847_v47, 1e-05 }
 0x580   : > { %v2890_v62 = vmul.f32 %v5969_v39, %v2862_v9  ;;  %v2882_v5 = vmul.f32 %v5967_v8, %v2881_v31 }
 0x581   : > { %5970 = vrsqrt.f32 %v7555_v1  ;;  %vm2908_vm10 = vcmp.eq.f32.partialorder %v7555_v1, inf  ;;  %vm2910_vm12 = vcmp.eq.f32.partialorder %v7555_v1, 0.0 }
 0x582   : > { %v7558_v15 = vpop.f32.mrf.mxu2  ;;  %v2891_v46 = vmul.f32 %v5969_v39, %v2890_v62  ;;  %v2883_v6 = vmul.f32 %v2882_v5, %v2861_v34 }
 0x583   : > { %8804 = vst [vmem:[#allocation16_spill] sm:$0xff] %v7558_v15  ;;  %v2832_v57 = vmul.f32 %v7558_v15, %v7558_v15 }
 0x584   : > { %v2892_v22 = vmul.f32 0.5, %v2891_v46  ;;  %v2885_v62 = vsel %vm2884_vm4, %v2861_v34, %v2883_v6  ;;  %v2887_v46 = vand.u32 2147483648, %v2861_v34 }
 0x585   : > { %v2848_v29 = vadd.f32 %v2832_v57, %v7400_v7  ;;  %v2899_v7 = vand.u32 2147483648, %v2862_v9 }
 0x586   : > { %v2893_v63 = vsub.f32 1.5, %v2892_v22  ;;  %v2888_v22 = vsel %vm2886_vm7, %v2887_v46, %v2885_v62 }
 0x587   : > { %v5971_v47 = vpop.eup %5970  ;;  %v2864_v21 = vmax.f32 %v2848_v29, 1e-05 }
 0x588   : > { %v2894_v45 = vmul.f32 %v5969_v39, %v2893_v63  ;;  %v2902_v14 = vmul.f32 %v5971_v47, %v7555_v1 }
 0x589   : > { %5972 = vrsqrt.f32 %v2864_v21  ;;  %vm2920_vm11 = vcmp.eq.f32.partialorder %v2864_v21, inf  ;;  %vm2922_vm13 = vcmp.eq.f32.partialorder %v2864_v21, 0.0 }
 0x58a   : > { %v7566_v31 = vpop.f32.mrf.mxu2  ;;  %v2895_v8 = vmul.f32 %v2894_v45, %v2862_v9  ;;  %v2903_v3 = vmul.f32 %v5971_v47, %v2902_v14 }
 0x58b   : > { %v2833_v23 = vmul.f32 %v7566_v31, %v7566_v31 }
 0x58c   : > { %v2897_v5 = vsel %vm2896_vm5, %v2862_v9, %v2895_v8  ;;  %v2904_v57 = vmul.f32 0.5, %v2903_v3 }
 0x58d   : > { %v2849_v39 = vadd.f32 %v2833_v23, %v7412_v58  ;;  %v2900_v29 = vsel %vm2898_vm8, %v2899_v7, %v2897_v5 }
 0x58e   : > { %v3070_v63 = vpack.c.bf16 %v2900_v29, %v2888_v22  ;;  %v2905_v56 = vsub.f32 1.5, %v2904_v57 }
 0x58f   : > { %v5973_v15 = vpop.eup %5972  ;;  %v7571_v6 = vmax.f32 %v2849_v39, 1e-05 }
 0x590   : > { %5440 = vmatmul.msk.bf16.vlgmr.msrb.gmra.mxu1 %vm832_vm2, %v3070_v63  ;;  %v2914_v14 = vmul.f32 %v5973_v15, %v2864_v21  ;;  %v2906_v34 = vmul.f32 %v5971_v47, %v2905_v56  ;;  %v2911_v63 = vand.u32 2147483648, %v7555_v1 }
 0x591   : > { %5974 = vrsqrt.f32 %v7571_v6  ;;  %vm2932_vm14 = vcmp.eq.f32.partialorder %v7571_v6, inf  ;;  %vm2934_vm0 = vcmp.eq.f32.partialorder %v7571_v6, 0.0 }
 0x592   : > { %v7575_v45 = vpop.f32.mrf.mxu2  ;;  %v2915_v8 = vmul.f32 %v5973_v15, %v2914_v14  ;;  %v2907_v62 = vmul.f32 %v2906_v34, %v7555_v1  ;;  %v2923_v14 = vand.u32 2147483648, %v2864_v21 }
 0x593   : > { %v2834_v3 = vmul.f32 %v7575_v45, %v7575_v45 }
 0x594   : > { %v2916_v23 = vmul.f32 0.5, %v2915_v8  ;;  %v2909_v47 = vsel %vm2908_vm10, %v7555_v1, %v2907_v62 }
 0x595   : > { %v2850_v9 = vadd.f32 %v2834_v3, %v7422_v54  ;;  %v2912_v3 = vsel %vm2910_vm12, %v2911_v63, %v2909_v47 }
 0x596   : > { %v2917_v46 = vsub.f32 1.5, %v2916_v23 }
 0x597   : > { %v5975_v7 = vpop.eup %5974  ;;  %v2866_v5 = vmax.f32 %v2850_v9, 1e-05 }
 0x598   : > { %v2918_v57 = vmul.f32 %v5973_v15, %v2917_v46  ;;  %v2926_v39 = vmul.f32 %v5975_v7, %v7571_v6 }
 0x599   : > { %5976 = vrsqrt.f32 %v2866_v5  ;;  %vm2944_vm15 = vcmp.eq.f32.partialorder %v2866_v5, inf  ;;  %vm2946_vm3 = vcmp.eq.f32.partialorder %v2866_v5, 0.0 }
 0x59a   : > { %v7585_v56 = vpop.f32.mrf.mxu2  ;;  %v2919_v22 = vmul.f32 %v2918_v57, %v2864_v21  ;;  %v2927_v29 = vmul.f32 %v5975_v7, %v2926_v39 }
 0x59b   : > { %v2835_v54 = vmul.f32 %v7585_v56, %v7585_v56 }
 0x59c   : > { %v2921_v15 = vsel %vm2920_vm11, %v2864_v21, %v2919_v22  ;;  %v2928_v34 = vmul.f32 0.5, %v2927_v29 }
 0x59d   : > { %v2851_v8 = vadd.f32 %v2835_v54, %v7434_v55  ;;  %v2924_v23 = vsel %vm2922_vm13, %v2923_v14, %v2921_v15 }
 0x59e   : > { %v3071_v9 = vpack.c.bf16 %v2924_v23, %v2912_v3  ;;  %v2929_v62 = vsub.f32 1.5, %v2928_v34 }
 0x59f   : > { %v5977_v46 = vpop.eup %5976  ;;  %v7593_v57 = vmax.f32 %v2851_v8, 1e-05 }
 0x5a0   : > { %5441 = vmatmul.msk.bf16.gmra.mxu1 %vm832_vm2, %v3071_v9  ;;  %v2938_v39 = vmul.f32 %v5977_v46, %v2866_v5  ;;  %v2930_v1 = vmul.f32 %v5975_v7, %v2929_v62  ;;  %v2935_v62 = vand.u32 2147483648, %v7571_v6 }
 0x5a1   : > { %5978 = vrsqrt.f32 %v7593_v57  ;;  %vm2956_vm4 = vcmp.eq.f32.partialorder %v7593_v57, inf  ;;  %vm2958_vm7 = vcmp.eq.f32.partialorder %v7593_v57, 0.0 }
 0x5a2   : > { %v7597_v58 = vpop.f32.mrf.mxu2  ;;  %v2939_v22 = vmul.f32 %v5977_v46, %v2938_v39  ;;  %v2931_v54 = vmul.f32 %v2930_v1, %v7571_v6  ;;  %v2947_v39 = vand.u32 2147483648, %v2866_v5 }
 0x5a3   : > { %v2836_v21 = vmul.f32 %v7597_v58, %v7597_v58 }
 0x5a4   : > { %v2940_v47 = vmul.f32 0.5, %v2939_v22  ;;  %v2933_v3 = vsel %vm2932_vm14, %v7571_v6, %v2931_v54 }
 0x5a5   : > { %v2852_v29 = vadd.f32 %v2836_v21, %v7444_v13  ;;  %v2936_v21 = vsel %vm2934_vm0, %v2935_v62, %v2933_v3 }
 0x5a6   : > { %v2941_v63 = vsub.f32 1.5, %v2940_v47 }
 0x5a7   : > { %v5979_v14 = vpop.eup %5978  ;;  %v2868_v15 = vmax.f32 %v2852_v29, 1e-05 }
 0x5a8   : > { %v2942_v34 = vmul.f32 %v5977_v46, %v2941_v63  ;;  %v2950_v8 = vmul.f32 %v5979_v14, %v7593_v57 }
 0x5a9   : > { %5980 = vrsqrt.f32 %v2868_v15  ;;  %vm2968_vm5 = vcmp.eq.f32.partialorder %v2868_v15, inf  ;;  %vm2970_vm8 = vcmp.eq.f32.partialorder %v2868_v15, 0.0 }
 0x5aa   : > { %v7607_v7 = vpop.f32.mrf.mxu2  ;;  %v2943_v23 = vmul.f32 %v2942_v34, %v2866_v5  ;;  %v2951_v9 = vmul.f32 %v5979_v14, %v2950_v8 }
 0x5ab   : > { %v2837_v13 = vmul.f32 %v7607_v7, %v7607_v7 }
 0x5ac   : > { %v2945_v46 = vsel %vm2944_vm15, %v2866_v5, %v2943_v23  ;;  %v2952_v1 = vmul.f32 0.5, %v2951_v9 }
 0x5ad   : > { %v2853_v22 = vadd.f32 %v2837_v13, %v7456_v52  ;;  %v2948_v47 = vsel %vm2946_vm3, %v2947_v39, %v2945_v46 }
 0x5ae   : > { %v3072_v29 = vpack.c.bf16 %v2948_v47, %v2936_v21  ;;  %v2953_v54 = vsub.f32 1.5, %v2952_v1 }
 0x5af   : > { %v5981_v63 = vpop.eup %5980  ;;  %v7615_v34 = vmax.f32 %v2853_v22, 1e-05 }
 0x5b0   : > { %5442 = vmatmul.msk.bf16.gmra.mxu1 %vm832_vm2, %v3072_v29  ;;  %v2962_v8 = vmul.f32 %v5981_v63, %v2868_v15  ;;  %v2954_v6 = vmul.f32 %v5979_v14, %v2953_v54  ;;  %v2959_v54 = vand.u32 2147483648, %v7593_v57 }
 0x5b1   : > { %5982 = vrsqrt.f32 %v7615_v34  ;;  %vm2980_vm10 = vcmp.eq.f32.partialorder %v7615_v34, inf  ;;  %vm2982_vm12 = vcmp.eq.f32.partialorder %v7615_v34, 0.0 }
 0x5b2   : > { %v7619_v55 = vpop.f32.mrf.mxu2  ;;  %v2963_v23 = vmul.f32 %v5981_v63, %v2962_v8  ;;  %v2955_v13 = vmul.f32 %v2954_v6, %v7593_v57  ;;  %v2971_v8 = vand.u32 2147483648, %v2868_v15 }
 0x5b3   : > { %v2838_v5 = vmul.f32 %v7619_v55, %v7619_v55 }
 0x5b4   : > { %v2964_v3 = vmul.f32 0.5, %v2963_v23  ;;  %v2957_v21 = vsel %vm2956_vm4, %v7593_v57, %v2955_v13 }
 0x5b5   : > { %v2854_v9 = vadd.f32 %v2838_v5, %v7466_v60  ;;  %v2960_v5 = vsel %vm2958_vm7, %v2959_v54, %v2957_v21 }
 0x5b6   : > { %v2965_v62 = vsub.f32 1.5, %v2964_v3 }
 0x5b7   : > { %v5983_v39 = vpop.eup %5982  ;;  %v2870_v46 = vmax.f32 %v2854_v9, 1e-05 }
 0x5b8   : > { %v2966_v1 = vmul.f32 %v5981_v63, %v2965_v62  ;;  %v2974_v22 = vmul.f32 %v5983_v39, %v7615_v34 }
 0x5b9   : > { %5984 = vrsqrt.f32 %v2870_v46  ;;  %vm2992_vm11 = vcmp.eq.f32.partialorder %v2870_v46, inf  ;;  %vm2994_vm13 = vcmp.eq.f32.partialorder %v2870_v46, 0.0 }
 0x5ba   : > { %v7629_v14 = vpop.f32.mrf.mxu2  ;;  %v2967_v47 = vmul.f32 %v2966_v1, %v2868_v15  ;;  %v2975_v29 = vmul.f32 %v5983_v39, %v2974_v22 }
 0x5bb   : > { %v2839_v60 = vmul.f32 %v7629_v14, %v7629_v14 }
 0x5bc   : > { %v2969_v63 = vsel %vm2968_vm5, %v2868_v15, %v2967_v47  ;;  %v2976_v6 = vmul.f32 0.5, %v2975_v29 }
 0x5bd   : > { %v2855_v23 = vadd.f32 %v2839_v60, %v7478_v4  ;;  %v2972_v3 = vsel %vm2970_vm8, %v2971_v8, %v2969_v63 }
 0x5be   : > { %v3073_v9 = vpack.c.bf16 %v2972_v3, %v2960_v5  ;;  %v2977_v13 = vsub.f32 1.5, %v2976_v6 }
 0x5bf   : > { %v5985_v62 = vpop.eup %5984  ;;  %v7637_v1 = vmax.f32 %v2855_v23, 1e-05 }
 0x5c0   : > { %5443 = vmatmul.msk.bf16.gmra.mxu1 %vm832_vm2, %v3073_v9  ;;  %v2986_v22 = vmul.f32 %v5985_v62, %v2870_v46  ;;  %v2978_v57 = vmul.f32 %v5983_v39, %v2977_v13  ;;  %v3297_v39 = vld [vmem:[%s8720_s5 + $0x20] sm:$0x3] }
 0x5c1   : > { %5986 = vrsqrt.f32 %v7637_v1  ;;  %v3371_v13 = vsel %vm905_vm1, %v3297_v39, 0  ;;  %vm3004_vm14 = vcmp.eq.f32.partialorder %v7637_v1, inf  ;;  %vm3006_vm0 = vcmp.eq.f32.partialorder %v7637_v1, 0.0 }
 0x5c2   : > { %v7641_v52 = vpop.f32.mrf.mxu2  ;;  %v2987_v47 = vmul.f32 %v5985_v62, %v2986_v22  ;;  %v2979_v60 = vmul.f32 %v2978_v57, %v7615_v34  ;;  %v2983_v22 = vand.u32 2147483648, %v7615_v34  ;;  %v2995_v57 = vand.u32 2147483648, %v2870_v46  ;;  %3380 = vmatpush.bf16.msra.mxu1 %v3371_v13 }
 0x5c3   : > { %v2840_v15 = vmul.f32 %v7641_v52, %v7641_v52 }
 0x5c4   : > { %v2988_v21 = vmul.f32 0.5, %v2987_v47  ;;  %v2981_v3 = vsel %vm2980_vm10, %v7615_v34, %v2979_v60 }
 0x5c5   : > { %v2856_v29 = vadd.f32 %v2840_v15, %v7488_v40 }
 0x5c6   : > { %v2989_v54 = vsub.f32 1.5, %v2988_v21 }
 0x5c7   : > { %v5987_v8 = vpop.eup %5986  ;;  %v2872_v63 = vmax.f32 %v2856_v29, 1e-05  ;;  %v2984_v29 = vsel %vm2982_vm12, %v2983_v22, %v2981_v3 }
 0x5c8   : > { %v2990_v6 = vmul.f32 %v5985_v62, %v2989_v54  ;;  %v2998_v23 = vmul.f32 %v5987_v8, %v7637_v1 }
 0x5c9   : > { %5988 = vrsqrt.f32 %v2872_v63  ;;  %vm3016_vm15 = vcmp.eq.f32.partialorder %v2872_v63, inf  ;;  %vm3018_vm3 = vcmp.eq.f32.partialorder %v2872_v63, 0.0 }
 0x5ca   : > { %v7654_v5 = vpop.f32.mrf.mxu2  ;;  %v2991_v40 = vmul.f32 %v2990_v6, %v2870_v46  ;;  %v2999_v9 = vmul.f32 %v5987_v8, %v2998_v23 }
 0x5cb   : > { %8805 = vst [vmem:[#allocation17_spill] sm:$0xff] %v7654_v5  ;;  %v2841_v62 = vmul.f32 %v7654_v5, %v7654_v5 }
 0x5cc   : > { %v2993_v47 = vsel %vm2992_vm11, %v2870_v46, %v2991_v40  ;;  %v3000_v15 = vmul.f32 0.5, %v2999_v9 }
 0x5cd   : > { %v2857_v21 = vadd.f32 %v2841_v62, %v7500_v36  ;;  %v2996_v60 = vsel %vm2994_vm13, %v2995_v57, %v2993_v47 }
 0x5ce   : > { %v3074_v54 = vpack.c.bf16 %v2996_v60, %v2984_v29  ;;  %v3001_v6 = vsub.f32 1.5, %v3000_v15 }
 0x5cf   : > { %v5989_v23 = vpop.eup %5988  ;;  %v7663_v39 = vmax.f32 %v2857_v21, 1e-05 }
 0x5d0   : > { %5444 = vmatmul.msk.bf16.gmra.mxu1 %vm832_vm2, %v3074_v54  ;;  %v3010_v4 = vmul.f32 %v5989_v23, %v2872_v63  ;;  %v3002_v34 = vmul.f32 %v5987_v8, %v3001_v6  ;;  %v3007_v54 = vand.u32 2147483648, %v7637_v1  ;;  %v3019_v6 = vand.u32 2147483648, %v2872_v63 }
 0x5d1   : > { %5990 = vrsqrt.f32 %v7663_v39  ;;  %vm3028_vm4 = vcmp.eq.f32.partialorder %v7663_v39, inf  ;;  %vm3030_vm7 = vcmp.eq.f32.partialorder %v7663_v39, 0.0 }
 0x5d2   : > { %v7667_v13 = vpop.f32.mrf.mxu2  ;;  %v3011_v40 = vmul.f32 %v5989_v23, %v3010_v4  ;;  %v3003_v62 = vmul.f32 %v3002_v34, %v7637_v1 }
 0x5d3   : > { %8806 = vst [vmem:[#allocation18_spill] sm:$0xff] %v7667_v13  ;;  %v2842_v46 = vmul.f32 %v7667_v13, %v7667_v13 }
 0x5d4   : > { %v3012_v3 = vmul.f32 0.5, %v3011_v40  ;;  %v3005_v8 = vsel %vm3004_vm14, %v7637_v1, %v3003_v62 }
 0x5d5   : > { %v2858_v9 = vadd.f32 %v2842_v46, %v7510_v19  ;;  %v3008_v46 = vsel %vm3006_vm0, %v3007_v54, %v3005_v8 }
 0x5d6   : > { %v3013_v22 = vsub.f32 1.5, %v3012_v3 }
 0x5d7   : > { %v5991_v57 = vpop.eup %5990  ;;  %v2874_v47 = vmax.f32 %v2858_v9, 1e-05 }
 0x5d8   : > { %v3014_v15 = vmul.f32 %v5989_v23, %v3013_v22  ;;  %v3022_v21 = vmul.f32 %v5991_v57, %v7663_v39 }
 0x5d9   : > { %5992 = vrsqrt.f32 %v2874_v47  ;;  %vm3040_vm5 = vcmp.eq.f32.partialorder %v2874_v47, inf  ;;  %vm3042_vm8 = vcmp.eq.f32.partialorder %v2874_v47, 0.0 }
 0x5da   : > { %v7677_v4 = vpop.f32.mrf.mxu2  ;;  %v3015_v29 = vmul.f32 %v3014_v15, %v2872_v63  ;;  %v3023_v60 = vmul.f32 %v5991_v57, %v3022_v21 }
 0x5db   : > { %v2843_v19 = vmul.f32 %v7677_v4, %v7677_v4 }
 0x5dc   : > { %v3017_v23 = vsel %vm3016_vm15, %v2872_v63, %v3015_v29  ;;  %v3024_v34 = vmul.f32 0.5, %v3023_v60 }
 0x5dd   : > { %v2859_v40 = vadd.f32 %v2843_v19, %v7522_v35  ;;  %v3020_v3 = vsel %vm3018_vm3, %v3019_v6, %v3017_v23 }
 0x5de   : > { %v3075_v9 = vpack.c.bf16 %v3020_v3, %v3008_v46  ;;  %v3025_v62 = vsub.f32 1.5, %v3024_v34  ;;  %v3031_v46 = vand.u32 2147483648, %v7663_v39 }
 0x5df   : > { %v5993_v22 = vpop.eup %5992  ;;  %v2875_v15 = vmax.f32 %v2859_v40, 1e-05 }
 0x5e0   : > { %5445 = vmatmul.msk.bf16.gmra.mxu1 %vm832_vm2, %v3075_v9  ;;  %v3034_v21 = vmul.f32 %v5993_v22, %v2874_v47  ;;  %v3026_v5 = vmul.f32 %v5991_v57, %v3025_v62 }
 0x5e1   : > { %5994 = vrsqrt.f32 %v2875_v15  ;;  %vm3052_vm10 = vcmp.eq.f32.partialorder %v2875_v15, inf  ;;  %vm3054_vm12 = vcmp.eq.f32.partialorder %v2875_v15, 0.0 }
 0x5e2   : > { %v7686_v36 = vpop.f32.mrf.mxu2  ;;  %v3035_v13 = vmul.f32 %v5993_v22, %v3034_v21  ;;  %v3027_v29 = vmul.f32 %v3026_v5, %v7663_v39 }
 0x5e3   : > { %v2844_v1 = vmul.f32 %v7686_v36, %v7686_v36 }
 0x5e4   : > { %v3036_v63 = vmul.f32 0.5, %v3035_v13  ;;  %v3029_v57 = vsel %vm3028_vm4, %v7663_v39, %v3027_v29  ;;  %v3043_v13 = vand.u32 2147483648, %v2874_v47 }
 0x5e5   : > { %v2860_v8 = vadd.f32 %v2844_v1, %v7532_v37  ;;  %v3032_v3 = vsel %vm3030_vm7, %v3031_v46, %v3029_v57 }
 0x5e6   : > { %v3037_v60 = vsub.f32 1.5, %v3036_v63  ;;  %v3217_v63 = vpop.f32.mrf.mxu0 }
 0x5e7   : > { %v5995_v19 = vpop.eup %5994  ;;  %v2876_v54 = vmax.f32 %v2860_v8, 1e-05 }
 0x5e8   : > { %v3038_v6 = vmul.f32 %v5993_v22, %v3037_v60  ;;  %v3046_v23 = vmul.f32 %v5995_v19, %v2875_v15 }
 0x5e9   : > { %5996 = vrsqrt.f32 %v2876_v54  ;;  %vm3064_vm11 = vcmp.eq.f32.partialorder %v2876_v54, inf  ;;  %v3067_v57 = vand.u32 2147483648, %v2876_v54  ;;  %vm3066_vm13 = vcmp.eq.f32.partialorder %v2876_v54, 0.0 }
 0x5ea   : > { %v3039_v34 = vmul.f32 %v3038_v6, %v2874_v47  ;;  %v3047_v40 = vmul.f32 %v5995_v19, %v3046_v23 }
 0x5ec   : > { %v3041_v37 = vsel %vm3040_vm5, %v2874_v47, %v3039_v34  ;;  %v3048_v5 = vmul.f32 0.5, %v3047_v40  ;;  %v3055_v40 = vand.u32 2147483648, %v2875_v15 }
 0x5ed   : > { %v3044_v9 = vsel %vm3042_vm8, %v3043_v13, %v3041_v37 }
 0x5ee   : > { %v3076_v62 = vpack.c.bf16 %v3044_v9, %v3032_v3  ;;  %v3049_v22 = vsub.f32 1.5, %v3048_v5  ;;  %v3219_v47 = vpop.f32.mrf.mxu0  ;;  %v7703_v3 = vld [vmem:[%s8721_s6 + $0x2] ss:$0 sm:$0xff] }
 0x5ef   : > { %v5997_v21 = vpop.eup %5996 }
 0x5f0   : > { %5446 = vmatmul.msk.bf16.gmra.mxu1 %vm832_vm2, %v3076_v62  ;;  %v3058_v1 = vmul.f32 %v5997_v21, %v2876_v54  ;;  %v3050_v8 = vmul.f32 %v5995_v19, %v3049_v22 }
 0x5f2   : > { %v3059_v29 = vmul.f32 %v5997_v21, %v3058_v1  ;;  %v3051_v6 = vmul.f32 %v3050_v8, %v2875_v15  ;;  %v3814_v1 = vld [vmem:[%s8720_s5 + $0x24] sm:$0xf] }
 0x5f4   : > { %v3060_v60 = vmul.f32 0.5, %v3059_v29  ;;  %v3053_v39 = vsel %vm3052_vm10, %v2875_v15, %v3051_v6  ;;  %v8808_v15 = vpack.c.bf16 %v7290_v10, %v7284_v20  ;;  %v3842_v29 = vsel %vm1495_vm6, %v3814_v1, 0 }
 0x5f5   : > { %v3056_v13 = vsel %vm3054_vm12, %v3055_v40, %v3053_v39  ;;  %3851 = vmatpush.bf16.msra.mxu3 %v3842_v29  ;;  %v8811_v40 = vpack.c.bf16 %v7300_v59, %v7294_v41 }
 0x5f6   : > { %v3061_v23 = vsub.f32 1.5, %v3060_v60  ;;  %v3222_v19 = vpop.f32.mrf.mxu0 }
 0x5f8   : > { %v3062_v35 = vmul.f32 %v5997_v21, %v3061_v23 }
 0x5fa   : > { %v3063_v34 = vmul.f32 %v3062_v35, %v2876_v54 }
 0x5fc   : > { %v3065_v46 = vsel %vm3064_vm11, %v2876_v54, %v3063_v34 }
 0x5fd   : > { %v3068_v37 = vsel %vm3066_vm13, %v3067_v57, %v3065_v46 }
 0x5fe   : > { %v3077_v5 = vpack.c.bf16 %v3068_v37, %v3056_v13  ;;  %v3224_v62 = vpop.f32.mrf.mxu0 }
 0x600   : > { %5447 = vmatmul.msk.bf16.gmra.mxu1 %vm832_vm2, %v3077_v5 }
 0x606   : > { %v3227_v60 = vpop.f32.mrf.mxu0 }
 0x60d   : > { %v3115_v9 = vpop.f32.mrf.mxu1 }
 0x60e   : > { %v3156_v35 = vadd.f32 %v7703_v3, %v3115_v9  ;;  %v3229_v13 = vpop.f32.mrf.mxu0 }
 0x610   : > { %v7706_v22 = vadd.f32 %v3217_v63, %v3156_v35  ;;  %5456 = vmatmul.msk.bf16.vlgmr.msra.gmra.mxu1 %vm832_vm2, %v8808_v15 }
 0x612   : > { %8807 = vst [vmem:[#allocation19_spill] sm:$0xff] %v7706_v22  ;;  %v5480_v54 = vmul.f32 -1.442695, %v7706_v22 }
 0x614   : > { %5998 = vpow2.f32 %v5480_v54 }
 0x615   : > { %v3117_v21 = vpop.f32.mrf.mxu1 }
 0x616   : > { %v3157_v8 = vadd.f32 %v7703_v3, %v3117_v21  ;;  %v3232_v29 = vpop.f32.mrf.mxu0 }
 0x618   : > { %v7718_v63 = vadd.f32 %v3219_v47, %v3157_v8 }
 0x61a   : > { %8809 = vst [vmem:[#allocation20_spill] sm:$0xff] %v7718_v63  ;;  %v5999_v6 = vpop.eup %5998  ;;  %v5481_v20 = vmul.f32 -1.442695, %v7718_v63 }
 0x61b   : > { %v3550_v10 = vadd.f32 1.0, %v5999_v6 }
 0x61c   : > { %6000 = vpow2.f32 %v5481_v20 }
 0x61d   : > { %6002 = vrcp.f32 %v3550_v10  ;;  %v3120_v23 = vpop.f32.mrf.mxu1  ;;  %vm3571_vm15 = vweird.f32 %v3550_v10 }
 0x61e   : > { %v3158_v39 = vadd.f32 %v7703_v3, %v3120_v23 }
 0x620   : > { %v7722_v34 = vadd.f32 %v3222_v19, %v3158_v39  ;;  %5457 = vmatmul.msk.bf16.gmra.mxu1 %vm832_vm2, %v8811_v40  ;;  %v3577_v40 = vand.u32 2147483648, %v3550_v10 }
 0x622   : > { %8810 = vst [vmem:[#allocation21_spill] sm:$0xff] %v7722_v34  ;;  %v6001_v57 = vpop.eup %6000  ;;  %v5482_v47 = vmul.f32 -1.442695, %v7722_v34 }
 0x623   : > { %v6003_v46 = vpop.eup %6002  ;;  %v3551_v37 = vadd.f32 1.0, %v6001_v57 }
 0x624   : > { %v3567_v5 = vmul.f32 %v6003_v46, %v3550_v10  ;;  %6004 = vpow2.f32 %v5482_v47  ;;  %vm3572_vm14 = vweird.f32 %v6003_v46 }
 0x625   : > { %6006 = vrcp.f32 %v3551_v37  ;;  %v3122_v9 = vpop.f32.mrf.mxu1  ;;  %v3592_v57 = vand.u32 2147483648, %v3551_v37  ;;  %vm7743_vm3 = vmor %vm3571_vm15, %vm3572_vm14  ;;  %vm3586_vm4 = vweird.f32 %v3551_v37 }
 0x626   : > { %v3568_v35 = vsub.f32 1.0, %v3567_v5  ;;  %v3159_v15 = vadd.f32 %v7703_v3, %v3122_v9  ;;  %v3590_v5 = vand.u32 2147483647, %v3551_v37 }
 0x628   : > { %v7730_v19 = vadd.f32 %v3224_v62, %v3159_v15  ;;  %v3569_v21 = vmul.f32 %v6003_v46, %v3568_v35  ;;  %v3575_v62 = vand.u32 2147483647, %v3550_v10  ;;  %v8814_v35 = vpack.c.bf16 %v7310_v42, %v7304_v30  ;;  %v3234_v15 = vpop.f32.mrf.mxu0 }
 0x629   : > { %v3593_v30 = vor.u32 1.1754944e-38, %v3592_v57  ;;  %vm3591_vm8 = vcmp.eq.f32.partialorder %v3590_v5, 8.507059e+37 }
 0x62a   : > { %8812 = vst [vmem:[#allocation22_spill] sm:$0xff] %v7730_v19  ;;  %v6005_v54 = vpop.eup %6004  ;;  %v5483_v41 = vmul.f32 -1.442695, %v7730_v19  ;;  %v3570_v20 = vadd.f32 %v6003_v46, %v3569_v21  ;;  %vm3576_vm5 = vcmp.eq.f32.partialorder %v3575_v62, 8.507059e+37 }
 0x62b   : > { %v6007_v59 = vpop.eup %6006  ;;  %v7733_v1 = vadd.f32 1.0, %v6005_v54 }
 0x62c   : > { %v3582_v8 = vmul.f32 %v6007_v59, %v3551_v37  ;;  %6008 = vpow2.f32 %v5483_v41  ;;  %vm3587_vm0 = vweird.f32 %v6007_v59  ;;  %v3574_v41 = vsel %vm7743_vm3, %v6003_v46, %v3570_v20 }
 0x62d   : > { %6010 = vrcp.f32 %v7733_v1  ;;  %v3125_v6 = vpop.f32.mrf.mxu1  ;;  %vm3588_vm7 = vmor %vm3586_vm4, %vm3587_vm0  ;;  %vm3601_vm11 = vweird.f32 %v7733_v1 }
 0x62e   : > { %v3583_v23 = vsub.f32 1.0, %v3582_v8  ;;  %v3160_v39 = vadd.f32 %v7703_v3, %v3125_v6 }
 0x630   : > { %v3584_v47 = vmul.f32 %v6007_v59, %v3583_v23  ;;  %v7737_v9 = vadd.f32 %v3227_v60, %v3160_v39  ;;  %5458 = vmatmul.msk.bf16.gmra.mxu1 %vm832_vm2, %v8814_v35  ;;  %v3578_v60 = vor.u32 1.1754944e-38, %v3577_v40 }
 0x632   : > { %8813 = vst [vmem:[#allocation23_spill] sm:$0xff] %v7737_v9  ;;  %v6009_v54 = vpop.eup %6008  ;;  %v3585_v21 = vadd.f32 %v6007_v59, %v3584_v47  ;;  %v5484_v10 = vmul.f32 -1.442695, %v7737_v9  ;;  %v3579_v39 = vsel %vm3576_vm5, %v3578_v60, %v3574_v41 }
 0x633   : > { %v7750_v8 = vpop.eup %6010  ;;  %v3553_v42 = vadd.f32 1.0, %v6009_v54 }
 0x634   : > { %v3597_v6 = vmul.f32 %v7750_v8, %v7733_v1  ;;  %6012 = vpow2.f32 %v5484_v10  ;;  %v3589_v23 = vsel %vm3588_vm7, %v6007_v59, %v3585_v21  ;;  %vm3602_vm10 = vweird.f32 %v7750_v8 }
 0x635   : > { %6014 = vrcp.f32 %v3553_v42  ;;  %v3127_v37 = vpop.f32.mrf.mxu1  ;;  %v3594_v47 = vsel %vm3591_vm8, %v3593_v30, %v3589_v23  ;;  %v3605_v30 = vand.u32 2147483647, %v7733_v1  ;;  %v3622_v23 = vand.u32 2147483648, %v3553_v42  ;;  %vm7775_vm13 = vmor %vm3601_vm11, %vm3602_vm10 }
 0x636   : > { %v3161_v35 = vadd.f32 %v7703_v3, %v3127_v37  ;;  %v3806_v46 = vpack.c.bf16 %v3594_v47, %v3579_v39  ;;  %v3598_v20 = vsub.f32 1.0, %v3597_v6  ;;  %v3607_v6 = vand.u32 2147483648, %v7733_v1 }
 0x637   : > { %v8819_v39 = vpack.c.bf16 %v7320_v48, %v7314_v43  ;;  %vm3616_vm14 = vweird.f32 %v3553_v42  ;;  %vm3606_vm15 = vcmp.eq.f32.partialorder %v3605_v30, 8.507059e+37 }
 0x638   : > { %v7755_v62 = vadd.f32 %v3229_v13, %v3161_v35  ;;  %5496 = vmatmul.msk.bf16.vlgmr.msra.gmra.mxu3 %vm1470_vm9, %v3806_v46  ;;  %v3599_v54 = vmul.f32 %v7750_v8, %v3598_v20  ;;  %v3620_v35 = vand.u32 2147483647, %v3553_v42  ;;  %v3237_v46 = vpop.f32.mrf.mxu0 }
 0x63a   : > { %8817 = vst [vmem:[#allocation24_spill] sm:$0xff] %v7755_v62  ;;  %v6013_v40 = vpop.eup %6012  ;;  %v5485_v57 = vmul.f32 -1.442695, %v7755_v62  ;;  %v3600_v13 = vadd.f32 %v7750_v8, %v3599_v54  ;;  %v3608_v54 = vor.u32 1.1754944e-38, %v3607_v6  ;;  %vm3621_vm3 = vcmp.eq.f32.partialorder %v3620_v35, 8.507059e+37 }
 0x63b   : > { %v6015_v59 = vpop.eup %6014  ;;  %v7760_v5 = vadd.f32 1.0, %v6013_v40 }
 0x63c   : > { %6016 = vpow2.f32 %v5485_v57  ;;  %v3612_v21 = vmul.f32 %v6015_v59, %v3553_v42  ;;  %vm3617_vm12 = vweird.f32 %v6015_v59  ;;  %v3604_v1 = vsel %vm7775_vm13, %v7750_v8, %v3600_v13 }
 0x63d   : > { %6018 = vrcp.f32 %v7760_v5  ;;  %v3130_v10 = vpop.f32.mrf.mxu1  ;;  %vm3618_vm0 = vmor %vm3616_vm14, %vm3617_vm12  ;;  %vm3631_vm5 = vweird.f32 %v7760_v5 }
 0x63e   : > { %v3162_v41 = vadd.f32 %v7703_v3, %v3130_v10  ;;  %v3613_v60 = vsub.f32 1.0, %v3612_v21  ;;  %v3623_v21 = vor.u32 1.1754944e-38, %v3622_v23 }
 0x640   : > { %v7769_v37 = vadd.f32 %v3232_v29, %v3162_v41  ;;  %5459 = vmatmul.msk.bf16.gmra.mxu1 %vm832_vm2, %v8819_v39  ;;  %v3614_v47 = vmul.f32 %v6015_v59, %v3613_v60  ;;  %v3609_v39 = vsel %vm3606_vm15, %v3608_v54, %v3604_v1 }
 0x642   : > { %8818 = vst [vmem:[#allocation25_spill] sm:$0xff] %v7769_v37  ;;  %v6017_v40 = vpop.eup %6016  ;;  %v5486_v57 = vmul.f32 -1.442695, %v7769_v37  ;;  %v3615_v29 = vadd.f32 %v6015_v59, %v3614_v47 }
 0x643   : > { %v7783_v43 = vpop.eup %6018  ;;  %v3555_v48 = vadd.f32 1.0, %v6017_v40 }
 0x644   : > { %v3627_v10 = vmul.f32 %v7783_v43, %v7760_v5  ;;  %6020 = vpow2.f32 %v5486_v57  ;;  %v3619_v41 = vsel %vm3618_vm0, %v6015_v59, %v3615_v29  ;;  %v3239_v59 = vpop.f32.mrf.mxu0  ;;  %vm3632_vm4 = vweird.f32 %v7783_v43 }
 0x645   : > { %6022 = vrcp.f32 %v3555_v48  ;;  %v3132_v60 = vpop.f32.mrf.mxu1  ;;  %v3624_v20 = vsel %vm3621_vm3, %v3623_v21, %v3619_v41  ;;  %v3635_v21 = vand.u32 2147483647, %v7760_v5  ;;  %v3652_v41 = vand.u32 2147483648, %v3555_v48  ;;  %vm7808_vm8 = vmor %vm3631_vm5, %vm3632_vm4 }
 0x646   : > { %v3163_v8 = vadd.f32 %v7703_v3, %v3132_v60  ;;  %v3807_v42 = vpack.c.bf16 %v3624_v20, %v3609_v39  ;;  %v3628_v13 = vsub.f32 1.0, %v3627_v10  ;;  %v3637_v10 = vand.u32 2147483648, %v7760_v5 }
 0x647   : > { %v8824_v39 = vpack.c.bf16 %v7330_v0, %v7324_v33  ;;  %vm3646_vm10 = vweird.f32 %v3555_v48  ;;  %vm3636_vm11 = vcmp.eq.f32.partialorder %v3635_v21, 8.507059e+37 }
 0x648   : > { %v7788_v47 = vadd.f32 %v3234_v15, %v3163_v8  ;;  %5497 = vmatmul.msk.bf16.gmra.mxu3 %vm1470_vm9, %v3807_v42  ;;  %v3629_v23 = vmul.f32 %v7783_v43, %v3628_v13  ;;  %v3650_v8 = vand.u32 2147483647, %v3555_v48  ;;  %v3638_v0 = vor.u32 1.1754944e-38, %v3637_v10 }
 0x64a   : > { %8822 = vst [vmem:[#allocation26_spill] sm:$0xff] %v7788_v47  ;;  %v6021_v30 = vpop.eup %6020  ;;  %v5487_v6 = vmul.f32 -1.442695, %v7788_v47  ;;  %v3630_v15 = vadd.f32 %v7783_v43, %v3629_v23  ;;  %v3653_v23 = vor.u32 1.1754944e-38, %v3652_v41  ;;  %vm3651_vm13 = vcmp.eq.f32.partialorder %v3650_v8, 8.507059e+37 }
 0x64b   : > { %v6023_v40 = vpop.eup %6022  ;;  %v7793_v35 = vadd.f32 1.0, %v6021_v30 }
 0x64c   : > { %6024 = vpow2.f32 %v5487_v6  ;;  %v3642_v57 = vmul.f32 %v6023_v40, %v3555_v48  ;;  %vm3647_vm7 = vweird.f32 %v6023_v40  ;;  %v3634_v5 = vsel %vm7808_vm8, %v7783_v43, %v3630_v15 }
 0x64d   : > { %6026 = vrcp.f32 %v7793_v35  ;;  %v3135_v1 = vpop.f32.mrf.mxu1  ;;  %vm3648_vm12 = vmor %vm3646_vm10, %vm3647_vm7  ;;  %vm3661_vm15 = vweird.f32 %v7793_v35 }
 0x64e   : > { %v3164_v29 = vadd.f32 %v7703_v3, %v3135_v1  ;;  %v3643_v54 = vsub.f32 1.0, %v3642_v57 }
 0x650   : > { %v7802_v60 = vadd.f32 %v3237_v46, %v3164_v29  ;;  %5460 = vmatmul.msk.bf16.gmra.mxu1 %vm832_vm2, %v8824_v39  ;;  %v3644_v20 = vmul.f32 %v6023_v40, %v3643_v54  ;;  %v3242_v29 = vpop.f32.mrf.mxu0  ;;  %v3639_v39 = vsel %vm3636_vm11, %v3638_v0, %v3634_v5 }
 0x652   : > { %8823 = vst [vmem:[#allocation27_spill] sm:$0xff] %v7802_v60  ;;  %v6025_v13 = vpop.eup %6024  ;;  %v5488_v30 = vmul.f32 -1.442695, %v7802_v60  ;;  %v3645_v46 = vadd.f32 %v6023_v40, %v3644_v20 }
 0x653   : > { %v7816_v6 = vpop.eup %6026  ;;  %v3557_v33 = vadd.f32 1.0, %v6025_v13 }
 0x654   : > { %v3657_v57 = vmul.f32 %v7816_v6, %v7793_v35  ;;  %6028 = vpow2.f32 %v5488_v30  ;;  %v3649_v1 = vsel %vm3648_vm12, %v6023_v40, %v3645_v46  ;;  %vm3662_vm14 = vweird.f32 %v7816_v6 }
 0x655   : > { %6030 = vrcp.f32 %v3557_v33  ;;  %v3137_v54 = vpop.f32.mrf.mxu1  ;;  %v3654_v43 = vsel %vm3651_vm13, %v3653_v23, %v3649_v1  ;;  %v3665_v23 = vand.u32 2147483647, %v7793_v35  ;;  %v3682_v1 = vand.u32 2147483648, %v3557_v33  ;;  %vm7841_vm3 = vmor %vm3661_vm15, %vm3662_vm14 }
 0x656   : > { %v3165_v48 = vadd.f32 %v7703_v3, %v3137_v54  ;;  %v3808_v15 = vpack.c.bf16 %v3654_v43, %v3639_v39  ;;  %v3658_v20 = vsub.f32 1.0, %v3657_v57  ;;  %v3667_v57 = vand.u32 2147483648, %v7793_v35 }
 0x657   : > { %v8829_v39 = vpack.c.bf16 %v7340_v2, %v7338_v28  ;;  %vm3676_vm4 = vweird.f32 %v3557_v33  ;;  %vm3666_vm5 = vcmp.eq.f32.partialorder %v3665_v23, 8.507059e+37 }
 0x658   : > { %v7821_v42 = vadd.f32 %v3239_v59, %v3165_v48  ;;  %5498 = vmatmul.msk.bf16.gmra.mxu3 %vm1470_vm9, %v3808_v15  ;;  %v3659_v41 = vmul.f32 %v7816_v6, %v3658_v20  ;;  %v3244_v0 = vpop.f32.mrf.mxu0  ;;  %v3680_v48 = vand.u32 2147483647, %v3557_v33  ;;  %v3668_v2 = vor.u32 1.1754944e-38, %v3667_v57 }
 0x65a   : > { %8827 = vst [vmem:[#allocation28_spill] sm:$0xff] %v7821_v42  ;;  %v6029_v21 = vpop.eup %6028  ;;  %v5489_v10 = vmul.f32 -1.442695, %v7821_v42  ;;  %v3660_v59 = vadd.f32 %v7816_v6, %v3659_v41  ;;  %v3683_v41 = vor.u32 1.1754944e-38, %v3682_v1  ;;  %vm3681_vm8 = vcmp.eq.f32.partialorder %v3680_v48, 8.507059e+37  ;;  %v8863_v42 = vld [vmem:[#allocation14_spill] sm:$0xff] }
 0x65b   : > { %v6031_v40 = vpop.eup %6030  ;;  %v7826_v8 = vadd.f32 1.0, %v6029_v21 }
 0x65c   : > { %6032 = vpow2.f32 %v5489_v10  ;;  %v3672_v13 = vmul.f32 %v6031_v40, %v3557_v33  ;;  %vm3677_vm0 = vweird.f32 %v6031_v40  ;;  %v3664_v35 = vsel %vm7841_vm3, %v7816_v6, %v3660_v59 }
 0x65d   : > { %6034 = vrcp.f32 %v7826_v8  ;;  %v3140_v30 = vpop.f32.mrf.mxu1  ;;  %vm3678_vm7 = vmor %vm3676_vm4, %vm3677_vm0  ;;  %vm3691_vm11 = vweird.f32 %v7826_v8 }
 0x65e   : > { %v3166_v5 = vadd.f32 %v7703_v3, %v3140_v30  ;;  %v3673_v46 = vsub.f32 1.0, %v3672_v13 }
 0x660   : > { %v7835_v54 = vadd.f32 %v3242_v29, %v3166_v5  ;;  %5461 = vmatmul.msk.bf16.gmra.mxu1 %vm832_vm2, %v8829_v39  ;;  %v3674_v43 = vmul.f32 %v6031_v40, %v3673_v46  ;;  %v3669_v46 = vsel %vm3666_vm5, %v3668_v2, %v3664_v35  ;;  %v3247_v23 = vpop.f32.mrf.mxu0  ;;  %v3695_v2 = vand.u32 2147483647, %v7826_v8 }
 0x662   : > { %8828 = vst [vmem:[#allocation29_spill] sm:$0xff] %v7835_v54  ;;  %v6033_v20 = vpop.eup %6032  ;;  %v5490_v21 = vmul.f32 -1.442695, %v7835_v54  ;;  %v3675_v29 = vadd.f32 %v6031_v40, %v3674_v43  ;;  %vm3696_vm15 = vcmp.eq.f32.partialorder %v3695_v2, 8.507059e+37 }
 0x663   : > { %v7849_v10 = vpop.eup %6034  ;;  %v3559_v28 = vadd.f32 1.0, %v6033_v20 }
 0x664   : > { %v3687_v13 = vmul.f32 %v7849_v10, %v7826_v8  ;;  %6036 = vpow2.f32 %v5490_v21  ;;  %v3679_v30 = vsel %vm3678_vm7, %v6031_v40, %v3675_v29  ;;  %vm3692_vm10 = vweird.f32 %v7849_v10 }
 0x665   : > { %6038 = vrcp.f32 %v3559_v28  ;;  %v3142_v5 = vpop.f32.mrf.mxu1  ;;  %v3684_v39 = vsel %vm3681_vm8, %v3683_v41, %v3679_v30  ;;  %v3697_v41 = vand.u32 2147483648, %v7826_v8  ;;  %vm7874_vm13 = vmor %vm3691_vm11, %vm3692_vm10  ;;  %vm3706_vm14 = vweird.f32 %v3559_v28 }
 0x666   : > { %v3167_v6 = vadd.f32 %v7703_v3, %v3142_v5  ;;  %v3809_v33 = vpack.c.bf16 %v3684_v39, %v3669_v46  ;;  %v3688_v59 = vsub.f32 1.0, %v3687_v13  ;;  %v3712_v13 = vand.u32 2147483648, %v3559_v28 }
 0x667   : > { %v8834_v5 = vpack.c.bf16 %v7347_v53, %v7345_v12  ;;  %v3710_v39 = vand.u32 2147483647, %v3559_v28 }
 0x668   : > { %v7854_v43 = vadd.f32 %v3244_v0, %v3167_v6  ;;  %5499 = vmatmul.msk.bf16.gmra.mxu3 %vm1470_vm9, %v3809_v33  ;;  %v3689_v15 = vmul.f32 %v7849_v10, %v3688_v59  ;;  %v3249_v12 = vpop.f32.mrf.mxu0 }
 0x669   : > { %vm3711_vm3 = vcmp.eq.f32.partialorder %v3710_v39, 8.507059e+37 }
 0x66a   : > { %8832 = vst [vmem:[#allocation30_spill] sm:$0xff] %v7854_v43  ;;  %v6037_v57 = vpop.eup %6036  ;;  %v5491_v1 = vmul.f32 -1.442695, %v7854_v43  ;;  %v3690_v0 = vadd.f32 %v7849_v10, %v3689_v15  ;;  %v3713_v15 = vor.u32 1.1754944e-38, %v3712_v13 }
 0x66b   : > { %v6039_v40 = vpop.eup %6038  ;;  %v7859_v48 = vadd.f32 1.0, %v6037_v57 }
 0x66c   : > { %6040 = vpow2.f32 %v5491_v1  ;;  %v3702_v20 = vmul.f32 %v6039_v40, %v3559_v28  ;;  %vm3707_vm12 = vweird.f32 %v6039_v40  ;;  %v3694_v8 = vsel %vm7874_vm13, %v7849_v10, %v3690_v0 }
 0x66d   : > { %6042 = vrcp.f32 %v7859_v48  ;;  %v3145_v21 = vpop.f32.mrf.mxu1  ;;  %v3698_v1 = vor.u32 1.1754944e-38, %v3697_v41  ;;  %vm3708_vm0 = vmor %vm3706_vm14, %vm3707_vm12  ;;  %vm3721_vm5 = vweird.f32 %v7859_v48 }
 0x66e   : > { %v3168_v35 = vadd.f32 %v7703_v3, %v3145_v21  ;;  %v3703_v29 = vsub.f32 1.0, %v3702_v20 }
 0x670   : > { %v7868_v30 = vadd.f32 %v3247_v23, %v3168_v35  ;;  %5462 = vmatmul.msk.bf16.gmra.mxu1 %vm832_vm2, %v8834_v5  ;;  %v3704_v46 = vmul.f32 %v6039_v40, %v3703_v29  ;;  %v3699_v29 = vsel %vm3696_vm15, %v3698_v1, %v3694_v8  ;;  %v3725_v1 = vand.u32 2147483647, %v7859_v48 }
 0x672   : > { %8833 = vst [vmem:[#allocation31_spill] sm:$0xff] %v7868_v30  ;;  %v6041_v33 = vpop.eup %6040  ;;  %v5492_v59 = vmul.f32 -1.442695, %v7868_v30  ;;  %v3705_v23 = vadd.f32 %v6039_v40, %v3704_v46  ;;  %vm3726_vm11 = vcmp.eq.f32.partialorder %v3725_v1, 8.507059e+37 }
 0x673   : > { %v7882_v57 = vpop.eup %6042  ;;  %v3561_v53 = vadd.f32 1.0, %v6041_v33  ;;  %v3252_v33 = vpop.f32.mrf.mxu0 }
 0x674   : > { %v3717_v20 = vmul.f32 %v7882_v57, %v7859_v48  ;;  %6044 = vpow2.f32 %v5492_v59  ;;  %v3709_v21 = vsel %vm3708_vm0, %v6039_v40, %v3705_v23  ;;  %vm3722_vm4 = vweird.f32 %v7882_v57 }
 0x675   : > { %6046 = vrcp.f32 %v3561_v53  ;;  %v3147_v35 = vpop.f32.mrf.mxu1  ;;  %v3714_v10 = vsel %vm3711_vm3, %v3713_v15, %v3709_v21  ;;  %v3727_v15 = vand.u32 2147483648, %v7859_v48  ;;  %vm7907_vm8 = vmor %vm3721_vm5, %vm3722_vm4  ;;  %vm3736_vm10 = vweird.f32 %v3561_v53 }
 0x676   : > { %v3169_v28 = vadd.f32 %v7703_v3, %v3147_v35  ;;  %v3810_v0 = vpack.c.bf16 %v3714_v10, %v3699_v29  ;;  %v3718_v5 = vsub.f32 1.0, %v3717_v20  ;;  %v3742_v20 = vand.u32 2147483648, %v3561_v53 }
 0x677   : > { %v8839_v35 = vpack.c.bf16 %v7354_v51, %v7352_v44  ;;  %v3740_v10 = vand.u32 2147483647, %v3561_v53  ;;  %v3728_v51 = vor.u32 1.1754944e-38, %v3727_v15 }
 0x678   : > { %v7887_v46 = vadd.f32 %v3249_v12, %v3169_v28  ;;  %5500 = vmatmul.msk.bf16.gmra.mxu3 %vm1470_vm9, %v3810_v0  ;;  %v3719_v13 = vmul.f32 %v7882_v57, %v3718_v5 }
 0x679   : > { %vm3741_vm13 = vcmp.eq.f32.partialorder %v3740_v10, 8.507059e+37 }
 0x67a   : > { %8837 = vst [vmem:[#allocation32_spill] sm:$0xff] %v7887_v46  ;;  %v6045_v2 = vpop.eup %6044  ;;  %v5493_v41 = vmul.f32 -1.442695, %v7887_v46  ;;  %v3720_v23 = vadd.f32 %v7882_v57, %v3719_v13  ;;  %v3743_v13 = vor.u32 1.1754944e-38, %v3742_v20 }
 0x67b   : > { %v6047_v6 = vpop.eup %6046  ;;  %v7892_v40 = vadd.f32 1.0, %v6045_v2 }
 0x67c   : > { %6048 = vpow2.f32 %v5493_v41  ;;  %v3732_v39 = vmul.f32 %v6047_v6, %v3561_v53  ;;  %vm3737_vm7 = vweird.f32 %v6047_v6  ;;  %v3724_v48 = vsel %vm7907_vm8, %v7882_v57, %v3720_v23  ;;  %v3254_v53 = vpop.f32.mrf.mxu0 }
 0x67d   : > { %6050 = vrcp.f32 %v7892_v40  ;;  %v3150_v59 = vpop.f32.mrf.mxu1  ;;  %vm3738_vm12 = vmor %vm3736_vm10, %vm3737_vm7  ;;  %vm3751_vm15 = vweird.f32 %v7892_v40 }
 0x67e   : > { %v3170_v8 = vadd.f32 %v7703_v3, %v3150_v59  ;;  %v3733_v12 = vsub.f32 1.0, %v3732_v39 }
 0x680   : > { %v7901_v21 = vadd.f32 %v3252_v33, %v3170_v8  ;;  %5463 = vmatmul.msk.bf16.gmra.mxu1 %vm832_vm2, %v8839_v35  ;;  %v3734_v29 = vmul.f32 %v6047_v6, %v3733_v12  ;;  %v3729_v8 = vsel %vm3726_vm11, %v3728_v51, %v3724_v48  ;;  %v3757_v48 = vand.u32 2147483648, %v7892_v40 }
 0x681   : > { %v8844_v51 = vpack.c.bf16 %v7370_v38, %v7362_v50 }
 0x682   : > { %8838 = vst [vmem:[#allocation33_spill] sm:$0xff] %v7901_v21  ;;  %v6049_v0 = vpop.eup %6048  ;;  %v5494_v5 = vmul.f32 -1.442695, %v7901_v21  ;;  %v3735_v2 = vadd.f32 %v6047_v6, %v3734_v29  ;;  %v3758_v50 = vor.u32 1.1754944e-38, %v3757_v48 }
 0x683   : > { %v6051_v41 = vpop.eup %6050  ;;  %v3563_v44 = vadd.f32 1.0, %v6049_v0 }
 0x684   : > { %v3747_v39 = vmul.f32 %v6051_v41, %v7892_v40  ;;  %6052 = vpow2.f32 %v5494_v5  ;;  %v3739_v33 = vsel %vm3738_vm12, %v6047_v6, %v3735_v2  ;;  %vm3752_vm14 = vweird.f32 %v6051_v41 }
 0x685   : > { %6054 = vrcp.f32 %v3563_v44  ;;  %v3152_v59 = vpop.f32.mrf.mxu1  ;;  %v3744_v12 = vsel %vm3741_vm13, %v3743_v13, %v3739_v33  ;;  %v3772_v2 = vand.u32 2147483648, %v3563_v44  ;;  %v3755_v13 = vand.u32 2147483647, %v7892_v40  ;;  %vm7930_vm3 = vmor %vm3751_vm15, %vm3752_vm14 }
 0x686   : > { %v3171_v35 = vadd.f32 %v7703_v3, %v3152_v59  ;;  %v3811_v57 = vpack.c.bf16 %v3744_v12, %v3729_v8  ;;  %v3748_v23 = vsub.f32 1.0, %v3747_v39  ;;  %v3770_v33 = vand.u32 2147483647, %v3563_v44 }
 0x687   : > { %vm3766_vm4 = vweird.f32 %v3563_v44  ;;  %v3773_v38 = vor.u32 1.1754944e-38, %v3772_v2  ;;  %vm3756_vm7 = vcmp.eq.f32.partialorder %v3755_v13, 8.507059e+37 }
 0x688   : > { %v7917_v29 = vadd.f32 %v3254_v53, %v3171_v35  ;;  %5501 = vmatmul.msk.bf16.gmra.mxu3 %vm1470_vm9, %v3811_v57  ;;  %v3749_v20 = vmul.f32 %v6051_v41, %v3748_v23  ;;  %vm3771_vm8 = vcmp.eq.f32.partialorder %v3770_v33, 8.507059e+37 }
 0x68a   : > { %8842 = vst [vmem:[#allocation34_spill] sm:$0xff] %v7917_v29  ;;  %v6053_v1 = vpop.eup %6052  ;;  %v5495_v15 = vmul.f32 -1.442695, %v7917_v29  ;;  %v3750_v5 = vadd.f32 %v6051_v41, %v3749_v20 }
 0x68b   : > { %v6055_v28 = vpop.eup %6054  ;;  %v3564_v6 = vadd.f32 1.0, %v6053_v1 }
 0x68c   : > { %6056 = vpow2.f32 %v5495_v15  ;;  %v3762_v10 = vmul.f32 %v6055_v28, %v3563_v44  ;;  %vm3767_vm0 = vweird.f32 %v6055_v28  ;;  %v3754_v12 = vsel %vm7930_vm3, %v6051_v41, %v3750_v5 }
 0x68d   : > { %6058 = vrcp.f32 %v3564_v6  ;;  %v7921_v0 = vpop.f32.mrf.mxu1  ;;  %vm3768_vm5 = vmor %vm3766_vm4, %vm3767_vm0  ;;  %v3759_v15 = vsel %vm3756_vm7, %v3758_v50, %v3754_v12  ;;  %vm3781_vm11 = vweird.f32 %v3564_v6  ;;  %v3785_v33 = vand.u32 2147483647, %v3564_v6 }
 0x68e   : > { %8843 = vst [vmem:[#allocation35_spill] sm:$0xff] %v7921_v0  ;;  %v3763_v3 = vsub.f32 1.0, %v3762_v10 }
 0x68f   : > { %vm3786_vm0 = vcmp.eq.f32.partialorder %v3785_v33, 8.507059e+37 }
 0x690   : > { %5464 = vmatmul.msk.bf16.gmra.mxu1 %vm832_vm2, %v8844_v51  ;;  %v3764_v39 = vmul.f32 %v6055_v28, %v3763_v3 }
 0x692   : > { %v6057_v8 = vpop.eup %6056  ;;  %v3765_v35 = vadd.f32 %v6055_v28, %v3764_v39  ;;  %v8847_v39 = vpack.c.bf16 %v7392_v27, %v7384_v49 }
 0x693   : > { %v6059_v57 = vpop.eup %6058  ;;  %v3565_v23 = vadd.f32 1.0, %v6057_v8 }
 0x694   : > { %v3777_v53 = vmul.f32 %v6059_v57, %v3564_v6  ;;  %v3769_v40 = vsel %vm3768_vm5, %v6055_v28, %v3765_v35  ;;  %vm3782_vm10 = vweird.f32 %v6059_v57  ;;  %v3787_v28 = vand.u32 2147483648, %v3564_v6 }
 0x695   : > { %6060 = vrcp.f32 %v3565_v23  ;;  %v7936_v1 = vpop.f32.mrf.mxu1  ;;  %v3774_v20 = vsel %vm3771_vm8, %v3773_v38, %v3769_v40  ;;  %v3802_v13 = vand.u32 2147483648, %v3565_v23  ;;  %v3800_v8 = vand.u32 2147483647, %v3565_v23  ;;  %vm3783_vm13 = vmor %vm3781_vm11, %vm3782_vm10 }
 0x696   : > { %v3812_v10 = vpack.c.bf16 %v3774_v20, %v3759_v15  ;;  %v3778_v3 = vsub.f32 1.0, %v3777_v53  ;;  %vm3796_vm14 = vweird.f32 %v3565_v23  ;;  %v3788_v50 = vor.u32 1.1754944e-38, %v3787_v28 }
 0x697   : > { %v3803_v38 = vor.u32 1.1754944e-38, %v3802_v13  ;;  %vm3801_vm3 = vcmp.eq.f32.partialorder %v3800_v8, 8.507059e+37  ;;  %v8851_v13 = vpack.c.bf16 %v7480_v16, %v7472_v61  ;;  %v8852_v61 = vld [vmem:[#allocation10_spill] sm:$0xff] }
 0x698   : > { %5502 = vmatmul.msk.bf16.gmra.mxu3 %vm1470_vm9, %v3812_v10  ;;  %v3779_v41 = vmul.f32 %v6059_v57, %v3778_v3  ;;  %v8849_v3 = vpack.c.bf16 %v7436_v11, %v7428_v18  ;;  %v7975_v18 = vld [vmem:[%s8721_s6 + $0x3] ss:$0 sm:$0xff] }
 0x69a   : > { %v3780_v48 = vadd.f32 %v6059_v57, %v3779_v41 }
 0x69b   : > { %v6061_v44 = vpop.eup %6060 }
 0x69c   : > { %v3792_v5 = vmul.f32 %v6061_v44, %v3565_v23  ;;  %vm3797_vm12 = vweird.f32 %v6061_v44  ;;  %v3784_v12 = vsel %vm3783_vm13, %v6059_v57, %v3780_v48  ;;  %v8848_v57 = vpack.c.bf16 %v7414_v24, %v7406_v25 }
 0x69d   : > { %v7939_v51 = vpop.f32.mrf.mxu1  ;;  %vm3798_vm15 = vmor %vm3796_vm14, %vm3797_vm12  ;;  %v3789_v15 = vsel %vm3786_vm0, %v3788_v50, %v3784_v12  ;;  %v8850_v25 = vpack.c.bf16 %v7458_v32, %v7450_v26 }
 0x69e   : > { %v3793_v2 = vsub.f32 1.0, %v3792_v5 }
 0x6a0   : > { %5465 = vmatmul.msk.bf16.gmra.mxu1 %vm832_vm2, %v8847_v39  ;;  %v3794_v59 = vmul.f32 %v6061_v44, %v3793_v2 }
 0x6a2   : > { %v3795_v35 = vadd.f32 %v6061_v44, %v3794_v59 }
 0x6a4   : > { %v3799_v53 = vsel %vm3798_vm15, %v6061_v44, %v3795_v35 }
 0x6a5   : > { %v7945_v40 = vpop.f32.mrf.mxu1  ;;  %v3804_v49 = vsel %vm3801_vm3, %v3803_v38, %v3799_v53  ;;  %v8853_v38 = vpack.c.bf16 %v7502_v17, %v8852_v61  ;;  %v8854_v61 = vld [vmem:[#allocation11_spill] sm:$0xff] }
 0x6a6   : > { %v3813_v27 = vpack.c.bf16 %v3804_v49, %v3789_v15 }
 0x6a8   : > { %5503 = vmatmul.msk.bf16.gmra.mxu3 %vm1470_vm9, %v3813_v27 }
 0x6ad   : > { %v7948_v6 = vpop.f32.mrf.mxu1 }
 0x6b0   : > { %5466 = vmatmul.msk.bf16.gmra.mxu1 %vm832_vm2, %v8848_v57 }
 0x6b5   : > { %v7954_v23 = vpop.f32.mrf.mxu1 }
 0x6bb   : > { %v3853_v20 = vpop.f32.mrf.mxu3 }
 0x6bc   : > { %v3854_v26 = vadd.f32 %v7975_v18, %v3853_v20 }
 0x6bd   : > { %v7956_v10 = vpop.f32.mrf.mxu1 }
 0x6be   : > { %v5504_v33 = vmul.f32 -1.442695, %v3854_v26 }
 0x6c0   : > { %5467 = vmatmul.msk.bf16.gmra.mxu1 %vm832_vm2, %v8849_v3  ;;  %6062 = vpow2.f32 %v5504_v33 }
 0x6c3   : > { %v3855_v41 = vpop.f32.mrf.mxu3 }
 0x6c4   : > { %v3856_v39 = vadd.f32 %v7975_v18, %v3855_v41 }
 0x6c5   : > { %v7962_v44 = vpop.f32.mrf.mxu1 }
 0x6c6   : > { %v5505_v8 = vmul.f32 -1.442695, %v3856_v39  ;;  %v6063_v50 = vpop.eup %6062 }
 0x6c7   : > { %v7996_v15 = vadd.f32 1.0, %v6063_v50 }
 0x6c8   : > { %6064 = vpow2.f32 %v5505_v8 }
 0x6c9   : > { %6066 = vrcp.f32 %v7996_v15  ;;  %vm3962_vm5 = vweird.f32 %v7996_v15 }
 0x6cb   : > { %v3858_v5 = vpop.f32.mrf.mxu3 }
 0x6cc   : > { %v3859_v16 = vadd.f32 %v7975_v18, %v3858_v5 }
 0x6cd   : > { %v7964_v48 = vpop.f32.mrf.mxu1 }
 0x6ce   : > { %v6065_v53 = vpop.eup %6064  ;;  %v5506_v27 = vmul.f32 -1.442695, %v3859_v16 }
 0x6cf   : > { %v8001_v20 = vadd.f32 1.0, %v6065_v53  ;;  %v8007_v5 = vpop.eup %6066 }
 0x6d0   : > { %5468 = vmatmul.msk.bf16.gmra.mxu1 %vm832_vm2, %v8850_v25  ;;  %6068 = vpow2.f32 %v5506_v27  ;;  %v3958_v8 = vmul.f32 %v8007_v5, %v7996_v15  ;;  %vm3963_vm4 = vweird.f32 %v8007_v5 }
 0x6d1   : > { %6070 = vrcp.f32 %v8001_v20  ;;  %vm8058_vm8 = vmor %vm3962_vm5, %vm3963_vm4  ;;  %vm3977_vm10 = vweird.f32 %v8001_v20 }
 0x6d3   : > { %v3860_v24 = vpop.f32.mrf.mxu3 }
 0x6d4   : > { %v3861_v49 = vadd.f32 %v7975_v18, %v3860_v24 }
 0x6d5   : > { %v7970_v2 = vpop.f32.mrf.mxu1 }
 0x6d6   : > { %v5507_v41 = vmul.f32 -1.442695, %v3861_v49  ;;  %v6069_v24 = vpop.eup %6068 }
 0x6d7   : > { %v8013_v33 = vpop.eup %6070  ;;  %v8017_v16 = vadd.f32 1.0, %v6069_v24 }
 0x6d8   : > { %6072 = vpow2.f32 %v5507_v41  ;;  %vm3978_vm11 = vweird.f32 %v8013_v33 }
 0x6d9   : > { %v3998_v37 = vand.u32 2147483648, %v8017_v16  ;;  %vm8088_vm13 = vmor %vm3977_vm10, %vm3978_vm11  ;;  %vm3992_vm14 = vweird.f32 %v8017_v16 }
 0x6db   : > { %v3863_v28 = vpop.f32.mrf.mxu3 }
 0x6dc   : > { %v3864_v26 = vadd.f32 %v7975_v18, %v3863_v28  ;;  %v3973_v28 = vmul.f32 %v8013_v33, %v8001_v20 }
 0x6dd   : > { %v7977_v11 = vpop.f32.mrf.mxu1 }
 0x6de   : > { %v6073_v50 = vpop.eup %6072  ;;  %v5508_v49 = vmul.f32 -1.442695, %v3864_v26  ;;  %v3974_v26 = vsub.f32 1.0, %v3973_v28 }
 0x6df   : > { %v8026_v41 = vadd.f32 1.0, %v6073_v50 }
 0x6e0   : > { %5469 = vmatmul.msk.bf16.gmra.mxu1 %vm832_vm2, %v8851_v13 }
 0x6e1   : > { %vm4007_vm0 = vweird.f32 %v8026_v41 }
 0x6e3   : > { %v3865_v32 = vpop.f32.mrf.mxu3 }
 0x6e4   : > { %v3866_v27 = vadd.f32 %v7975_v18, %v3865_v32 }
 0x6e5   : > { %v7985_v59 = vpop.f32.mrf.mxu1 }
 0x6eb   : > { %v7987_v12 = vpop.f32.mrf.mxu3 }
 0x6ed   : > { %v7989_v35 = vpop.f32.mrf.mxu1 }
 0x6f0   : > { %5470 = vmatmul.msk.bf16.gmra.mxu1 %vm832_vm2, %v8853_v38  ;;  %v8855_v38 = vld [vmem:[#allocation12_spill] sm:$0xff] }
 0x6f1   : > { %v8856_v53 = vpack.c.bf16 %v8854_v61, %v8855_v38  ;;  %v5509_v61 = vmul.f32 -1.442695, %v3866_v27 }
 0x6f3   : > { %v7999_v57 = vpop.f32.mrf.mxu3 }
 0x6f5   : > { %v8003_v3 = vpop.f32.mrf.mxu1 }
 0x6fb   : > { %v3873_v17 = vpop.f32.mrf.mxu3 }
 0x6fc   : > { %v3874_v25 = vadd.f32 %v7975_v18, %v3873_v17 }
 0x6fd   : > { %v8010_v13 = vpop.f32.mrf.mxu1 }
 0x6fe   : > { %v5512_v39 = vmul.f32 -1.442695, %v3874_v25  ;;  %v3959_v25 = vsub.f32 1.0, %v3958_v8  ;;  %v3966_v8 = vand.u32 2147483647, %v7996_v15 }
 0x700   : > { %6074 = vpow2.f32 %v5512_v39  ;;  %5471 = vmatmul.msk.bf16.gmra.mxu1 %vm832_vm2, %v8856_v53  ;;  %v3960_v50 = vmul.f32 %v8007_v5, %v3959_v25  ;;  %v3968_v53 = vand.u32 2147483648, %v7996_v15  ;;  %vm8052_vm7 = vcmp.eq.f32.partialorder %v3966_v8, 8.507059e+37 }
 0x701   : > { %6076 = vrcp.f32 %v8017_v16 }
 0x702   : > { %6078 = vpow2.f32 %v5508_v49  ;;  %v3975_v49 = vmul.f32 %v8013_v33, %v3974_v26  ;;  %v3961_v28 = vadd.f32 %v8007_v5, %v3960_v50  ;;  %v3969_v50 = vor.u32 1.1754944e-38, %v3968_v53 }
 0x703   : > { %v3875_v17 = vpop.f32.mrf.mxu3  ;;  %6080 = vrcp.f32 %v8026_v41 }
 0x704   : > { %v3876_v24 = vadd.f32 %v7975_v18, %v3875_v17  ;;  %v3976_v62 = vadd.f32 %v8013_v33, %v3975_v49  ;;  %v3965_v53 = vsel %vm8058_vm8, %v8007_v5, %v3961_v28 }
 0x705   : > { %v8030_v39 = vpop.f32.mrf.mxu1 }
 0x706   : > { %v6075_v22 = vpop.eup %6074  ;;  %v5513_v38 = vmul.f32 -1.442695, %v3876_v24 }
 0x707   : > { %v8033_v32 = vadd.f32 1.0, %v6075_v22  ;;  %v8039_v17 = vpop.eup %6076  ;;  %v3981_v22 = vand.u32 2147483647, %v8001_v20 }
 0x708   : > { %6082 = vpow2.f32 %v5513_v38  ;;  %v6079_v25 = vpop.eup %6078  ;;  %v3983_v38 = vand.u32 2147483648, %v8001_v20  ;;  %v3988_v19 = vmul.f32 %v8039_v17, %v8017_v16  ;;  %v3980_v20 = vsel %vm8088_vm13, %v8013_v33, %v3976_v62 }
 0x709   : > { %6084 = vrcp.f32 %v8033_v32  ;;  %v8048_v63 = vpop.eup %6080  ;;  %vm8072_vm12 = vcmp.eq.f32.partialorder %v3981_v22, 8.507059e+37  ;;  %v8077_v49 = vadd.f32 1.0, %v6079_v25  ;;  %vm3993_vm15 = vweird.f32 %v8039_v17 }
 0x70a   : > { %6086 = vpow2.f32 %v5509_v61  ;;  %v3869_v61 = vadd.f32 %v7975_v18, %v7987_v12  ;;  %v3984_v15 = vor.u32 1.1754944e-38, %v3983_v38  ;;  %v3989_v22 = vsub.f32 1.0, %v3988_v19  ;;  %vm8160_vm8 = vmor %vm3992_vm14, %vm3993_vm15 }
 0x70b   : > { %v3878_v27 = vpop.f32.mrf.mxu3  ;;  %v4003_v25 = vmul.f32 %v8048_v63, %v8026_v41  ;;  %v3996_v19 = vand.u32 2147483647, %v8017_v16  ;;  %vm4082_vm4 = vweird.f32 %v8033_v32  ;;  %vm4008_vm11 = vweird.f32 %v8048_v63 }
 0x70c   : > { %v3879_v24 = vadd.f32 %v7975_v18, %v3878_v27  ;;  %v5510_v5 = vmul.f32 -1.442695, %v3869_v61  ;;  %v8115_v62 = vsel %vm8072_vm12, %v3984_v15, %v3980_v20  ;;  %vm8194_vm15 = vmor %vm4007_vm0, %vm4008_vm11 }
 0x70d   : > { %v3422_v26 = vpop.f32.mrf.mxu1  ;;  %v4004_v33 = vsub.f32 1.0, %v4003_v25  ;;  %vm8141_vm5 = vcmp.eq.f32.partialorder %v3996_v19, 8.507059e+37 }
 0x70e   : > { %v6083_v9 = vpop.eup %6082  ;;  %v5514_v27 = vmul.f32 -1.442695, %v3879_v24 }
 0x70f   : > { %v8065_v12 = vpop.eup %6084  ;;  %v8067_v8 = vadd.f32 1.0, %v6083_v9  ;;  %v8864_v9 = vld [vmem:[#allocation13_spill] sm:$0xff]  ;;  %v4005_v25 = vmul.f32 %v8048_v63, %v4004_v33  ;;  %v4013_v33 = vand.u32 2147483648, %v8026_v41 }
 0x710   : > { %v6087_v47 = vpop.eup %6086  ;;  %v4078_v60 = vmul.f32 %v8065_v12, %v8033_v32  ;;  %6088 = vpow2.f32 %v5514_v27  ;;  %v8865_v54 = vpack.c.bf16 %v8863_v42, %v8864_v9  ;;  %v3871_v27 = vadd.f32 %v7975_v18, %v7999_v57 }
 0x711   : > { %6090 = vrcp.f32 %v8067_v8  ;;  %v8103_v38 = vadd.f32 1.0, %v6087_v47  ;;  %v8107_v9 = vor.u32 1.1754944e-38, %v3998_v37  ;;  %v3990_v47 = vmul.f32 %v8039_v17, %v3989_v22 }
 0x712   : > { %5472 = vmatmul.msk.bf16.gmra.mxu1 %vm832_vm2, %v8865_v54  ;;  %v4079_v42 = vsub.f32 1.0, %v4078_v60  ;;  %v8098_v54 = vsel %vm8052_vm7, %v3969_v50, %v3965_v53  ;;  %6092 = vrcp.f32 %v8077_v49  ;;  %v5511_v37 = vmul.f32 -1.442695, %v3871_v27 }
 0x713   : > { %v3880_v61 = vpop.f32.mrf.mxu3  ;;  %6094 = vpow2.f32 %v5510_v5  ;;  %v8119_v53 = vmul.f32 %v8098_v54, %v3422_v26  ;;  %vm4083_vm3 = vweird.f32 %v8065_v12  ;;  %v3991_v22 = vadd.f32 %v8039_v17, %v3990_v47 }
 0x714   : > { %v3881_v60 = vadd.f32 %v7975_v18, %v3880_v61  ;;  %v4080_v34 = vmul.f32 %v8065_v12, %v4079_v42  ;;  %6096 = vrcp.f32 %v8103_v38  ;;  %v4088_v27 = vand.u32 2147483648, %v8033_v32  ;;  %vm8149_vm7 = vmor %vm4082_vm4, %vm4083_vm3 }
 0x715   : > { %v3424_v57 = vpop.f32.mrf.mxu1  ;;  %8868 = vst [vmem:[#allocation10_spill] sm:$0xff] %v8119_v53  ;;  %v4011_v47 = vand.u32 2147483647, %v8026_v41  ;;  %v4006_v29 = vadd.f32 %v8048_v63, %v4005_v25  ;;  %vm4097_vm13 = vweird.f32 %v8067_v8  ;;  %vm4022_vm4 = vweird.f32 %v8077_v49 }
 0x716   : > { %v6089_v50 = vpop.eup %6088  ;;  %v5515_v28 = vmul.f32 -1.442695, %v3881_v60  ;;  %v8122_v61 = vmul.f32 %v8115_v62, %v3424_v57  ;;  %v4081_v15 = vadd.f32 %v8065_v12, %v4080_v34  ;;  %v4086_v60 = vand.u32 2147483647, %v8033_v32 }
 0x717   : > { %v6091_v43 = vpop.eup %6090  ;;  %v8125_v5 = vadd.f32 1.0, %v6089_v50  ;;  %v4103_v32 = vand.u32 2147483648, %v8067_v8  ;;  %v4089_v16 = vor.u32 1.1754944e-38, %v4088_v27  ;;  %vm4012_vm0 = vcmp.eq.f32.partialorder %v4011_v47, 8.507059e+37 }
 0x718   : > { %8869 = vst [vmem:[#allocation11_spill] sm:$0xff] %v8122_v61  ;;  %v4093_v24 = vmul.f32 %v6091_v43, %v8067_v8  ;;  %6098 = vpow2.f32 %v5515_v28  ;;  %v8137_v42 = vpop.eup %6092  ;;  %v4085_v26 = vsel %vm8149_vm7, %v8065_v12, %v4081_v15  ;;  %vm4098_vm10 = vweird.f32 %v6091_v43 }
 0x719   : > { %6100 = vrcp.f32 %v8125_v5  ;;  %v6095_v57 = vpop.eup %6094  ;;  %vm4087_vm12 = vcmp.eq.f32.partialorder %v4086_v60, 8.507059e+37  ;;  %vm4099_vm14 = vmor %vm4097_vm13, %vm4098_vm10  ;;  %v8877_v60 = vld [vmem:[#allocation15_spill] sm:$0xff]  ;;  %vm4023_vm7 = vweird.f32 %v8137_v42  ;;  %vm4112_vm10 = vweird.f32 %v8125_v5 }
 0x71a   : > { %6102 = vpow2.f32 %v5511_v37  ;;  %v4094_v20 = vsub.f32 1.0, %v4093_v24  ;;  %v4101_v37 = vand.u32 2147483647, %v8067_v8  ;;  %v8167_v46 = vpop.eup %6096 }
 0x71b   : > { %v3883_v50 = vpop.f32.mrf.mxu3  ;;  %vm4038_vm13 = vweird.f32 %v8167_v46 }
 0x71c   : > { %v3884_v24 = vadd.f32 %v7975_v18, %v3883_v50  ;;  %v4095_v30 = vmul.f32 %v6091_v43, %v4094_v20  ;;  %v3995_v50 = vsel %vm8160_vm8, %v8039_v17, %v3991_v22  ;;  %v8179_v20 = vsel %vm4087_vm12, %v4089_v16, %v4085_v26 }
 0x71d   : > { %v3427_v21 = vpop.f32.mrf.mxu1  ;;  %v4104_v17 = vor.u32 1.1754944e-38, %v4103_v32  ;;  %v4018_v22 = vmul.f32 %v8137_v42, %v8077_v49  ;;  %vm4102_vm3 = vcmp.eq.f32.partialorder %v4101_v37, 8.507059e+37  ;;  %v4033_v32 = vmul.f32 %v8167_v46, %v8103_v38 }
 0x71e   : > { %v6099_v53 = vpop.eup %6098  ;;  %v5516_v61 = vmul.f32 -1.442695, %v3884_v24  ;;  %v4096_v0 = vadd.f32 %v6091_v43, %v4095_v30  ;;  %v8876_v30 = vld [vmem:[#allocation16_spill] sm:$0xff]  ;;  %v8206_v24 = vadd.f32 1.0, %v6095_v57  ;;  %v4205_v19 = vmul.f32 %v8179_v20, %v7964_v48 }
 0x71f   : > { %v8175_v12 = vpop.eup %6100  ;;  %v8177_v15 = vadd.f32 1.0, %v6099_v53  ;;  %v8878_v8 = vpack.c.bf16 %v8876_v30, %v8877_v60  ;;  %v4014_v16 = vor.u32 1.1754944e-38, %v4013_v33  ;;  %v4034_v33 = vsub.f32 1.0, %v4033_v32 }
 0x720   : > { %v6103_v25 = vpop.eup %6102  ;;  %v4108_v27 = vmul.f32 %v8175_v12, %v8125_v5  ;;  %6104 = vpow2.f32 %v5516_v61  ;;  %v4100_v26 = vsel %vm4099_vm14, %v6091_v43, %v4096_v0  ;;  %v4010_v61 = vsel %vm8194_vm15, %v8048_v63, %v4006_v29  ;;  %vm8275_vm14 = vmor %vm4022_vm4, %vm4023_vm7 }
 0x721   : > { %6106 = vrcp.f32 %v8177_v15  ;;  %v8202_v28 = vsel %vm4102_vm3, %v4104_v17, %v4100_v26  ;;  %v8212_v0 = vadd.f32 1.0, %v6103_v25  ;;  %v4019_v63 = vsub.f32 1.0, %v4018_v22 }
 0x722   : > { %5473 = vmatmul.msk.bf16.gmra.mxu1 %vm832_vm2, %v8878_v8  ;;  %v4109_v41 = vsub.f32 1.0, %v4108_v27  ;;  %v4206_v43 = vmul.f32 %v8202_v28, %v7970_v2  ;;  %v8217_v29 = vsel %vm8141_vm5, %v8107_v9, %v3995_v50  ;;  %v8221_v30 = vsel %vm4012_vm0, %v4014_v16, %v4010_v61 }
 0x723   : > { %v3885_v37 = vpop.f32.mrf.mxu3  ;;  %6108 = vrcp.f32 %v8206_v24  ;;  %v8228_v9 = vmul.f32 %v8217_v29, %v3427_v21  ;;  %v4020_v8 = vmul.f32 %v8137_v42, %v4019_v63  ;;  %vm4113_vm5 = vweird.f32 %v8175_v12 }
 0x724   : > { %v3886_v57 = vadd.f32 %v7975_v18, %v3885_v37  ;;  %v5681_v17 = vpack.i.bf16 %v4206_v43, %v4205_v19  ;;  %v4110_v27 = vmul.f32 %v8175_v12, %v4109_v41  ;;  %6110 = vrcp.f32 %v8212_v0  ;;  %vm8254_vm11 = vmor %vm4112_vm10, %vm4113_vm5 }
 0x725   : > { %v3429_v48 = vpop.f32.mrf.mxu1  ;;  %v4035_v61 = vmul.f32 %v8167_v46, %v4034_v33  ;;  %v4118_v32 = vand.u32 2147483648, %v8125_v5  ;;  %vm4037_vm8 = vweird.f32 %v8103_v38  ;;  %v4116_v19 = vand.u32 2147483647, %v8125_v5 }
 0x726   : > { %v6105_v22 = vpop.eup %6104  ;;  %v5517_v34 = vmul.f32 -1.442695, %v3886_v57  ;;  %v8231_v50 = vmul.f32 %v8221_v30, %v3429_v48  ;;  %5682 = vrot.lane.b32.xlu0 %v5681_v17, %s6223_s19  ;;  %v4111_v26 = vadd.f32 %v8175_v12, %v4110_v27  ;;  %v4021_v37 = vadd.f32 %v8137_v42, %v4020_v8  ;;  %vm8300_vm4 = vmor %vm4037_vm8, %vm4038_vm13 }
 0x727   : > { %v6107_v25 = vpop.eup %6106  ;;  %v8235_v60 = vadd.f32 1.0, %v6105_v22  ;;  %v4041_v16 = vand.u32 2147483647, %v8103_v38  ;;  %v4131_v57 = vand.u32 2147483647, %v8177_v15  ;;  %v4133_v17 = vand.u32 2147483648, %v8177_v15 }
 0x728   : > { %v4123_v53 = vmul.f32 %v6107_v25, %v8177_v15  ;;  %6112 = vpow2.f32 %v5517_v34  ;;  %v4115_v5 = vsel %vm8254_vm11, %v8175_v12, %v4111_v26  ;;  %vm4128_vm12 = vweird.f32 %v6107_v25 }
 0x729   : > { %6114 = vrcp.f32 %v8235_v60  ;;  %v8260_v27 = vpop.eup %6108  ;;  %v4036_v8 = vadd.f32 %v8167_v46, %v4035_v61  ;;  %v4119_v21 = vor.u32 1.1754944e-38, %v4118_v32  ;;  %vm4117_vm15 = vcmp.eq.f32.partialorder %v4116_v19, 8.507059e+37 }
 0x72a   : > { %v4124_v41 = vsub.f32 1.0, %v4123_v53  ;;  %v8266_v22 = vpop.eup %6110  ;;  %v4043_v53 = vand.u32 2147483648, %v8103_v38  ;;  %vm4127_vm3 = vweird.f32 %v8177_v15  ;;  %v4025_v32 = vsel %vm8275_vm14, %v8137_v42, %v4021_v37 }
 0x72b   : > { %v3888_v43 = vpop.f32.mrf.mxu3  ;;  %vm4129_vm0 = vmor %vm4127_vm3, %vm4128_vm12  ;;  %v4134_v63 = vor.u32 1.1754944e-38, %v4133_v17  ;;  %v8885_v15 = vpack.c.bf16 %v7575_v45, %v7566_v31  ;;  %vm4132_vm5 = vcmp.eq.f32.partialorder %v4131_v57, 8.507059e+37  ;;  %v4048_v31 = vmul.f32 %v8260_v27, %v8206_v24 }
 0x72c   : > { %v3889_v48 = vadd.f32 %v7975_v18, %v3888_v43  ;;  %v4125_v33 = vmul.f32 %v6107_v25, %v4124_v41  ;;  %v8287_v43 = vsel %vm4117_vm15, %v4119_v21, %v4115_v5  ;;  %v8888_v37 = vand.u32 2147483647, %v8077_v49 }
 0x72d   : > { %v3432_v34 = vpop.f32.mrf.mxu1  ;;  %v4207_v38 = vmul.f32 %v8287_v43, %v7977_v11  ;;  %v4044_v5 = vor.u32 1.1754944e-38, %v4043_v53  ;;  %vm4042_vm8 = vcmp.eq.f32.partialorder %v4041_v16, 8.507059e+37  ;;  %vm4052_vm11 = vweird.f32 %v8206_v24 }
 0x72e   : > { %v6113_v47 = vpop.eup %6112  ;;  %v5518_v2 = vmul.f32 -1.442695, %v3889_v48  ;;  %v4126_v26 = vadd.f32 %v6107_v25, %v4125_v33  ;;  %vm4027_vm7 = vcmp.eq.f32.partialorder %v8888_v37, 8.507059e+37  ;;  %vm4142_vm12 = vweird.f32 %v8235_v60 }
 0x72f   : > { %v8280_v61 = vpop.eup %6114  ;;  %v8282_v41 = vadd.f32 1.0, %v6113_v47  ;;  %vm4053_vm13 = vweird.f32 %v8260_v27  ;;  %v4058_v37 = vand.u32 2147483648, %v8206_v24  ;;  %vm4067_vm3 = vweird.f32 %v8212_v0 }
 0x730   : > { %v4138_v48 = vmul.f32 %v8280_v61, %v8235_v60  ;;  %6116 = vpow2.f32 %v5518_v2  ;;  %v4130_v47 = vsel %vm4129_vm0, %v6107_v25, %v4126_v26  ;;  %v4040_v2 = vsel %vm8300_vm4, %v8167_v46, %v4036_v8 }
 0x731   : > { %6118 = vrcp.f32 %v8282_v41  ;;  %v8308_v21 = vsel %vm4132_vm5, %v4134_v63, %v4130_v47  ;;  %v4063_v25 = vmul.f32 %v8266_v22, %v8212_v0  ;;  %v8889_v46 = vand.u32 2147483648, %v8077_v49 }
 0x732   : > { %5474 = vmatmul.msk.bf16.gmra.mxu1 %vm832_vm2, %v8885_v15  ;;  %v4139_v45 = vsub.f32 1.0, %v4138_v48  ;;  %v4208_v19 = vmul.f32 %v8308_v21, %v7985_v59  ;;  %v8326_v26 = vsel %vm4042_vm8, %v4044_v5, %v4040_v2  ;;  %v4049_v63 = vsub.f32 1.0, %v4048_v31  ;;  %vm8377_vm8 = vmor %vm4052_vm11, %vm4053_vm13 }
 0x733   : > { %v4029_v57 = vor.u32 1.1754944e-38, %v8889_v46  ;;  %v3890_v17 = vpop.f32.mrf.mxu3  ;;  %vm4143_vm10 = vweird.f32 %v8280_v61  ;;  %v4148_v31 = vand.u32 2147483648, %v8235_v60  ;;  %vm4068_vm0 = vweird.f32 %v8266_v22 }
 0x734   : > { %v3891_v33 = vadd.f32 %v7975_v18, %v3890_v17  ;;  %v5686_v8 = vpack.i.bf16 %v4208_v19, %v4207_v38  ;;  %v4140_v11 = vmul.f32 %v8280_v61, %v4139_v45  ;;  %v4064_v18 = vsub.f32 1.0, %v4063_v25  ;;  %vm8354_vm14 = vmor %vm4142_vm12, %vm4143_vm10 }
 0x735   : > { %v8324_v12 = vsel %vm4027_vm7, %v4029_v57, %v4025_v32  ;;  %v3434_v59 = vpop.f32.mrf.mxu1  ;;  %v4050_v2 = vmul.f32 %v8260_v27, %v4049_v63  ;;  %v4146_v19 = vand.u32 2147483647, %v8235_v60  ;;  %v4056_v25 = vand.u32 2147483647, %v8206_v24  ;;  %vm4069_vm11 = vmor %vm4067_vm3, %vm4068_vm0 }
 0x736   : > { %v6117_v48 = vpop.eup %6116  ;;  %v8329_v15 = vmul.f32 %v8324_v12, %v3432_v34  ;;  %v5519_v49 = vmul.f32 -1.442695, %v3891_v33  ;;  %v8332_v42 = vmul.f32 %v8326_v26, %v3434_v59  ;;  %5687 = vrot.lane.b32.xlu0 %v5686_v8, %s6223_s19  ;;  %v4141_v34 = vadd.f32 %v8280_v61, %v4140_v11 }
 0x737   : > { %v6119_v16 = vpop.eup %6118  ;;  %v8335_v53 = vadd.f32 1.0, %v6117_v48  ;;  %v4065_v38 = vmul.f32 %v8266_v22, %v4064_v18  ;;  %v4163_v57 = vand.u32 2147483648, %v8282_v41  ;;  %v4161_v60 = vand.u32 2147483647, %v8282_v41 }
 0x738   : > { %v4153_v32 = vmul.f32 %v6119_v16, %v8282_v41  ;;  %6120 = vpow2.f32 %v5519_v49  ;;  %v5761_v47 = vpack.i.bf16 %v8332_v42, %v8329_v15  ;;  %v4145_v17 = vsel %vm8354_vm14, %v8280_v61, %v4141_v34 }
 0x739   : > { %6122 = vrcp.f32 %v8335_v53  ;;  %vm4158_vm15 = vweird.f32 %v6119_v16  ;;  %v4051_v8 = vadd.f32 %v8260_v27, %v4050_v2  ;;  %v4149_v11 = vor.u32 1.1754944e-38, %v4148_v31 }
 0x73a   : > { %v4154_v45 = vsub.f32 1.0, %v4153_v32  ;;  %v4066_v63 = vadd.f32 %v8266_v22, %v4065_v38  ;;  %vm4147_vm4 = vcmp.eq.f32.partialorder %v4146_v19, 8.507059e+37  ;;  %vm4157_vm5 = vweird.f32 %v8282_v41 }
 0x73b   : > { %v4073_v18 = vand.u32 2147483648, %v8212_v0  ;;  %v8369_v32 = vsel %vm4147_vm4, %v4149_v11, %v4145_v17  ;;  %vm4159_vm7 = vmor %vm4157_vm5, %vm4158_vm15  ;;  %v4164_v34 = vor.u32 1.1754944e-38, %v4163_v57  ;;  %v8894_v41 = vpack.c.bf16 %v7597_v58, %v7585_v56 }
 0x73c   : > { %v4155_v5 = vmul.f32 %v6119_v16, %v4154_v45  ;;  %v4071_v45 = vand.u32 2147483647, %v8212_v0  ;;  %vm4162_vm10 = vcmp.eq.f32.partialorder %v4161_v60, 8.507059e+37  ;;  %v4055_v19 = vsel %vm8377_vm8, %v8260_v27, %v4051_v8 }
 0x73d   : > { %v3437_v33 = vpop.f32.mrf.mxu1  ;;  %v4070_v58 = vsel %vm4069_vm11, %v8266_v22, %v4066_v63  ;;  %v4209_v56 = vmul.f32 %v8369_v32, %v7989_v35  ;;  %v4059_v57 = vor.u32 1.1754944e-38, %v4058_v37  ;;  %v4074_v17 = vor.u32 1.1754944e-38, %v4073_v18 }
 0x73e   : > { %v6121_v59 = vpop.eup %6120  ;;  %v4156_v48 = vadd.f32 %v6119_v16, %v4155_v5  ;;  %vm4057_vm12 = vcmp.eq.f32.partialorder %v4056_v25, 8.507059e+37  ;;  %vm4072_vm13 = vcmp.eq.f32.partialorder %v4071_v45, 8.507059e+37  ;;  %vm4172_vm15 = vweird.f32 %v8335_v53 }
 0x73f   : > { %v6123_v61 = vpop.eup %6122  ;;  %v3956_v49 = vadd.f32 1.0, %v6121_v59  ;;  %v8400_v60 = vsel %vm4057_vm12, %v4059_v57, %v4055_v19  ;;  %v8402_v8 = vsel %vm4072_vm13, %v4074_v17, %v4070_v58  ;;  %v4178_v59 = vand.u32 2147483648, %v8335_v53 }
 0x740   : > { %v4168_v2 = vmul.f32 %v6123_v61, %v8335_v53  ;;  %v4160_v38 = vsel %vm4159_vm7, %v6119_v16, %v4156_v48  ;;  %v8405_v11 = vmul.f32 %v8400_v60, %v3437_v33  ;;  %vm4173_vm14 = vweird.f32 %v6123_v61 }
 0x741   : > { %6124 = vrcp.f32 %v3956_v49  ;;  %v8393_v24 = vsel %vm4162_vm10, %v4164_v34, %v4160_v38  ;;  %v4176_v33 = vand.u32 2147483647, %v8335_v53  ;;  %vm4174_vm3 = vmor %vm4172_vm15, %vm4173_vm14  ;;  %v4193_v48 = vand.u32 2147483648, %v3956_v49 }
 0x742   : > { %5475 = vmatmul.msk.bf16.gmra.mxu1 %vm832_vm2, %v8894_v41  ;;  %v4169_v46 = vsub.f32 1.0, %v4168_v2  ;;  %v4210_v16 = vmul.f32 %v8393_v24, %v8003_v3  ;;  %v4191_v2 = vand.u32 2147483647, %v3956_v49  ;;  %v4179_v41 = vor.u32 1.1754944e-38, %v4178_v59 }
 0x743   : > { %vm4177_vm4 = vcmp.eq.f32.partialorder %v4176_v33, 8.507059e+37  ;;  %vm4187_vm5 = vweird.f32 %v3956_v49  ;;  %v4194_v19 = vor.u32 1.1754944e-38, %v4193_v48  ;;  %vm4453_vm10 = vcmask 97280  }
 0x744   : > { %v5691_v27 = vpack.i.bf16 %v4210_v16, %v4209_v56  ;;  %v4170_v5 = vmul.f32 %v6123_v61, %v4169_v46  ;;  %v8895_v46 = vpack.c.bf16 %v7619_v55, %v7607_v7  ;;  %vm4192_vm8 = vcmp.eq.f32.partialorder %v4191_v2, 8.507059e+37 }
 0x745   : > { %v3439_v0 = vpop.f32.mrf.mxu1  ;;  %vm4470_vm11 = vcmask 130048   ;;  %vm4520_vm14 = vcmask 162816  }
 0x746   : > { %v8408_v22 = vmul.f32 %v8402_v8, %v3439_v0  ;;  %5692 = vrot.lane.b32.xlu1 %v5691_v27, %s6223_s19  ;;  %v4171_v37 = vadd.f32 %v6123_v61, %v4170_v5  ;;  %v8896_v27 = vpack.c.bf16 %v7641_v52, %v7629_v14 }
 0x747   : > { %v6125_v35 = vpop.eup %6124 }
 0x748   : > { %v4183_v3 = vmul.f32 %v6125_v35, %v3956_v49  ;;  %v5746_v25 = vpack.i.bf16 %v8408_v22, %v8405_v11  ;;  %v4175_v18 = vsel %vm4174_vm3, %v6123_v61, %v4171_v37  ;;  %vm4188_vm0 = vweird.f32 %v6125_v35  ;;  %v8898_v37 = vld [vmem:[#allocation17_spill] sm:$0xff] }
 0x749   : > { %v8416_v38 = vsel %vm4177_vm4, %v4179_v41, %v4175_v18  ;;  %vm4189_vm7 = vmor %vm4187_vm5, %vm4188_vm0  ;;  %v8900_v18 = vpack.c.bf16 %v7686_v36, %v7677_v4  ;;  %v4202_v36 = vmul.f32 %v8326_v26, %v7954_v23 }
 0x74a   : > { %v4184_v63 = vsub.f32 1.0, %v4183_v3  ;;  %v4211_v58 = vmul.f32 %v8416_v38, %v8010_v13  ;;  %v8897_v3 = vld [vmem:[#allocation18_spill] sm:$0xff] }
 0x74b   : > { %v8899_v59 = vpack.c.bf16 %v8897_v3, %v8898_v37 }
 0x74c   : > { %v4185_v34 = vmul.f32 %v6125_v35, %v4184_v63 }
 0x74d   : > { %v3442_v31 = vpop.f32.mrf.mxu1 }
 0x74e   : > { %v4186_v45 = vadd.f32 %v6125_v35, %v4185_v34  ;;  %v4221_v57 = vmul.f32 %v8179_v20, %v3442_v31 }
 0x750   : > { %v4190_v53 = vsel %vm4189_vm7, %v6125_v35, %v4186_v45  ;;  %v4204_v45 = vmul.f32 %v8402_v8, %v7962_v44 }
 0x751   : > { %v8422_v61 = vsel %vm4192_vm8, %v4194_v19, %v4190_v53 }
 0x752   : > { %5476 = vmatmul.msk.bf16.gmra.mxu1 %vm832_vm2, %v8895_v46  ;;  %v4212_v56 = vmul.f32 %v8422_v61, %v8030_v39  ;;  %v4203_v46 = vmul.f32 %v8400_v60, %v7956_v10  ;;  %v4200_v10 = vmul.f32 %v8221_v30, %v7945_v40 }
 0x754   : > { %v5696_v49 = vpack.i.bf16 %v4212_v56, %v4211_v58  ;;  %v5721_v53 = vpack.i.bf16 %v4204_v45, %v4203_v46  ;;  %v4201_v58 = vmul.f32 %v8324_v12, %v7948_v6  ;;  %v4198_v6 = vmul.f32 %v8115_v62, %v7936_v1 }
 0x755   : > { %v3444_v16 = vpop.f32.mrf.mxu1 }
 0x756   : > { %v4222_v17 = vmul.f32 %v8202_v28, %v3444_v16  ;;  %5697 = vrot.lane.b32.xlu0 %v5696_v49, %s6223_s19  ;;  %v5756_v44 = vpack.i.bf16 %v4202_v36, %v4201_v58 }
 0x758   : > { %v5701_v55 = vpack.i.bf16 %v4222_v17, %v4221_v57  ;;  %v4199_v17 = vmul.f32 %v8217_v29, %v7939_v51 }
 0x75a   : > { %5702 = vrot.lane.b32.xlu1 %v5701_v55, %s6224_s17  ;;  %v5771_v23 = vpack.i.bf16 %v4200_v10, %v4199_v17  ;;  %v8906_v17 = vld [vmem:[#allocation34_spill] sm:$0xff] }
 0x75d   : > { %v3447_v7 = vpop.f32.mrf.mxu1 }
 0x75e   : > { %v4223_v39 = vmul.f32 %v8287_v43, %v3447_v7  ;;  %v8901_v7 = vld [vmem:[#allocation35_spill] sm:$0xff] }
 0x762   : > { %5477 = vmatmul.msk.bf16.gmra.mxu1 %vm832_vm2, %v8896_v27  ;;  %v4197_v27 = vmul.f32 %v8098_v54, %v8901_v7 }
 0x764   : > { %v5786_v40 = vpack.i.bf16 %v4198_v6, %v4197_v27  ;;  %v8907_v6 = vld [vmem:[#allocation33_spill] sm:$0xff] }
 0x765   : > { %v3449_v13 = vpop.f32.mrf.mxu1 }
 0x766   : > { %v4224_v5 = vmul.f32 %v8308_v21, %v3449_v13 }
 0x768   : > { %v5706_v0 = vpack.i.bf16 %v4224_v5, %v4223_v39 }
 0x76a   : > { %5707 = vrot.lane.b32.xlu1 %v5706_v0, %s6224_s17 }
 0x76d   : > { %v3452_v35 = vpop.f32.mrf.mxu1 }
 0x76e   : > { %v4225_v33 = vmul.f32 %v8369_v32, %v3452_v35 }
 0x772   : > { %5478 = vmatmul.msk.bf16.gmra.mxu1 %vm832_vm2, %v8899_v59 }
 0x775   : > { %v3454_v63 = vpop.f32.mrf.mxu1 }
 0x776   : > { %v4226_v52 = vmul.f32 %v8393_v24, %v3454_v63 }
 0x778   : > { %v5711_v14 = vpack.i.bf16 %v4226_v52, %v4225_v33 }
 0x77a   : > { %5712 = vrot.lane.b32.xlu2 %v5711_v14, %s6224_s17 }
 0x77d   : > { %v3457_v48 = vpop.f32.mrf.mxu1 }
 0x77e   : > { %v4227_v2 = vmul.f32 %v8416_v38, %v3457_v48 }
 0x782   : > { %5479 = vmatmul.msk.bf16.gmra.mxu1 %vm832_vm2, %v8900_v18 }
 0x785   : > { %v3459_v34 = vpop.f32.mrf.mxu1 }
 0x786   : > { %v4228_v31 = vmul.f32 %v8422_v61, %v3459_v34 }
 0x788   : > { %v5716_v41 = vpack.i.bf16 %v4228_v31, %v4227_v2 }
 0x78a   : > { %5717 = vrot.lane.b32.xlu0 %v5716_v41, %s6224_s17 }
 0x78f   : > { %v3462_v19 = vpop.f32.mrf.mxu1 }
 0x790   : > { %v4229_v56 = vmul.f32 %v8098_v54, %v3462_v19 }
 0x792   : > { %5722 = vrot.lane.b32.xlu0 %v5721_v53, %s6223_s19 }
 0x797   : > { %v3464_v4 = vpop.f32.mrf.mxu1 }
 0x798   : > { %v4230_v49 = vmul.f32 %v8115_v62, %v3464_v4 }
 0x79a   : > { %v5796_v16 = vpack.i.bf16 %v4230_v49, %v4229_v56  ;;  %5757 = vrot.lane.b32.xlu0 %v5756_v44, %s6223_s19 }
 0x79f   : > { %v3467_v57 = vpop.f32.mrf.mxu1 }
 0x7a0   : > { %v4231_v13 = vmul.f32 %v8217_v29, %v3467_v57 }
 0x7a2   : > { %5772 = vrot.lane.b32.xlu0 %v5771_v23, %s6223_s19 }
 0x7a7   : > { %v3469_v55 = vpop.f32.mrf.mxu1 }
 0x7a8   : > { %v4232_v39 = vmul.f32 %v8221_v30, %v3469_v55 }
 0x7aa   : > { %v5781_v5 = vpack.i.bf16 %v4232_v39, %v4231_v13  ;;  %5787 = vrot.lane.b32.xlu0 %v5786_v40, %s6223_s19 }
 0x7af   : > { %v3472_v0 = vpop.f32.mrf.mxu1 }
 0x7b0   : > { %v4233_v35 = vmul.f32 %v8324_v12, %v3472_v0 }
 0x7b7   : > { %v3474_v51 = vpop.f32.mrf.mxu1 }
 0x7b8   : > { %v4234_v3 = vmul.f32 %v8326_v26, %v3474_v51 }
 0x7ba   : > { %v5766_v37 = vpack.i.bf16 %v4234_v3, %v4233_v35  ;;  %v8908_v35 = vld [vmem:[#allocation32_spill] sm:$0xff] }
 0x7bf   : > { %v3477_v1 = vpop.f32.mrf.mxu1 }
 0x7c0   : > { %v4235_v41 = vmul.f32 %v8400_v60, %v3477_v1  ;;  %v8904_v60 = vld [vmem:[#allocation10_spill] sm:$0xff] }
 0x7c7   : > { %v3479_v62 = vpop.f32.mrf.mxu1 }
 0x7cf   : > { %v3482_v59 = vpop.f32.mrf.mxu1 }
 0x7d0   : > { %v4237_v54 = vmul.f32 %v8179_v20, %v3482_v59 }
 0x7d4   : > { %v5713_v11 = vpop.permute.xlu2 %5712 }
 0x7d5   : > { %v5715_v7 = vunpack.i.h.bf16 %v5713_v11  ;;  %v5714_v27 = vunpack.i.l.bf16 %v5713_v11 }
 0x7d7   : > { %v3484_v63 = vpop.f32.mrf.mxu1 }
 0x7d8   : > { %v4238_v29 = vmul.f32 %v8202_v28, %v3484_v63  ;;  %v4236_v28 = vmul.f32 %v8402_v8, %v3479_v62  ;;  %v8909_v62 = vld [vmem:[#allocation31_spill] sm:$0xff] }
 0x7da   : > { %v5726_v30 = vpack.i.bf16 %v4238_v29, %v4237_v54  ;;  %v5751_v45 = vpack.i.bf16 %v4236_v28, %v4235_v41 }
 0x7dc   : > { %5727 = vrot.lane.b32.xlu2 %v5726_v30, %s6225_s4 }
 0x7df   : > { %v3487_v33 = vpop.f32.mrf.mxu1 }
 0x7e0   : > { %v4239_v14 = vmul.f32 %v8287_v43, %v3487_v33 }
 0x7e7   : > { %v3489_v52 = vpop.f32.mrf.mxu1 }
 0x7e8   : > { %v4240_v12 = vmul.f32 %v8308_v21, %v3489_v52 }
 0x7ea   : > { %v5731_v48 = vpack.i.bf16 %v4240_v12, %v4239_v14 }
 0x7ec   : > { %5732 = vrot.lane.b32.xlu2 %v5731_v48, %s6225_s4 }
 0x7ef   : > { %v3492_v26 = vpop.f32.mrf.mxu1 }
 0x7f0   : > { %v4241_v34 = vmul.f32 %v8369_v32, %v3492_v26  ;;  %v8902_v32 = vpack.i.bf16 %v8231_v50, %v8228_v9 }
 0x7f7   : > { %v3494_v18 = vpop.f32.mrf.mxu1 }
 0x7f8   : > { %v4242_v2 = vmul.f32 %v8393_v24, %v3494_v18  ;;  %v8903_v24 = vld [vmem:[#allocation11_spill] sm:$0xff] }
 0x7f9   : > { %v8905_v8 = vpack.i.bf16 %v8903_v24, %v8904_v60 }
 0x7fa   : > { %v5736_v20 = vpack.i.bf16 %v4242_v2, %v4241_v34 }
 0x7fc   : > { %5737 = vrot.lane.b32.xlu2 %v5736_v20, %s6225_s4  ;;  %v8910_v20 = vld [vmem:[#allocation30_spill] sm:$0xff] }
 0x7ff   : > { %v3497_v31 = vpop.f32.mrf.mxu1 }
 0x800   : > { %v4243_v21 = vmul.f32 %v8416_v38, %v3497_v31  ;;  %v8505_v38 = vpop.permute.xlu0 %5682  ;;  %v8911_v31 = vld [vmem:[#allocation29_spill] sm:$0xff] }
 0x801   : > { %v5685_v34 = vunpack.i.h.bf16 %v8505_v38  ;;  %v5684_v2 = vunpack.i.l.bf16 %v8505_v38 }
 0x804   : > { %5752 = vrot.lane.b32.xlu2 %v5751_v45, %s6225_s4 }
 0x807   : > { %v3499_v43 = vpop.f32.mrf.mxu1 }
 0x808   : > { %v4244_v19 = vmul.f32 %v8422_v61, %v3499_v43  ;;  %v5688_v22 = vpop.permute.xlu0 %5687  ;;  %v5693_v61 = vpop.permute.xlu1 %5692 }
 0x809   : > { %v5695_v56 = vunpack.i.h.bf16 %v5693_v61  ;;  %v5690_v44 = vunpack.i.h.bf16 %v5688_v22  ;;  %v5689_v10 = vunpack.i.l.bf16 %v5688_v22  ;;  %v5694_v57 = vunpack.i.l.bf16 %v5693_v61 }
 0x80a   : > { %v5741_v46 = vpack.i.bf16 %v4244_v19, %v4243_v21 }
 0x80b   : > { %v4450_v3 = vsel %vm1470_vm9, %v8908_v35, %v5695_v56  ;;  %v4449_v59 = vsel %vm1470_vm9, %v8909_v62, %v5694_v57  ;;  %v4448_v28 = vsel %vm1470_vm9, %v8910_v20, %v5690_v44  ;;  %v4447_v41 = vsel %vm1470_vm9, %v8911_v31, %v5689_v10  ;;  %v8917_v62 = vld [vmem:[#allocation23_spill] sm:$0xff] }
 0x80c   : > { %5767 = vrot.lane.b32.xlu2 %v5766_v37, %s6225_s4  ;;  %5742 = vrot.lane.b32.xlu1 %v5741_v46, %s6225_s4  ;;  %v4467_v30 = vsel %vm4453_vm10, %v4450_v3, %v5715_v7  ;;  %v4466_v33 = vsel %vm4453_vm10, %v4449_v59, %v5714_v27 }
 0x810   : > { %v5698_v53 = vpop.permute.xlu0 %5697  ;;  %v8509_v42 = vpop.permute.xlu1 %5702 }
 0x811   : > { %v5700_v50 = vunpack.i.h.bf16 %v5698_v53  ;;  %v5699_v4 = vunpack.i.l.bf16 %v5698_v53  ;;  %v5705_v45 = vunpack.i.h.bf16 %v8509_v42  ;;  %v5704_v43 = vunpack.i.l.bf16 %v8509_v42  ;;  %v8912_v42 = vld [vmem:[#allocation28_spill] sm:$0xff] }
 0x813   : > { %v4452_v23 = vsel %vm1470_vm9, %v8906_v17, %v5700_v50  ;;  %v4451_v55 = vsel %vm1470_vm9, %v8907_v6, %v5699_v4 }
 0x814   : > { %5782 = vrot.lane.b32.xlu2 %v5781_v5, %s6225_s4  ;;  %5747 = vrot.lane.b32.xlu1 %v5746_v25, %s6224_s17 }
 0x818   : > { %v5708_v9 = vpop.permute.xlu1 %5707 }
 0x819   : > { %v5710_v63 = vunpack.i.h.bf16 %v5708_v9  ;;  %v5709_v52 = vunpack.i.l.bf16 %v5708_v9 }
 0x81b   : > { %v4465_v21 = vsel %vm4453_vm10, %v4448_v28, %v5710_v63  ;;  %v4464_v46 = vsel %vm4453_vm10, %v4447_v41, %v5709_v52  ;;  %v8918_v28 = vld [vmem:[#allocation22_spill] sm:$0xff]  ;;  %v8919_v41 = vld [vmem:[#allocation21_spill] sm:$0xff] }
 0x81c   : > { %5797 = vrot.lane.b32.xlu2 %v5796_v16, %s6225_s4  ;;  %5762 = vrot.lane.b32.xlu1 %v5761_v47, %s6224_s17  ;;  %v5718_v47 = vpop.permute.xlu0 %5717  ;;  %s6232_s4 = smov (!%p5523_p3), 1  }
 0x81d   : > { %v5720_v49 = vunpack.i.h.bf16 %v5718_v47  ;;  %v5719_v16 = vunpack.i.l.bf16 %v5718_v47  ;;  %v4446_v47 = vsel %vm1470_vm9, %v8912_v42, %v5685_v34  ;;  %v4495_v34 = vlaneseq }
 0x81e   : > { %v4463_v4 = vsel %vm4453_vm10, %v4446_v47, %v5705_v45  ;;  %v5805_v47 = vld [vmem:[%s622_s20] ss:$0 sm:$0xff]  ;;  %s6228_s20 = smov (!%p5523_p3), 120  }
 0x81f   : > { %v4468_v37 = vsel %vm4453_vm10, %v4451_v55, %v5719_v16  ;;  %v4469_v1 = vsel %vm4453_vm10, %v4452_v23, %v5720_v49  ;;  %v8915_v16 = vld [vmem:[#allocation25_spill] sm:$0xff] }
 0x824   : > { %5777 = vrot.lane.b32.xlu1 %v8902_v32, %s6224_s17  ;;  %v8511_v58 = vpop.permute.xlu0 %5722 }
 0x825   : > { %v5725_v32 = vunpack.i.h.bf16 %v8511_v58  ;;  %v5724_v24 = vunpack.i.l.bf16 %v8511_v58 }
 0x827   : > { %v4443_v44 = vsel %vm1470_vm9, %v8915_v16, %v5724_v24 }
 0x82c   : > { %5792 = vrot.lane.b32.xlu1 %v8905_v8, %s6224_s17  ;;  %v5758_v19 = vpop.permute.xlu0 %5757  ;;  %s6231_s17 = smov (!%p5523_p3), 2  }
 0x82d   : > { %v5760_v17 = vunpack.i.h.bf16 %v5758_v19  ;;  %v5759_v23 = vunpack.i.l.bf16 %v5758_v19 }
 0x82f   : > { %v4441_v59 = vsel %vm1470_vm9, %v8917_v62, %v5759_v23  ;;  %v6226_v23 = vmov 1.0|1.0  }
 0x836   : > { %v8507_v25 = vpop.permute.xlu2 %5727 }
 0x837   : > { %v5730_v38 = vunpack.i.h.bf16 %v8507_v25  ;;  %v5729_v11 = vunpack.i.l.bf16 %v8507_v25  ;;  %v8914_v25 = vld [vmem:[#allocation26_spill] sm:$0xff] }
 0x838   : > { %v4444_v49 = vsel %vm1470_vm9, %v8914_v25, %v5725_v32 }
 0x839   : > { %v4480_v57 = vsel %vm4470_vm11, %v4463_v4, %v5730_v38 }
 0x846   : > { %v5733_v15 = vpop.permute.xlu2 %5732 }
 0x847   : > { %v5735_v12 = vunpack.i.h.bf16 %v5733_v15  ;;  %v5734_v48 = vunpack.i.l.bf16 %v5733_v15 }
 0x849   : > { %v4481_v22 = vsel %vm4470_vm11, %v4464_v46, %v5734_v48  ;;  %v4482_v61 = vsel %vm4470_vm11, %v4465_v21, %v5735_v12 }
 0x84a   : > { %v4492_v56 = vpack.c.bf16 %v4482_v61, %v4481_v22 }
 0x856   : > { %v5738_v36 = vpop.permute.xlu2 %5737 }
 0x857   : > { %v5740_v39 = vunpack.i.h.bf16 %v5738_v36  ;;  %v5739_v5 = vunpack.i.l.bf16 %v5738_v36  ;;  %v8913_v36 = vld [vmem:[#allocation27_spill] sm:$0xff] }
 0x858   : > { %v4445_v9 = vsel %vm1470_vm9, %v8913_v36, %v5684_v2 }
 0x859   : > { %v4483_v26 = vsel %vm4470_vm11, %v4466_v33, %v5739_v5  ;;  %v4484_v18 = vsel %vm4470_vm11, %v4467_v30, %v5740_v39  ;;  %v4462_v58 = vsel %vm4453_vm10, %v4445_v9, %v5704_v43  ;;  %v5773_v5 = vpop.permute.xlu0 %5772 }
 0x85a   : > { %v4493_v8 = vpack.c.bf16 %v4484_v18, %v4483_v26  ;;  %v4479_v10 = vsel %vm4470_vm11, %v4462_v58, %v5729_v11  ;;  %v5775_v12 = vunpack.i.h.bf16 %v5773_v5  ;;  %v5774_v48 = vunpack.i.l.bf16 %v5773_v5  ;;  %v8921_v58 = vld [vmem:[#allocation19_spill] sm:$0xff] }
 0x85b   : > { %v4491_v39 = vpack.c.bf16 %v4480_v57, %v4479_v10  ;;  %v4498_v11 = vstv %s5520_s30 }
 0x85c   : > { %v4440_v31 = vsel %vm1470_vm9, %v8918_v28, %v5775_v12  ;;  %v4439_v45 = vsel %vm1470_vm9, %v8919_v41, %v5774_v48 }
 0x85e   : > { %v8517_v40 = vpop.permute.xlu2 %5752 }
 0x85f   : > { %v5755_v7 = vunpack.i.h.bf16 %v8517_v40  ;;  %v5754_v27 = vunpack.i.l.bf16 %v8517_v40 }
 0x861   : > { %v5788_v19 = vpop.permute.xlu0 %5787 }
 0x862   : > { %v5790_v22 = vunpack.i.h.bf16 %v5788_v19  ;;  %v5789_v61 = vunpack.i.l.bf16 %v5788_v19 }
 0x866   : > { %v5768_v50 = vpop.permute.xlu2 %5767 }
 0x867   : > { %v5770_v63 = vunpack.i.h.bf16 %v5768_v50 }
 0x86e   : > { %v5783_v33 = vpop.permute.xlu2 %5782 }
 0x86f   : > { %v5785_v43 = vunpack.i.h.bf16 %v5783_v33  ;;  %v5784_v21 = vunpack.i.l.bf16 %v5783_v33 }
 0x87e   : > { %v5743_v13 = vpop.permute.xlu1 %5742 }
 0x87f   : > { %v5745_v0 = vunpack.i.h.bf16 %v5743_v13  ;;  %v5744_v51 = vunpack.i.l.bf16 %v5743_v13 }
 0x881   : > { %v4485_v54 = vsel %vm4470_vm11, %v4468_v37, %v5744_v51  ;;  %v4486_v29 = vsel %vm4470_vm11, %v4469_v1, %v5745_v0  ;;  %v8916_v37 = vld [vmem:[#allocation24_spill] sm:$0xff] }
 0x882   : > { %v4494_v14 = vpack.c.bf16 %v4486_v29, %v4485_v54  ;;  %v4442_v1 = vsel %vm1470_vm9, %v8916_v37, %v5760_v17  ;;  %v5769_v54 = vunpack.i.l.bf16 %v5768_v50  ;;  %v8920_v50 = vld [vmem:[#allocation20_spill] sm:$0xff] }
 0x883   : > { %v4438_v4 = vsel %vm1470_vm9, %v8920_v50, %v5790_v22 }
 0x884   : > { %4506 = vmatpush.bf16.msrb.mxu0 %v4494_v14 }
 0x886   : > { %v5748_v60 = vpop.permute.xlu1 %5747 }
 0x887   : > { %v5750_v53 = vunpack.i.h.bf16 %v5748_v60  ;;  %v5749_v15 = vunpack.i.l.bf16 %v5748_v60 }
 0x888   : > { %4507 = vmatpush.bf16.msrb.mxu0 %v4493_v8  ;;  %v4496_v8 = vshrl.u32 %v4495_v34, 7 }
 0x889   : > { %v4460_v6 = vsel %vm4453_vm10, %v4443_v44, %v5749_v15  ;;  %v4461_v55 = vsel %vm4453_vm10, %v4444_v49, %v5750_v53  ;;  %v5798_v53 = vpop.permute.xlu2 %5797 }
 0x88a   : > { %v4477_v35 = vsel %vm4470_vm11, %v4460_v6, %v5754_v27  ;;  %v4478_v3 = vsel %vm4470_vm11, %v4461_v55, %v5755_v7  ;;  %v4499_v42 = vadd.s32 %v4498_v11, %v4496_v8  ;;  %v5800_v25 = vunpack.i.h.bf16 %v5798_v53  ;;  %v4505_v6 = vld [vmem:[#allocation2] sm:$0xff] }
 0x88b   : > { %v4490_v30 = vpack.c.bf16 %v4478_v3, %v4477_v35  ;;  %v5799_v49 = vunpack.i.l.bf16 %v5798_v53 }
 0x88c   : > { %4508 = vmatpush.bf16.msrb.mxu0 %v4492_v56  ;;  %v4437_v56 = vsel %vm1470_vm9, %v8921_v58, %v5789_v61  ;;  %vm4502_vm12 = vcmp.eq.s32.totalorder %v4499_v42, %v5805_v47 }
 0x88d   : > { %vm5521_vm13 = vmpackc.low %vm4502_vm12, %vm4502_vm12 }
 0x88e   : > { %v5763_v13 = vpop.permute.xlu1 %5762 }
 0x88f   : > { %v5765_v0 = vunpack.i.h.bf16 %v5763_v13  ;;  %v5764_v51 = vunpack.i.l.bf16 %v5763_v13 }
 0x890   : > { %4509 = vmatpush.bf16.msrb.mxu0 %v4491_v39 }
 0x891   : > { %v4458_v40 = vsel %vm4453_vm10, %v4441_v59, %v5764_v51  ;;  %v4459_v29 = vsel %vm4453_vm10, %v4442_v1, %v5765_v0 }
 0x892   : > { %v4475_v52 = vsel %vm4470_vm11, %v4458_v40, %v5769_v54  ;;  %v4476_v14 = vsel %vm4470_vm11, %v4459_v29, %v5770_v63 }
 0x893   : > { %v4489_v18 = vpack.c.bf16 %v4476_v14, %v4475_v52 }
 0x894   : > { %4510 = vmatpush.bf16.msrb.mxu0 %v4490_v30 }
 0x896   : > { %v5778_v26 = vpop.permute.xlu1 %5777 }
 0x897   : > { %v5780_v2 = vunpack.i.h.bf16 %v5778_v26  ;;  %v5779_v20 = vunpack.i.l.bf16 %v5778_v26 }
 0x898   : > { %4511 = vmatpush.bf16.msrb.mxu0 %v4489_v18 }
 0x899   : > { %v4456_v46 = vsel %vm4453_vm10, %v4439_v45, %v5779_v20  ;;  %v4457_v32 = vsel %vm4453_vm10, %v4440_v31, %v5780_v2 }
 0x89a   : > { %v4473_v24 = vsel %vm4470_vm11, %v4456_v46, %v5784_v21  ;;  %v4474_v60 = vsel %vm4470_vm11, %v4457_v32, %v5785_v43 }
 0x89b   : > { %v4488_v38 = vpack.c.bf16 %v4474_v60, %v4473_v24 }
 0x89d   : > { %4512 = vmatpush.bf16.msrb.mxu0 %v4488_v38 }
 0x89e   : > { %v5793_v15 = vpop.permute.xlu1 %5792 }
 0x89f   : > { %v5795_v36 = vunpack.i.h.bf16 %v5793_v15  ;;  %v5794_v9 = vunpack.i.l.bf16 %v5793_v15 }
 0x8a1   : > { %v4454_v16 = vsel %vm4453_vm10, %v4437_v56, %v5794_v9  ;;  %v4455_v44 = vsel %vm4453_vm10, %v4438_v4, %v5795_v36 }
 0x8a2   : > { %v4471_v10 = vsel %vm4470_vm11, %v4454_v16, %v5799_v49  ;;  %v4472_v57 = vsel %vm4470_vm11, %v4455_v44, %v5800_v25 }
 0x8a3   : > { %v4487_v17 = vpack.c.bf16 %v4472_v57, %v4471_v10 }
 0x8a5   : > { %4513 = vmatpush.bf16.msrb.mxu0 %v4487_v17 }
 0x8a8   : > { %5522 = vmatmul.msk.bf16.vlgmr.msrb.gmra.mxu0 %vm5521_vm13, %v6226_v23 }
 0x925   : > { %v4515_v55 = vpop.f32.mrf.mxu0 }
 0x926   : > { %v4519_v7 = vadd.f32 %v4515_v55, %v4505_v6 }
 0x928   : > { %4521 = vst.msk [vmem:[#allocation2] sm:$0xff] %vm4520_vm14, %v4519_v7 }
 0x929   : > { %4525 = sbr.rel (%p5523_p3) target bundleno = 3613 (0xe1d), region = 135 }
 0x92d   : > { %v4517_v27 = vpop.f32.mrf.mxu0 }
 0x92e   : > { %v4569_v39 = vld [vmem:[%s8720_s5 + $0x2c] sm:$0x3]  ;;  %v4566_v5 = vld [vmem:[%s8720_s5 + $0x28] sm:$0x3]  ;;  %v4667_v3 = vld [vmem:[%s8720_s5 + $0x30] sm:$0xf] }
 0x92f   : > { %v4526_v13 = vld [vmem:[#allocation2] sm:$0xff]  ;;  %v4577_v0 = vsel %vm905_vm1, %v4569_v39, 0  ;;  %v4604_v51 = vsel %vm905_vm1, %v4566_v5, 0  ;;  %v4672_v62 = vsel %vm1495_vm6, %v4667_v3, 0  ;;  %v5525_v54 = vld [vmem:[%s6447_s13 + $0x10] sm:$0xff]  ;;  %v5524_v30 = vld [vmem:[%s6447_s13 + $0x8] sm:$0xff] }
 0x930   : > { %4544 = vrot.lane.b32.xlu1 %v4526_v13, %s6227_s15  ;;  %4535 = vrot.lane.b32.xlu0 %v4526_v13, %s6228_s20  ;;  %v4528_v35 = vld [vmem:[%s6447_s13] sm:$0xff]  ;;  %v4712_v22 = vld [vmem:[%s8720_s5 + $0x3c] sm:$0xf] }
 0x931   : > { %4586 = vmatpush.bf16.msra.mxu0 %v4577_v0  ;;  %4613 = vmatpush.bf16.msra.mxu1 %v4604_v51  ;;  %v4527_v37 = vld [vmem:[%s6435_s26] sm:$0xff]  ;;  %v4720_v61 = vsel %vm1495_vm6, %v4712_v22, 0  ;;  %v4644_v53 = vld [vmem:[%s8720_s5 + $0x38] sm:$0xf]  ;;  %v4689_v16 = vld [vmem:[%s8720_s5 + $0x34] sm:$0x3] }
 0x932   : > { %v4533_v59 = vmul.f32 %v4527_v37, %v4526_v13  ;;  %4681 = vmatpush.bf16.msra.mxu3 %v4672_v62  ;;  %v4649_v15 = vsel %vm1495_vm6, %v4644_v53, 0  ;;  %v4694_v57 = vsel %vm905_vm1, %v4689_v16, 0 }
 0x933   : > { %4658 = vmatpush.bf16.msra.mxu2 %v4649_v15 }
 0x934   : > { %v4666_v29 = vpack.c.bf16 %v4533_v59, %v4533_v59 }
 0x936   : > { %5531 = vmatmul.msk.bf16.vlgmr.msra.gmra.mxu3 %vm1470_vm9, %v4666_v29 }
 0x937   : > { %4729 = vmatpush.bf16.msrb.mxu3 %v4720_v61  ;;  %4703 = vmatpush.bf16.msrb.mxu2 %v4694_v57 }
 0x938   : > { %4539 = vrot.lane.b32.xlu0 %v4526_v13, %s6229_s22 }
 0x9a2   : > { %v4536_v1 = vpop.permute.xlu0 %4535  ;;  %v4545_v40 = vpop.permute.xlu1 %4544 }
 0x9a3   : > { %v4538_v63 = vmul.f32 %v4536_v1, %v4528_v35  ;;  %v4558_v33 = vmul.f32 %v5525_v54, %v4536_v1  ;;  %v4559_v52 = vmul.f32 %v4545_v40, %v4528_v35  ;;  %v4555_v14 = vmul.f32 %v5524_v30, %v4545_v40 }
 0x9a4   : > { %v4549_v12 = vadd.f32 %v4536_v1, %v4528_v35  ;;  %v4547_v2 = vmul.f32 %v5525_v54, %v4545_v40  ;;  %v4551_v32 = vadd.f32 %v5525_v54, %v4545_v40  ;;  %v4562_v24 = vmul.f32 %v5524_v30, %v4536_v1 }
 0x9a5   : > { %v4560_v20 = vsub.f32 %v4558_v33, %v4559_v52 }
 0x9a6   : > { %v4552_v41 = vmul.f32 0.5, %v4549_v12  ;;  %v4554_v8 = vmul.f32 0.5, %v4551_v32  ;;  %v5590_v12 = vld [vmem:[%s8720_s5 + $0x40] sm:$0xff] }
 0x9a7   : > { %4780 = vmatpush.bf16.msrb.mxu0 %v5590_v12 }
 0x9a8   : > { %v4565_v11 = vpack.c.bf16 %v4554_v8, %v4554_v8 }
 0x9aa   : > { %v4540_v48 = vpop.permute.xlu0 %4539 }
 0x9ab   : > { %v4542_v26 = vmul.f32 %v5524_v30, %v4540_v48  ;;  %v4550_v18 = vadd.f32 %v5524_v30, %v4540_v48  ;;  %v4556_v34 = vmul.f32 %v5525_v54, %v4540_v48  ;;  %v4561_v46 = vmul.f32 %v4540_v48, %v4528_v35 }
 0x9ad   : > { %v4543_v28 = vadd.f32 %v4542_v26, %v4538_v63  ;;  %v4557_v31 = vsub.f32 %v4555_v14, %v4556_v34  ;;  %v4553_v45 = vmul.f32 0.5, %v4550_v18  ;;  %v4563_v60 = vsub.f32 %v4561_v46, %v4562_v24  ;;  %v6126_v26 = vld [vmem:[%s8721_s6 + $0x4] ss:$0 sm:$0xff] }
 0x9af   : > { %v4567_v43 = vpack.c.bf16 %v4560_v20, %v4557_v31  ;;  %v4564_v21 = vpack.c.bf16 %v4553_v45, %v4552_v41  ;;  %v4548_v19 = vadd.f32 %v4547_v2, %v4543_v28  ;;  %v4568_v38 = vpack.c.bf16 %v4563_v60, %v4563_v60  ;;  %v5591_v31 = vld [vmem:[%s8720_s5 + $0x4c] sm:$0xff] }
 0x9b1   : > { %5526 = vmatmul.msk.bf16.vlgmr.msra.gmra.mxu0 %vm832_vm2, %v4567_v43  ;;  %5528 = vmatmul.msk.bf16.vlgmr.msra.gmra.mxu1 %vm832_vm2, %v4564_v21  ;;  %v4688_v29 = vpack.c.bf16 %v4548_v19, %v4548_v19 }
 0x9b2   : > { %4900 = vmatpush.bf16.msra.mxu0 %v5591_v31 }
 0x9b9   : > { %v4683_v0 = vpop.f32.mrf.mxu3 }
 0x9c1   : > { %5527 = vmatmul.msk.bf16.gmra.mxu0 %vm832_vm2, %v4568_v38  ;;  %5529 = vmatmul.msk.bf16.gmra.mxu1 %vm832_vm2, %v4565_v11  ;;  %v4685_v1 = vpop.f32.mrf.mxu3 }
 0xa2e   : > { %v4588_v42 = vpop.f32.mrf.mxu0  ;;  %v4615_v47 = vpop.f32.mrf.mxu1 }
 0xa2f   : > { %v4616_v50 = vadd.f32 %v4615_v47, %v4588_v42  ;;  %v4811_v47 = vld [vmem:[%s8720_s5 + $0x48] sm:$0xf] }
 0xa31   : > { %v4624_v44 = vmul.f32 %v4616_v50, %v4616_v50 }
 0xa36   : > { %v4590_v36 = vpop.f32.mrf.mxu0  ;;  %v4617_v9 = vpop.f32.mrf.mxu1 }
 0xa37   : > { %v4618_v4 = vadd.f32 %v4617_v9, %v4590_v36  ;;  %v4819_v36 = vsel %vm1495_vm6, %v4811_v47, 0  ;;  %v6127_v9 = vld [vmem:[%s8721_s6 + $0x5] ss:$0 sm:$0xff] }
 0xa38   : > { %4828 = vmatpush.bf16.msrb.mxu1 %v4819_v36 }
 0xa39   : > { %v4710_v58 = vpack.c.bf16 %v4618_v4, %v4616_v50  ;;  %v4625_v56 = vmul.f32 %v4618_v4, %v4618_v4 }
 0xa3b   : > { %5533 = vmatmul.msk.bf16.vlgmr.msrb.gmra.mxu3 %vm1470_vm9, %v4710_v58  ;;  %v4626_v17 = vadd.f32 %v4625_v56, %v4624_v44 }
 0xa3e   : > { %v4593_v25 = vpop.f32.mrf.mxu0  ;;  %v4620_v49 = vpop.f32.mrf.mxu1 }
 0xa3f   : > { %v4621_v10 = vadd.f32 %v4620_v49, %v4593_v25 }
 0xa41   : > { %v4627_v23 = vmul.f32 %v4621_v10, %v4621_v10  ;;  %v4711_v13 = vpack.c.bf16 %v4621_v10, %v4621_v10 }
 0xa43   : > { %v4628_v6 = vadd.f32 %v4627_v23, %v4626_v17 }
 0xa45   : > { %v4629_v55 = vmax.f32 %v4628_v6, 1e-05 }
 0xa46   : > { %v4595_v7 = vpop.f32.mrf.mxu0  ;;  %v4622_v27 = vpop.f32.mrf.mxu1 }
 0xa47   : > { %6130 = vrsqrt.f32 %v4629_v55  ;;  %vm4637_vm1 = vcmp.eq.f32.partialorder %v4629_v55, inf  ;;  %v4640_v59 = vand.u32 2147483648, %v4629_v55  ;;  %vm4639_vm15 = vcmp.eq.f32.partialorder %v4629_v55, 0.0 }
 0xa4b   : > { %5534 = vmatmul.msk.bf16.gmra.mxu3 %vm1470_vm9, %v4711_v13 }
 0xa4d   : > { %v6131_v39 = vpop.eup %6130 }
 0xa4e   : > { %v4631_v5 = vmul.f32 %v6131_v39, %v4629_v55 }
 0xa50   : > { %v4632_v51 = vmul.f32 %v6131_v39, %v4631_v5 }
 0xa52   : > { %v4633_v35 = vmul.f32 0.5, %v4632_v51 }
 0xa54   : > { %v4634_v3 = vsub.f32 1.5, %v4633_v35 }
 0xa56   : > { %v4635_v37 = vmul.f32 %v6131_v39, %v4634_v3 }
 0xa58   : > { %v4636_v62 = vmul.f32 %v4635_v37, %v4629_v55  ;;  %v4859_v37 = vld [vmem:[%s8720_s5 + $0x54] sm:$0xf] }
 0xa59   : > { %v4864_v1 = vsel %vm1495_vm6, %v4859_v37, 0 }
 0xa5a   : > { %v4638_v63 = vsel %vm4637_vm1, %v4629_v55, %v4636_v62 }
 0xa5b   : > { %v4641_v54 = vsel %vm4639_vm15, %v4640_v59, %v4638_v63  ;;  %vm4960_vm15 = vcmask 7168  }
 0xa5c   : > { %v4643_v40 = vpack.c.bf16 %v4641_v54, %v4641_v54  ;;  %v4909_v54 = vld [vmem:[%s8720_s5 + $0x58] sm:$0xf] }
 0xa5e   : > { %5530 = vmatmul.msk.bf16.vlgmr.msra.gmra.mxu2 %vm1470_vm9, %v4643_v40 }
 0xa5f   : > { %4873 = vmatpush.bf16.msra.mxu2 %v4864_v1 }
 0xa6e   : > { %5532 = vmatmul.msk.bf16.vlgmr.msrb.gmra.mxu2 %vm832_vm2, %v4688_v29  ;;  %v4917_v29 = vsel %vm1495_vm6, %v4909_v54, 0  ;;  %vm4964_vm6 = vcmask 1040384  }
 0xa6f   : > { %4926 = vmatpush.bf16.msrb.mxu2 %v4917_v29 }
 0xabe   : > { %v8633_v30 = vpop.f32.mrf.mxu3 }
 0xac6   : > { %v8635_v33 = vpop.f32.mrf.mxu3 }
 0xace   : > { %v8637_v52 = vpop.f32.mrf.mxu3 }
 0xad6   : > { %v4738_v14 = vpop.f32.mrf.mxu3 }
 0xae1   : > { %v4660_v48 = vpop.f32.mrf.mxu2 }
 0xae2   : > { %v4665_v34 = vadd.f32 %v6126_v26, %v4660_v48 }
 0xae4   : > { %v4687_v2 = vadd.f32 %v4683_v0, %v4665_v34 }
 0xae9   : > { %v4662_v18 = vpop.f32.mrf.mxu2 }
 0xaf1   : > { %v4705_v20 = vpop.f32.mrf.mxu2 }
 0xaf2   : > { %v4709_v28 = vadd.f32 %v4705_v20, %v4687_v2 }
 0xaf4   : > { %v5535_v41 = vmul.f32 -1.442695, %v4709_v28  ;;  %v4808_v15 = vmax.f32 %v4709_v28, 0.0 }
 0xaf6   : > { %6132 = vpow2.f32 %v5535_v41  ;;  %v4881_v42 = vpack.c.bf16 %v4808_v15, %v4808_v15 }
 0xaf9   : > { %v4707_v45 = vpop.f32.mrf.mxu2 }
 0xafc   : > { %v6133_v43 = vpop.eup %6132 }
 0xafd   : > { %v4743_v21 = vadd.f32 1.0, %v6133_v43 }
 0xaff   : > { %6134 = vrcp.f32 %v4743_v21  ;;  %v4755_v24 = vand.u32 2147483648, %v4743_v21  ;;  %v4753_v8 = vand.u32 2147483647, %v4743_v21  ;;  %vm4749_vm3 = vweird.f32 %v4743_v21 }
 0xb01   : > { %v4756_v11 = vor.u32 1.1754944e-38, %v4755_v24  ;;  %vm4754_vm4 = vcmp.eq.f32.partialorder %v4753_v8, 8.507059e+37  ;;  %v6230_v24 = vmov 0   ;;  %v6128_v8 = vld [vmem:[%s8721_s6 + $0x6] ss:$0 sm:$0xff] }
 0xb05   : > { %v6135_v19 = vpop.eup %6134 }
 0xb06   : > { %v4745_v46 = vmul.f32 %v6135_v19, %v4743_v21  ;;  %vm4750_vm2 = vweird.f32 %v6135_v19 }
 0xb07   : > { %vm4751_vm0 = vmor %vm4749_vm3, %vm4750_vm2 }
 0xb08   : > { %v4746_v32 = vsub.f32 1.0, %v4745_v46 }
 0xb0a   : > { %v4747_v60 = vmul.f32 %v6135_v19, %v4746_v32  ;;  %v4957_v32 = vld [vmem:[%s8720_s5 + $0x5c] sm:$0x1] }
 0xb0c   : > { %v4748_v38 = vadd.f32 %v6135_v19, %v4747_v60  ;;  %v4966_v60 = vsel %vm4964_vm6, 65535, %v6230_v24 }
 0xb0e   : > { %v4752_v22 = vsel %vm4751_vm0, %v6135_v19, %v4748_v38  ;;  %v4968_v38 = vand.u32 %v4966_v60, %v4957_v32 }
 0xb0f   : > { %v4757_v61 = vsel %vm4754_vm4, %v4756_v11, %v4752_v22 }
 0xb10   : > { %v4759_v53 = vpack.c.bf16 %v4757_v61, %v4757_v61  ;;  %4977 = vmatpush.bf16.msra.mxu3 %v4968_v38 }
 0xb12   : > { %5540 = vmatmul.msk.bf16.vlgmr.msrb.gmra.mxu0 %vm4470_vm11, %v4759_v53 }
 0xb22   : > { %5549 = vmatmul.msk.bf16.vlgmr.msra.gmra.mxu0 %vm4470_vm11, %v4881_v42 }
 0xb8f   : > { %v4782_v50 = vpop.f32.mrf.mxu0 }
 0xb90   : > { %v4783_v4 = vadd.f32 %v6127_v9, %v4782_v50 }
 0xb92   : > { %v5541_v58 = vmul.f32 -1.442695, %v4783_v4 }
 0xb94   : > { %6136 = vpow2.f32 %v5541_v58 }
 0xb97   : > { %v4784_v56 = vpop.f32.mrf.mxu0 }
 0xb9a   : > { %v6137_v25 = vpop.eup %6136 }
 0xb9b   : > { %v4789_v49 = vadd.f32 1.0, %v6137_v25 }
 0xb9d   : > { %6138 = vrcp.f32 %v4789_v49  ;;  %v4801_v23 = vand.u32 2147483648, %v4789_v49  ;;  %v4799_v55 = vand.u32 2147483647, %v4789_v49  ;;  %vm4795_vm7 = vweird.f32 %v4789_v49 }
 0xb9f   : > { %v8657_v16 = vpop.f32.mrf.mxu0  ;;  %v4802_v27 = vor.u32 1.1754944e-38, %v4801_v23  ;;  %vm4800_vm10 = vcmp.eq.f32.partialorder %v4799_v55, 8.507059e+37  ;;  %v6129_v55 = vld [vmem:[%s8721_s6 + $0x7] ss:$0 sm:$0xff] }
 0xba3   : > { %v6139_v44 = vpop.eup %6138 }
 0xba4   : > { %v4791_v10 = vmul.f32 %v6139_v44, %v4789_v49  ;;  %vm4796_vm5 = vweird.f32 %v6139_v44 }
 0xba5   : > { %vm4797_vm8 = vmor %vm4795_vm7, %vm4796_vm5  ;;  %vm5014_vm5 = vcmask 15360   ;;  %vm5016_vm7 = vcmask 23552  }
 0xba6   : > { %v4792_v57 = vsub.f32 1.0, %v4791_v10 }
 0xba7   : > { %v4904_v17 = vpop.f32.mrf.mxu0 }
 0xba8   : > { %v4793_v6 = vmul.f32 %v6139_v44, %v4792_v57 }
 0xbaa   : > { %v4794_v7 = vadd.f32 %v6139_v44, %v4793_v6 }
 0xbac   : > { %v4798_v13 = vsel %vm4797_vm8, %v6139_v44, %v4794_v7 }
 0xbad   : > { %v4803_v39 = vsel %vm4800_vm10, %v4802_v27, %v4798_v13 }
 0xbae   : > { %v4805_v5 = vmul.f32 %v4803_v39, %v8633_v30  ;;  %v4806_v0 = vmul.f32 %v4803_v39, %v8635_v33  ;;  %v4807_v35 = vmul.f32 %v4803_v39, %v8637_v52 }
 0xbb0   : > { %v4809_v51 = vpack.c.bf16 %v4806_v0, %v4805_v5  ;;  %v4810_v3 = vpack.c.bf16 %v4807_v35, %v4807_v35 }
 0xbb2   : > { %5542 = vmatmul.msk.bf16.vlgmr.msrb.gmra.mxu1 %vm1470_vm9, %v4809_v51 }
 0xbc2   : > { %5543 = vmatmul.msk.bf16.gmra.mxu1 %vm1470_vm9, %v4810_v3 }
 0xc2f   : > { %v4830_v62 = vpop.f32.mrf.mxu1 }
 0xc30   : > { %v4839_v40 = vmul.f32 %v4830_v62, %v4830_v62 }
 0xc37   : > { %v4832_v59 = vpop.f32.mrf.mxu1 }
 0xc38   : > { %v4840_v63 = vmul.f32 %v4832_v59, %v4832_v59  ;;  %v4907_v19 = vpack.c.bf16 %v4832_v59, %v4830_v62 }
 0xc3a   : > { %v4841_v33 = vadd.f32 %v4840_v63, %v4839_v40 }
 0xc3f   : > { %v4835_v30 = vpop.f32.mrf.mxu1 }
 0xc40   : > { %v4842_v52 = vmul.f32 %v4835_v30, %v4835_v30  ;;  %v4908_v46 = vpack.c.bf16 %v4835_v30, %v4835_v30 }
 0xc42   : > { %v4843_v14 = vadd.f32 %v4842_v52, %v4841_v33 }
 0xc44   : > { %v4844_v12 = vmax.f32 %v4843_v14, 1e-05 }
 0xc46   : > { %6140 = vrsqrt.f32 %v4844_v12  ;;  %vm4852_vm11 = vcmp.eq.f32.partialorder %v4844_v12, inf  ;;  %v4855_v41 = vand.u32 2147483648, %v4844_v12  ;;  %vm4854_vm12 = vcmp.eq.f32.partialorder %v4844_v12, 0.0 }
 0xc47   : > { %v4837_v48 = vpop.f32.mrf.mxu1 }
 0xc4c   : > { %v6141_v26 = vpop.eup %6140 }
 0xc4d   : > { %v4846_v18 = vmul.f32 %v6141_v26, %v4844_v12 }
 0xc4f   : > { %v4847_v34 = vmul.f32 %v6141_v26, %v4846_v18 }
 0xc51   : > { %v4848_v2 = vmul.f32 0.5, %v4847_v34 }
 0xc53   : > { %v4849_v20 = vsub.f32 1.5, %v4848_v2 }
 0xc55   : > { %v4850_v28 = vmul.f32 %v6141_v26, %v4849_v20 }
 0xc57   : > { %v4851_v31 = vmul.f32 %v4850_v28, %v4844_v12 }
 0xc59   : > { %v4853_v45 = vsel %vm4852_vm11, %v4844_v12, %v4851_v31 }
 0xc5a   : > { %v4856_v43 = vsel %vm4854_vm12, %v4855_v41, %v4853_v45 }
 0xc5b   : > { %v4858_v21 = vpack.c.bf16 %v4856_v43, %v4856_v43 }
 0xc5d   : > { %5544 = vmatmul.msk.bf16.vlgmr.msra.gmra.mxu2 %vm1470_vm9, %v4858_v21 }
 0xc6d   : > { %5550 = vmatmul.msk.bf16.vlgmr.msrb.gmra.mxu2 %vm1470_vm9, %v4907_v19 }
 0xc7d   : > { %5551 = vmatmul.msk.bf16.gmra.mxu2 %vm1470_vm9, %v4908_v46 }
 0xce0   : > { %v4875_v11 = vpop.f32.mrf.mxu2 }
 0xce1   : > { %v4880_v22 = vadd.f32 %v6128_v8, %v4875_v11 }
 0xce3   : > { %v4906_v61 = vadd.f32 %v8657_v16, %v4880_v22 }
 0xce5   : > { %v5552_v53 = vmul.f32 -1.442695, %v4906_v61 }
 0xce7   : > { %6142 = vpow2.f32 %v5552_v53 }
 0xce8   : > { %v4877_v15 = vpop.f32.mrf.mxu2 }
 0xced   : > { %v6143_v42 = vpop.eup %6142 }
 0xcee   : > { %v4940_v47 = vadd.f32 1.0, %v6143_v42 }
 0xcf0   : > { %6144 = vrcp.f32 %v4940_v47  ;;  %v4928_v36 = vpop.f32.mrf.mxu2  ;;  %v4952_v56 = vand.u32 2147483648, %v4940_v47  ;;  %v4950_v49 = vand.u32 2147483647, %v4940_v47  ;;  %vm4946_vm13 = vweird.f32 %v4940_v47 }
 0xcf2   : > { %v4953_v10 = vor.u32 1.1754944e-38, %v4952_v56  ;;  %vm4951_vm1 = vcmp.eq.f32.partialorder %v4950_v49, 8.507059e+37 }
 0xcf6   : > { %v6145_v9 = vpop.eup %6144 }
 0xcf7   : > { %v4942_v50 = vmul.f32 %v6145_v9, %v4940_v47  ;;  %vm4947_vm9 = vweird.f32 %v6145_v9 }
 0xcf8   : > { %v4930_v4 = vpop.f32.mrf.mxu2  ;;  %vm4948_vm14 = vmor %vm4946_vm13, %vm4947_vm9 }
 0xcf9   : > { %v4943_v58 = vsub.f32 1.0, %v4942_v50 }
 0xcfb   : > { %v4944_v25 = vmul.f32 %v6145_v9, %v4943_v58 }
 0xcfd   : > { %v4945_v44 = vadd.f32 %v6145_v9, %v4944_v25 }
 0xcff   : > { %v4949_v16 = vsel %vm4948_vm14, %v6145_v9, %v4945_v44 }
 0xd00   : > { %v4933_v57 = vpop.f32.mrf.mxu2  ;;  %v4954_v17 = vsel %vm4951_vm1, %v4953_v10, %v4949_v16 }
 0xd01   : > { %v4956_v23 = vpack.c.bf16 %v4954_v17, %v4954_v17 }
 0xd03   : > { %5553 = vmatmul.msk.bf16.vlgmr.msra.gmra.mxu3 %vm4960_vm15, %v4956_v23 }
 0xd08   : > { %v4935_v6 = vpop.f32.mrf.mxu2 }
 0xd86   : > { %v4979_v7 = vpop.f32.mrf.mxu3 }
 0xd87   : > { %v4980_v27 = vadd.f32 %v6129_v55, %v4979_v7 }
 0xd89   : > { %v5554_v13 = vmul.f32 -1.442695, %v4980_v27 }
 0xd8b   : > { %6146 = vpow2.f32 %v5554_v13 }
 0xd8e   : > { %v4981_v39 = vpop.f32.mrf.mxu3 }
 0xd91   : > { %v6147_v5 = vpop.eup %6146 }
 0xd92   : > { %v4986_v0 = vadd.f32 1.0, %v6147_v5 }
 0xd94   : > { %6148 = vrcp.f32 %v4986_v0  ;;  %v4998_v37 = vand.u32 2147483648, %v4986_v0  ;;  %v4996_v62 = vand.u32 2147483647, %v4986_v0  ;;  %vm4992_vm3 = vweird.f32 %v4986_v0 }
 0xd96   : > { %v4999_v63 = vor.u32 1.1754944e-38, %v4998_v37  ;;  %vm4997_vm4 = vcmp.eq.f32.partialorder %v4996_v62, 8.507059e+37 }
 0xd9a   : > { %v6149_v51 = vpop.eup %6148 }
 0xd9b   : > { %v4988_v35 = vmul.f32 %v6149_v51, %v4986_v0  ;;  %vm4993_vm2 = vweird.f32 %v6149_v51 }
 0xd9c   : > { %vm4994_vm0 = vmor %vm4992_vm3, %vm4993_vm2 }
 0xd9d   : > { %v4989_v3 = vsub.f32 1.0, %v4988_v35 }
 0xd9f   : > { %v4990_v1 = vmul.f32 %v6149_v51, %v4989_v3 }
 0xda1   : > { %v4991_v59 = vadd.f32 %v6149_v51, %v4990_v1 }
 0xda3   : > { %v4995_v54 = vsel %vm4994_vm0, %v6149_v51, %v4991_v59 }
 0xda4   : > { %v5000_v40 = vsel %vm4997_vm4, %v4999_v63, %v4995_v54 }
 0xda5   : > { %v5004_v29 = vmul.f32 %v5000_v40, %v4933_v57  ;;  %v5003_v30 = vmul.f32 %v5000_v40, %v4930_v4  ;;  %v5002_v33 = vmul.f32 %v5000_v40, %v4928_v36 }
 0xda7   : > { %5010 = vrot.lane.b32.xlu2 %v5004_v29, %s6231_s17  ;;  %5006 = vrot.lane.b32.xlu1 %v5003_v30, %s6232_s4 }
 0xe01   : > { %v5011_v14 = vpop.permute.xlu2 %5010 }
 0xe19   : > { %v5007_v52 = vpop.permute.xlu1 %5006 }
 0xe1a   : > { %v5013_v12 = vsel %vm4960_vm15, %v5002_v33, %v5007_v52 }
 0xe1b   : > { %v5015_v48 = vsel %vm5014_vm5, %v5013_v12, %v5011_v14 }
 0xe1c   : > { %5017 = vst.msk [vmem:[%s6440_s11] sm:$0xff] %vm5016_vm7, %v5015_v48 }
 0xe1d PF: > { %s17_s9 = sadd.s32 1, %s6220_s9   ;;  %s8922_s30 = sld [smem:[#allocation9_spill]] }
 0xe1e   : > { %p14_p4 = scmp.ge.s32.totalorder %s17_s9, 6   ;;  %s8923_s28 = sld [smem:[#allocation5_spill]] }
 0xe1f   : > { %s8924_s29 = sld [smem:[#allocation6_spill]]  ;;  %s8927_s24 = smov %s6192_s25 }
 0xe20   : > { %s8925_s8 = sld [smem:[#allocation7_spill]]  ;;  %s8928_s25 = smov %s6339_s16 }
 0xe21   : > { %s8926_s15 = sld [smem:[#allocation8_spill]]  ;;  %s8929_s26 = smov %s6200_s27 }
 0xe23   : > { %s8930_s27 = smov %s8922_s30  ;;  %16 = sbr.rel (!%p14_p4) target bundleno = 8 (0x8), region = 191 }
 0xe26   : > { %s8931_s30 = smov %s8925_s8 }
 0xe27   : > { %s8932_s8 = smov %s8926_s15 }

</bundles_post_ra>
